<compile_context>
chip_gen: v7x
topology: tpu7x:2x2x1
jax: 0.10.0
libtpu: 0.0.40
codegen_flags: <defaults>
</compile_context>

<pallas_src>
import math
from functools import partial

import jax
import jax.numpy as jnp
from jax.experimental import pallas as pl
from jax.experimental.pallas import tpu as pltpu


def _self_attn_layer_kernel(
    tgt_ref, pos_ref,
    w_qk_ref, w_v_ref, w_o_ref,
    b_qk_ref, b_v_ref, b_o_ref,
    gamma_ref, beta_ref,
    out_ref,
    attn_scratch,
    *, nhead: int, eps: float,
):
    # tgt_ref / pos_ref / out_ref: (Bb, L, E) block of batch elements.
    Bb, L, E = tgt_ref.shape
    hd = E // nhead

    x = tgt_ref[...]                           # (Bb, L, E) f32  (value + residual source)
    qk_in = x + pos_ref[...]                   # (Bb, L, E) f32  (tgt + query_pos)

    # Flatten batch into the matmul M dimension (L % 8 == 0 -> layout-preserving).
    x2 = x.reshape(Bb * L, E)
    qk2 = qk_in.reshape(Bb * L, E)

    # --- fused q/k projection and v projection (bf16 MXU, f32 accumulation) ---
    qk = jnp.dot(qk2.astype(jnp.bfloat16), w_qk_ref[...],
                 preferred_element_type=jnp.float32) + b_qk_ref[...]     # (Bb*L, 2E)
    v = jnp.dot(x2.astype(jnp.bfloat16), w_v_ref[...],
                preferred_element_type=jnp.float32) + b_v_ref[...]       # (Bb*L, E)

    # 1/sqrt(hd) is already folded into the q half of w_qk / b_qk.
    q3 = qk[:, :E].reshape(Bb, L, E).astype(jnp.bfloat16)
    k3 = qk[:, E:].reshape(Bb, L, E).astype(jnp.bfloat16)
    v3 = v.reshape(Bb, L, E).astype(jnp.bfloat16)

    # --- per-head scaled dot-product attention (batched over Bb, static head loop) ---
    for h in range(nhead):
        lo = h * hd
        qh = q3[:, :, lo:lo + hd]              # (Bb, L, hd) bf16
        kh = k3[:, :, lo:lo + hd]
        vh = v3[:, :, lo:lo + hd]
        s = jnp.einsum('bqd,bkd->bqk', qh, kh,
                       preferred_element_type=jnp.float32)               # (Bb, L, L) f32
        s = s - jnp.max(s, axis=-1, keepdims=True)
        p = jnp.exp(s)
        p = p * pl.reciprocal(jnp.sum(p, axis=-1, keepdims=True), approx=True)
        oh = jnp.einsum('bqk,bkd->bqd', p.astype(jnp.bfloat16), vh,
                        preferred_element_type=jnp.float32)              # (Bb, L, hd) f32
        attn_scratch[:, :, lo:lo + hd] = oh.astype(jnp.bfloat16)

    # --- output projection (single wide matmul over the bf16 head accumulator) ---
    attn = jnp.dot(attn_scratch[...].reshape(Bb * L, E), w_o_ref[...],
                   preferred_element_type=jnp.float32) + b_o_ref[...]    # (Bb*L, E)

    # --- residual + LayerNorm (f32) ---
    y = x2 + attn
    mu = jnp.mean(y, axis=-1, keepdims=True)
    yc = y - mu
    var = jnp.mean(yc * yc, axis=-1, keepdims=True)
    ynorm = yc * jax.lax.rsqrt(var + eps)
    out_ref[...] = (ynorm * gamma_ref[...] + beta_ref[...]).reshape(Bb, L, E)


def _pick_block_batch(N: int, L: int, target_rows: int = 256) -> int:
    """Pick a batch-block size: fill the MXU M dim (~256 rows) while keeping
    >= 2 grid steps when possible so both v7x TensorCores get work."""
    divisors = [d for d in range(1, N + 1) if N % d == 0]
    cands = [d for d in divisors if N // d >= 2] or divisors
    for d in cands:
        if d * L >= target_rows:
            return d
    return cands[-1]


def self_attention_layer(tgt, query_pos, params, *, nhead: int, eps: float = 1e-5,
                         block_batch: int | None = None):
    """tgt, query_pos: (N, L, E) float32 (batch-first). Returns (N, L, E).

    Note: the PyTorch module uses (L, N, E); keep activations batch-first end-to-end
    (or transpose once outside) to avoid extra HBM round-trips per layer.
    """
    N, L, E = tgt.shape
    assert E % nhead == 0, "d_model must be divisible by nhead"
    assert L % 8 == 0 and E % 128 == 0, "use L % 8 == 0 and E % 128 == 0 for lane/sublane density"

    Bb = _pick_block_batch(N, L) if block_batch is None else block_batch
    assert N % Bb == 0
    grid = (N // Bb,)

    w_qk, w_v, w_o = params["w_qk"], params["w_v"], params["w_o"]        # bf16
    b_qk, b_v, b_o = params["b_qk"], params["b_v"], params["b_o"]        # f32
    gamma, beta = params["gamma"], params["beta"]                        # f32

    per_batch = pl.BlockSpec((Bb, L, E), lambda b: (b, 0, 0))

    def inv(shape):  # grid-invariant (weights / biases / LN params)
        return pl.BlockSpec(shape, lambda b: (0,) * len(shape))

    kernel = partial(_self_attn_layer_kernel, nhead=nhead, eps=eps)

    # Advisory cost for XLA's scheduler.
    flops = int(8 * N * L * E * E + 4 * N * L * L * E)
    transcendentals = int(N * nhead * L * L + N * L * (nhead + 1))
    bytes_accessed = int(
        3 * N * L * E * 4
        + (w_qk.size + w_v.size + w_o.size) * 2
        + (b_qk.size + b_v.size + b_o.size + gamma.size + beta.size) * 4
    )

    # Explicit VMEM budget sized to the working set (+ headroom for intermediates).
    weight_bytes = int(w_qk.size + w_v.size + w_o.size) * 2
    bias_bytes = int(b_qk.size + b_v.size + b_o.size + gamma.size + beta.size) * 4
    act_block_bytes = Bb * L * E * 4
    vmem_limit = (
        2 * weight_bytes + 2 * bias_bytes          # double-buffered invariant operands
        + 2 * 3 * act_block_bytes                  # tgt / pos / out blocks
        + Bb * L * E * 2                           # bf16 head-output scratch
        + 8 * act_block_bytes                      # q/k/v/scores intermediates
        + (16 << 20)                               # safety margin
    )
    vmem_limit = int(min(vmem_limit, 100 * 1024 * 1024))

    out = pl.pallas_call(
        kernel,
        out_shape=jax.ShapeDtypeStruct((N, L, E), jnp.float32),
        grid_spec=pltpu.PrefetchScalarGridSpec(
            num_scalar_prefetch=0,
            grid=grid,
            in_specs=[
                per_batch, per_batch,                               # tgt, query_pos
                inv((E, 2 * E)), inv((E, E)), inv((E, E)),          # w_qk, w_v, w_o
                inv((1, 2 * E)), inv((1, E)), inv((1, E)),          # b_qk, b_v, b_o
                inv((1, E)), inv((1, E)),                           # gamma, beta
            ],
            out_specs=per_batch,
            scratch_shapes=[pltpu.VMEM((Bb, L, E), jnp.bfloat16)],  # head-output accumulator
        ),
        compiler_params=pltpu.CompilerParams(
            dimension_semantics=("parallel",),
            vmem_limit_bytes=vmem_limit,
        ),
        cost_estimate=pl.CostEstimate(
            flops=flops, transcendentals=transcendentals, bytes_accessed=bytes_accessed),
    )(tgt, query_pos, w_qk, w_v, w_o, b_qk, b_v, b_o, gamma, beta)
    return out


def init_params(key, d_model: int, nhead: int):
    """Deterministic init matching the module: xavier_uniform on >1-dim params,
    zero biases (PyTorch MHA defaults), LayerNorm weight=1 / bias=0.
    Weights are pre-transposed (x @ W), q-scaled by 1/sqrt(hd), q/k fused, and
    stored in bf16 for the MXU."""
    E = d_model
    hd = E // nhead
    k_in, k_out = jax.random.split(key, 2)
    bound_in = math.sqrt(6.0 / (3 * E + E))
    in_proj_w = jax.random.uniform(k_in, (3 * E, E), jnp.float32, -bound_in, bound_in)
    bound_out = math.sqrt(6.0 / (E + E))
    out_proj_w = jax.random.uniform(k_out, (E, E), jnp.float32, -bound_out, bound_out)

    scale = 1.0 / math.sqrt(hd)
    wq = in_proj_w[0 * E:1 * E].T * scale      # fold attention scale into q projection
    wk = in_proj_w[1 * E:2 * E].T
    wv = in_proj_w[2 * E:3 * E].T
    wo = out_proj_w.T

    zeros_e = jnp.zeros((1, E), jnp.float32)
    return {
        "w_qk": jnp.concatenate([wq, wk], axis=1).astype(jnp.bfloat16),   # (E, 2E)
        "w_v": wv.astype(jnp.bfloat16),                                   # (E, E)
        "w_o": wo.astype(jnp.bfloat16),                                   # (E, E)
        "b_qk": jnp.zeros((1, 2 * E), jnp.float32),  # (q-half already includes the scale: 0 * scale)
        "b_v": zeros_e, "b_o": zeros_e,
        "gamma": jnp.ones((1, E), jnp.float32),
        "beta": zeros_e,
    }


def _reference(tgt, query_pos, params, *, nhead: int, eps: float = 1e-5):
    """Pure-JAX reference of forward_post using the same prepared params and the same
    bf16-matmul / f32-accumulate precision policy as the kernel."""
    N, L, E = tgt.shape
    hd = E // nhead
    x = tgt.astype(jnp.float32)
    qk_in = x + query_pos.astype(jnp.float32)

    def mm(a, w, b):
        r = jnp.dot(a.reshape(-1, a.shape[-1]).astype(jnp.bfloat16), w,
                    preferred_element_type=jnp.float32)
        return r.reshape(*a.shape[:-1], -1) + b

    qk = mm(qk_in, params["w_qk"], params["b_qk"])     # (N, L, 2E)
    v = mm(x, params["w_v"], params["b_v"])            # (N, L, E)
    q, k = qk[..., :E], qk[..., E:]

    def split(t):  # (N, L, E) -> (N, H, L, hd)
        return jnp.transpose(t.reshape(N, L, nhead, hd), (0, 2, 1, 3))

    qh, kh, vh = split(q), split(k), split(v)
    s = jnp.einsum("nhqd,nhkd->nhqk", qh.astype(jnp.bfloat16), kh.astype(jnp.bfloat16),
                   preferred_element_type=jnp.float32)   # scale already folded into w_qk
    p = jax.nn.softmax(s, axis=-1)
    o = jnp.einsum("nhqk,nhkd->nhqd", p.astype(jnp.bfloat16), vh.astype(jnp.bfloat16),
                   preferred_element_type=jnp.float32)
    o = jnp.transpose(o, (0, 2, 1, 3)).reshape(N, L, E)
    attn = mm(o, params["w_o"], params["b_o"])
    y = x + attn
    mu = jnp.mean(y, axis=-1, keepdims=True)
    var = jnp.mean((y - mu) ** 2, axis=-1, keepdims=True)
    return (y - mu) / jnp.sqrt(var + eps) * params["gamma"] + params["beta"]


if __name__ == "__main__":
    # Batch-first layout (N, L, E). Shapes chosen lane/sublane dense:
    # batch=2, seq=128 (Mask2Former uses ~100 queries), d_model=128, nhead=4.
    N, L, E, H = 2, 128, 128, 4

    key = jax.random.PRNGKey(0)
    k_tgt, k_pos, k_par = jax.random.split(key, 3)
    tgt = jax.random.normal(k_tgt, (N, L, E), jnp.float32)
    query_pos = jax.random.normal(k_pos, (N, L, E), jnp.float32)
    params = init_params(k_par, E, H)

    out = self_attention_layer(tgt, query_pos, params, nhead=H)
    out = jax.block_until_ready(out)

    ref = _reference(tgt, query_pos, params, nhead=H)
    assert out.shape == (N, L, E)
    max_err = float(jnp.max(jnp.abs(out - ref)))
    assert jnp.allclose(out, ref, atol=1e-2, rtol=1e-2), f"mismatch vs reference: {max_err}"

    print("KERNEL_OK")
</pallas_src>

<mosaic_0001>
module attributes {stable_mosaic.version = 11 : i64} {
  func.func @_self_attn_layer_kernel(%arg0: i32, %arg1: memref<1x128x128xf32, #tpu.memory_space<vmem>>, %arg2: memref<1x128x128xf32, #tpu.memory_space<vmem>>, %arg3: memref<128x256xbf16, #tpu.memory_space<vmem>>, %arg4: memref<128x128xbf16, #tpu.memory_space<vmem>>, %arg5: memref<128x128xbf16, #tpu.memory_space<vmem>>, %arg6: memref<1x256xf32, #tpu.memory_space<vmem>>, %arg7: memref<1x128xf32, #tpu.memory_space<vmem>>, %arg8: memref<1x128xf32, #tpu.memory_space<vmem>>, %arg9: memref<1x128xf32, #tpu.memory_space<vmem>>, %arg10: memref<1x128xf32, #tpu.memory_space<vmem>>, %arg11: memref<1x128x128xf32, #tpu.memory_space<vmem>>, %arg12: memref<1x128x128xbf16, #tpu.memory_space<vmem>>) attributes {dimension_semantics = [#tpu.dimension_semantics<parallel>], iteration_bounds = array<i64: 2>, scalar_prefetch = 0 : i64, scratch_operands = 1 : i64, tpu.core_type = #tpu.core_type<tc>, window_params = [{transform_indices = @transform_0, window_bounds = array<i64: 1, 128, 128>}, {transform_indices = @transform_1, window_bounds = array<i64: 1, 128, 128>}, {pipeline_mode = #tpu.pipeline_mode<synchronous>, transform_indices = @transform_2, window_bounds = array<i64: 128, 256>}, {pipeline_mode = #tpu.pipeline_mode<synchronous>, transform_indices = @transform_3, window_bounds = array<i64: 128, 128>}, {pipeline_mode = #tpu.pipeline_mode<synchronous>, transform_indices = @transform_4, window_bounds = array<i64: 128, 128>}, {pipeline_mode = #tpu.pipeline_mode<synchronous>, transform_indices = @transform_5, window_bounds = array<i64: 1, 256>}, {pipeline_mode = #tpu.pipeline_mode<synchronous>, transform_indices = @transform_6, window_bounds = array<i64: 1, 128>}, {pipeline_mode = #tpu.pipeline_mode<synchronous>, transform_indices = @transform_7, window_bounds = array<i64: 1, 128>}, {pipeline_mode = #tpu.pipeline_mode<synchronous>, transform_indices = @transform_8, window_bounds = array<i64: 1, 128>}, {pipeline_mode = #tpu.pipeline_mode<synchronous>, transform_indices = @transform_9, window_bounds = array<i64: 1, 128>}, {transform_indices = @transform_10, window_bounds = array<i64: 1, 128, 128>}]} {
    %c0 = arith.constant 0 : index
    %c0_0 = arith.constant 0 : index
    %c0_1 = arith.constant 0 : index
    %0 = vector.load %arg1[%c0, %c0_0, %c0_1] : memref<1x128x128xf32, #tpu.memory_space<vmem>>, vector<1x128x128xf32>
    %c0_2 = arith.constant 0 : index
    %c0_3 = arith.constant 0 : index
    %c0_4 = arith.constant 0 : index
    %1 = vector.load %arg2[%c0_2, %c0_3, %c0_4] : memref<1x128x128xf32, #tpu.memory_space<vmem>>, vector<1x128x128xf32>
    %2 = arith.addf %0, %1 : vector<1x128x128xf32>
    %3 = vector.shape_cast %0 : vector<1x128x128xf32> to vector<128x128xf32>
    %4 = vector.shape_cast %2 : vector<1x128x128xf32> to vector<128x128xf32>
    %5 = arith.truncf %4 : vector<128x128xf32> to vector<128x128xbf16>
    %c0_5 = arith.constant 0 : index
    %c0_6 = arith.constant 0 : index
    %6 = vector.load %arg3[%c0_5, %c0_6] : memref<128x256xbf16, #tpu.memory_space<vmem>>, vector<128x256xbf16>
    %cst = arith.constant dense<0.000000e+00> : vector<128x256xf32>
    %7 = tpu.matmul %5, %6, %cst {dimension_numbers = #tpu.dot_dimension_numbers<[1], [0], [0], [1], [0, 0, 1, 1], [], []>} : vector<128x128xbf16>, vector<128x256xbf16>, vector<128x256xf32> -> vector<128x256xf32>
    %c0_7 = arith.constant 0 : index
    %c0_8 = arith.constant 0 : index
    %8 = vector.load %arg6[%c0_7, %c0_8] : memref<1x256xf32, #tpu.memory_space<vmem>>, vector<1x256xf32>
    %9 = vector.broadcast %8 : vector<1x256xf32> to vector<128x256xf32>
    %10 = arith.addf %7, %9 : vector<128x256xf32>
    %11 = arith.truncf %3 : vector<128x128xf32> to vector<128x128xbf16>
    %c0_9 = arith.constant 0 : index
    %c0_10 = arith.constant 0 : index
    %12 = vector.load %arg4[%c0_9, %c0_10] : memref<128x128xbf16, #tpu.memory_space<vmem>>, vector<128x128xbf16>
    %cst_11 = arith.constant dense<0.000000e+00> : vector<128x128xf32>
    %13 = tpu.matmul %11, %12, %cst_11 {dimension_numbers = #tpu.dot_dimension_numbers<[1], [0], [0], [1], [0, 0, 1, 1], [], []>} : vector<128x128xbf16>, vector<128x128xbf16>, vector<128x128xf32> -> vector<128x128xf32>
    %c0_12 = arith.constant 0 : index
    %c0_13 = arith.constant 0 : index
    %14 = vector.load %arg7[%c0_12, %c0_13] : memref<1x128xf32, #tpu.memory_space<vmem>>, vector<1x128xf32>
    %15 = vector.broadcast %14 : vector<1x128xf32> to vector<128x128xf32>
    %16 = arith.addf %13, %15 : vector<128x128xf32>
    %17 = vector.extract_strided_slice %10 {offsets = [0, 0], sizes = [128, 128], strides = [1, 1]} : vector<128x256xf32> to vector<128x128xf32>
    %18 = vector.shape_cast %17 : vector<128x128xf32> to vector<1x128x128xf32>
    %19 = arith.truncf %18 : vector<1x128x128xf32> to vector<1x128x128xbf16>
    %20 = vector.extract_strided_slice %10 {offsets = [0, 128], sizes = [128, 128], strides = [1, 1]} : vector<128x256xf32> to vector<128x128xf32>
    %21 = vector.shape_cast %20 : vector<128x128xf32> to vector<1x128x128xf32>
    %22 = arith.truncf %21 : vector<1x128x128xf32> to vector<1x128x128xbf16>
    %23 = vector.shape_cast %16 : vector<128x128xf32> to vector<1x128x128xf32>
    %24 = arith.truncf %23 : vector<1x128x128xf32> to vector<1x128x128xbf16>
    %25 = vector.extract_strided_slice %19 {offsets = [0, 0, 0], sizes = [1, 128, 32], strides = [1, 1, 1]} : vector<1x128x128xbf16> to vector<1x128x32xbf16>
    %26 = vector.extract_strided_slice %22 {offsets = [0, 0, 0], sizes = [1, 128, 32], strides = [1, 1, 1]} : vector<1x128x128xbf16> to vector<1x128x32xbf16>
    %27 = vector.extract_strided_slice %24 {offsets = [0, 0, 0], sizes = [1, 128, 32], strides = [1, 1, 1]} : vector<1x128x128xbf16> to vector<1x128x32xbf16>
    "tpu.trace_start"() <{level = 10 : i32, message = "bqd,bkd->bqk"}> : () -> ()
    %cst_14 = arith.constant dense<0.000000e+00> : vector<1x128x128xf32>
    %28 = tpu.matmul %25, %26, %cst_14 {dimension_numbers = #tpu.dot_dimension_numbers<[2], [2], [1], [1], [0, 0, 0, 1, 1, 1], [0], [0]>} : vector<1x128x32xbf16>, vector<1x128x32xbf16>, vector<1x128x128xf32> -> vector<1x128x128xf32>
    "tpu.trace_stop"() : () -> ()
    %cst_15 = arith.constant dense<0xFF800000> : vector<1x128xf32>
    %29 = vector.multi_reduction <maximumf>, %28, %cst_15 [2] : vector<1x128x128xf32> to vector<1x128xf32>
    %30 = vector.shape_cast %29 : vector<1x128xf32> to vector<1x128x1xf32>
    %31 = vector.broadcast %30 : vector<1x128x1xf32> to vector<1x128x128xf32>
    %32 = arith.subf %28, %31 : vector<1x128x128xf32>
    %33 = math.exp %32 : vector<1x128x128xf32>
    %cst_16 = arith.constant dense<0.000000e+00> : vector<1x128xf32>
    %34 = vector.multi_reduction <add>, %33, %cst_16 [2] : vector<1x128x128xf32> to vector<1x128xf32>
    %35 = vector.shape_cast %34 : vector<1x128xf32> to vector<1x128x1xf32>
    %36 = tpu.reciprocal %35 {approx = true} : vector<1x128x1xf32> -> vector<1x128x1xf32>
    %37 = vector.broadcast %36 : vector<1x128x1xf32> to vector<1x128x128xf32>
    %38 = arith.mulf %33, %37 : vector<1x128x128xf32>
    %39 = arith.truncf %38 : vector<1x128x128xf32> to vector<1x128x128xbf16>
    "tpu.trace_start"() <{level = 10 : i32, message = "bqk,bkd->bqd"}> : () -> ()
    %cst_17 = arith.constant dense<0.000000e+00> : vector<1x128x32xf32>
    %40 = tpu.matmul %39, %27, %cst_17 {dimension_numbers = #tpu.dot_dimension_numbers<[2], [1], [1], [2], [0, 0, 0, 1, 1, 2], [0], [0]>} : vector<1x128x128xbf16>, vector<1x128x32xbf16>, vector<1x128x32xf32> -> vector<1x128x32xf32>
    "tpu.trace_stop"() : () -> ()
    %41 = arith.truncf %40 : vector<1x128x32xf32> to vector<1x128x32xbf16>
    %c0_18 = arith.constant 0 : index
    %c0_19 = arith.constant 0 : index
    %c0_20 = arith.constant 0 : index
    %42 = vector.load %arg12[%c0_18, %c0_19, %c0_20] : memref<1x128x128xbf16, #tpu.memory_space<vmem>>, vector<1x128x32xbf16>
    tpu.vector_store %arg12[%c0_18, %c0_19, %c0_20], %41 {strides = array<i32>} : memref<1x128x128xbf16, #tpu.memory_space<vmem>>, vector<1x128x32xbf16>,
    %43 = vector.extract_strided_slice %19 {offsets = [0, 0, 32], sizes = [1, 128, 32], strides = [1, 1, 1]} : vector<1x128x128xbf16> to vector<1x128x32xbf16>
    %44 = vector.extract_strided_slice %22 {offsets = [0, 0, 32], sizes = [1, 128, 32], strides = [1, 1, 1]} : vector<1x128x128xbf16> to vector<1x128x32xbf16>
    %45 = vector.extract_strided_slice %24 {offsets = [0, 0, 32], sizes = [1, 128, 32], strides = [1, 1, 1]} : vector<1x128x128xbf16> to vector<1x128x32xbf16>
    "tpu.trace_start"() <{level = 10 : i32, message = "bqd,bkd->bqk"}> : () -> ()
    %cst_21 = arith.constant dense<0.000000e+00> : vector<1x128x128xf32>
    %46 = tpu.matmul %43, %44, %cst_21 {dimension_numbers = #tpu.dot_dimension_numbers<[2], [2], [1], [1], [0, 0, 0, 1, 1, 1], [0], [0]>} : vector<1x128x32xbf16>, vector<1x128x32xbf16>, vector<1x128x128xf32> -> vector<1x128x128xf32>
    "tpu.trace_stop"() : () -> ()
    %cst_22 = arith.constant dense<0xFF800000> : vector<1x128xf32>
    %47 = vector.multi_reduction <maximumf>, %46, %cst_22 [2] : vector<1x128x128xf32> to vector<1x128xf32>
    %48 = vector.shape_cast %47 : vector<1x128xf32> to vector<1x128x1xf32>
    %49 = vector.broadcast %48 : vector<1x128x1xf32> to vector<1x128x128xf32>
    %50 = arith.subf %46, %49 : vector<1x128x128xf32>
    %51 = math.exp %50 : vector<1x128x128xf32>
    %cst_23 = arith.constant dense<0.000000e+00> : vector<1x128xf32>
    %52 = vector.multi_reduction <add>, %51, %cst_23 [2] : vector<1x128x128xf32> to vector<1x128xf32>
    %53 = vector.shape_cast %52 : vector<1x128xf32> to vector<1x128x1xf32>
    %54 = tpu.reciprocal %53 {approx = true} : vector<1x128x1xf32> -> vector<1x128x1xf32>
    %55 = vector.broadcast %54 : vector<1x128x1xf32> to vector<1x128x128xf32>
    %56 = arith.mulf %51, %55 : vector<1x128x128xf32>
    %57 = arith.truncf %56 : vector<1x128x128xf32> to vector<1x128x128xbf16>
    "tpu.trace_start"() <{level = 10 : i32, message = "bqk,bkd->bqd"}> : () -> ()
    %cst_24 = arith.constant dense<0.000000e+00> : vector<1x128x32xf32>
    %58 = tpu.matmul %57, %45, %cst_24 {dimension_numbers = #tpu.dot_dimension_numbers<[2], [1], [1], [2], [0, 0, 0, 1, 1, 2], [0], [0]>} : vector<1x128x128xbf16>, vector<1x128x32xbf16>, vector<1x128x32xf32> -> vector<1x128x32xf32>
    "tpu.trace_stop"() : () -> ()
    %59 = arith.truncf %58 : vector<1x128x32xf32> to vector<1x128x32xbf16>
    %c0_25 = arith.constant 0 : index
    %c0_26 = arith.constant 0 : index
    %c32 = arith.constant 32 : index
    %60 = vector.load %arg12[%c0_25, %c0_26, %c32] : memref<1x128x128xbf16, #tpu.memory_space<vmem>>, vector<1x128x32xbf16>
    tpu.vector_store %arg12[%c0_25, %c0_26, %c32], %59 {strides = array<i32>} : memref<1x128x128xbf16, #tpu.memory_space<vmem>>, vector<1x128x32xbf16>,
    %61 = vector.extract_strided_slice %19 {offsets = [0, 0, 64], sizes = [1, 128, 32], strides = [1, 1, 1]} : vector<1x128x128xbf16> to vector<1x128x32xbf16>
    %62 = vector.extract_strided_slice %22 {offsets = [0, 0, 64], sizes = [1, 128, 32], strides = [1, 1, 1]} : vector<1x128x128xbf16> to vector<1x128x32xbf16>
    %63 = vector.extract_strided_slice %24 {offsets = [0, 0, 64], sizes = [1, 128, 32], strides = [1, 1, 1]} : vector<1x128x128xbf16> to vector<1x128x32xbf16>
    "tpu.trace_start"() <{level = 10 : i32, message = "bqd,bkd->bqk"}> : () -> ()
    %cst_27 = arith.constant dense<0.000000e+00> : vector<1x128x128xf32>
    %64 = tpu.matmul %61, %62, %cst_27 {dimension_numbers = #tpu.dot_dimension_numbers<[2], [2], [1], [1], [0, 0, 0, 1, 1, 1], [0], [0]>} : vector<1x128x32xbf16>, vector<1x128x32xbf16>, vector<1x128x128xf32> -> vector<1x128x128xf32>
    "tpu.trace_stop"() : () -> ()
    %cst_28 = arith.constant dense<0xFF800000> : vector<1x128xf32>
    %65 = vector.multi_reduction <maximumf>, %64, %cst_28 [2] : vector<1x128x128xf32> to vector<1x128xf32>
    %66 = vector.shape_cast %65 : vector<1x128xf32> to vector<1x128x1xf32>
    %67 = vector.broadcast %66 : vector<1x128x1xf32> to vector<1x128x128xf32>
    %68 = arith.subf %64, %67 : vector<1x128x128xf32>
    %69 = math.exp %68 : vector<1x128x128xf32>
    %cst_29 = arith.constant dense<0.000000e+00> : vector<1x128xf32>
    %70 = vector.multi_reduction <add>, %69, %cst_29 [2] : vector<1x128x128xf32> to vector<1x128xf32>
    %71 = vector.shape_cast %70 : vector<1x128xf32> to vector<1x128x1xf32>
    %72 = tpu.reciprocal %71 {approx = true} : vector<1x128x1xf32> -> vector<1x128x1xf32>
    %73 = vector.broadcast %72 : vector<1x128x1xf32> to vector<1x128x128xf32>
    %74 = arith.mulf %69, %73 : vector<1x128x128xf32>
    %75 = arith.truncf %74 : vector<1x128x128xf32> to vector<1x128x128xbf16>
    "tpu.trace_start"() <{level = 10 : i32, message = "bqk,bkd->bqd"}> : () -> ()
    %cst_30 = arith.constant dense<0.000000e+00> : vector<1x128x32xf32>
    %76 = tpu.matmul %75, %63, %cst_30 {dimension_numbers = #tpu.dot_dimension_numbers<[2], [1], [1], [2], [0, 0, 0, 1, 1, 2], [0], [0]>} : vector<1x128x128xbf16>, vector<1x128x32xbf16>, vector<1x128x32xf32> -> vector<1x128x32xf32>
    "tpu.trace_stop"() : () -> ()
    %77 = arith.truncf %76 : vector<1x128x32xf32> to vector<1x128x32xbf16>
    %c0_31 = arith.constant 0 : index
    %c0_32 = arith.constant 0 : index
    %c64 = arith.constant 64 : index
    %78 = vector.load %arg12[%c0_31, %c0_32, %c64] : memref<1x128x128xbf16, #tpu.memory_space<vmem>>, vector<1x128x32xbf16>
    tpu.vector_store %arg12[%c0_31, %c0_32, %c64], %77 {strides = array<i32>} : memref<1x128x128xbf16, #tpu.memory_space<vmem>>, vector<1x128x32xbf16>,
    %79 = vector.extract_strided_slice %19 {offsets = [0, 0, 96], sizes = [1, 128, 32], strides = [1, 1, 1]} : vector<1x128x128xbf16> to vector<1x128x32xbf16>
    %80 = vector.extract_strided_slice %22 {offsets = [0, 0, 96], sizes = [1, 128, 32], strides = [1, 1, 1]} : vector<1x128x128xbf16> to vector<1x128x32xbf16>
    %81 = vector.extract_strided_slice %24 {offsets = [0, 0, 96], sizes = [1, 128, 32], strides = [1, 1, 1]} : vector<1x128x128xbf16> to vector<1x128x32xbf16>
    "tpu.trace_start"() <{level = 10 : i32, message = "bqd,bkd->bqk"}> : () -> ()
    %cst_33 = arith.constant dense<0.000000e+00> : vector<1x128x128xf32>
    %82 = tpu.matmul %79, %80, %cst_33 {dimension_numbers = #tpu.dot_dimension_numbers<[2], [2], [1], [1], [0, 0, 0, 1, 1, 1], [0], [0]>} : vector<1x128x32xbf16>, vector<1x128x32xbf16>, vector<1x128x128xf32> -> vector<1x128x128xf32>
    "tpu.trace_stop"() : () -> ()
    %cst_34 = arith.constant dense<0xFF800000> : vector<1x128xf32>
    %83 = vector.multi_reduction <maximumf>, %82, %cst_34 [2] : vector<1x128x128xf32> to vector<1x128xf32>
    %84 = vector.shape_cast %83 : vector<1x128xf32> to vector<1x128x1xf32>
    %85 = vector.broadcast %84 : vector<1x128x1xf32> to vector<1x128x128xf32>
    %86 = arith.subf %82, %85 : vector<1x128x128xf32>
    %87 = math.exp %86 : vector<1x128x128xf32>
    %cst_35 = arith.constant dense<0.000000e+00> : vector<1x128xf32>
    %88 = vector.multi_reduction <add>, %87, %cst_35 [2] : vector<1x128x128xf32> to vector<1x128xf32>
    %89 = vector.shape_cast %88 : vector<1x128xf32> to vector<1x128x1xf32>
    %90 = tpu.reciprocal %89 {approx = true} : vector<1x128x1xf32> -> vector<1x128x1xf32>
    %91 = vector.broadcast %90 : vector<1x128x1xf32> to vector<1x128x128xf32>
    %92 = arith.mulf %87, %91 : vector<1x128x128xf32>
    %93 = arith.truncf %92 : vector<1x128x128xf32> to vector<1x128x128xbf16>
    "tpu.trace_start"() <{level = 10 : i32, message = "bqk,bkd->bqd"}> : () -> ()
    %cst_36 = arith.constant dense<0.000000e+00> : vector<1x128x32xf32>
    %94 = tpu.matmul %93, %81, %cst_36 {dimension_numbers = #tpu.dot_dimension_numbers<[2], [1], [1], [2], [0, 0, 0, 1, 1, 2], [0], [0]>} : vector<1x128x128xbf16>, vector<1x128x32xbf16>, vector<1x128x32xf32> -> vector<1x128x32xf32>
    "tpu.trace_stop"() : () -> ()
    %95 = arith.truncf %94 : vector<1x128x32xf32> to vector<1x128x32xbf16>
    %c0_37 = arith.constant 0 : index
    %c0_38 = arith.constant 0 : index
    %c96 = arith.constant 96 : index
    %96 = vector.load %arg12[%c0_37, %c0_38, %c96] : memref<1x128x128xbf16, #tpu.memory_space<vmem>>, vector<1x128x32xbf16>
    tpu.vector_store %arg12[%c0_37, %c0_38, %c96], %95 {strides = array<i32>} : memref<1x128x128xbf16, #tpu.memory_space<vmem>>, vector<1x128x32xbf16>,
    %c0_39 = arith.constant 0 : index
    %c0_40 = arith.constant 0 : index
    %c0_41 = arith.constant 0 : index
    %97 = vector.load %arg12[%c0_39, %c0_40, %c0_41] : memref<1x128x128xbf16, #tpu.memory_space<vmem>>, vector<1x128x128xbf16>
    %98 = vector.shape_cast %97 : vector<1x128x128xbf16> to vector<128x128xbf16>
    %c0_42 = arith.constant 0 : index
    %c0_43 = arith.constant 0 : index
    %99 = vector.load %arg5[%c0_42, %c0_43] : memref<128x128xbf16, #tpu.memory_space<vmem>>, vector<128x128xbf16>
    %cst_44 = arith.constant dense<0.000000e+00> : vector<128x128xf32>
    %100 = tpu.matmul %98, %99, %cst_44 {dimension_numbers = #tpu.dot_dimension_numbers<[1], [0], [0], [1], [0, 0, 1, 1], [], []>} : vector<128x128xbf16>, vector<128x128xbf16>, vector<128x128xf32> -> vector<128x128xf32>
    %c0_45 = arith.constant 0 : index
    %c0_46 = arith.constant 0 : index
    %101 = vector.load %arg8[%c0_45, %c0_46] : memref<1x128xf32, #tpu.memory_space<vmem>>, vector<1x128xf32>
    %102 = vector.broadcast %101 : vector<1x128xf32> to vector<128x128xf32>
    %103 = arith.addf %100, %102 : vector<128x128xf32>
    %104 = arith.addf %3, %103 : vector<128x128xf32>
    %cst_47 = arith.constant dense<0.000000e+00> : vector<128xf32>
    %105 = vector.multi_reduction <add>, %104, %cst_47 [1] : vector<128x128xf32> to vector<128xf32>
    %106 = vector.shape_cast %105 : vector<128xf32> to vector<128x1xf32>
    %cst_48 = arith.constant 1.280000e+02 : f32
    %107 = vector.broadcast %cst_48 : f32 to vector<128x1xf32>
    %108 = arith.divf %106, %107 : vector<128x1xf32>
    %109 = vector.broadcast %108 : vector<128x1xf32> to vector<128x128xf32>
    %110 = arith.subf %104, %109 : vector<128x128xf32>
    %111 = arith.mulf %110, %110 : vector<128x128xf32>
    %cst_49 = arith.constant dense<0.000000e+00> : vector<128xf32>
    %112 = vector.multi_reduction <add>, %111, %cst_49 [1] : vector<128x128xf32> to vector<128xf32>
    %113 = vector.shape_cast %112 : vector<128xf32> to vector<128x1xf32>
    %cst_50 = arith.constant 1.280000e+02 : f32
    %114 = vector.broadcast %cst_50 : f32 to vector<128x1xf32>
    %115 = arith.divf %113, %114 : vector<128x1xf32>
    %cst_51 = arith.constant 9.99999974E-6 : f32
    %116 = vector.broadcast %cst_51 : f32 to vector<128x1xf32>
    %117 = arith.addf %115, %116 : vector<128x1xf32>
    %118 = math.rsqrt %117 : vector<128x1xf32>
    %119 = vector.broadcast %118 : vector<128x1xf32> to vector<128x128xf32>
    %120 = arith.mulf %110, %119 : vector<128x128xf32>
    %c0_52 = arith.constant 0 : index
    %c0_53 = arith.constant 0 : index
    %121 = vector.load %arg9[%c0_52, %c0_53] : memref<1x128xf32, #tpu.memory_space<vmem>>, vector<1x128xf32>
    %122 = vector.broadcast %121 : vector<1x128xf32> to vector<128x128xf32>
    %123 = arith.mulf %120, %122 : vector<128x128xf32>
    %c0_54 = arith.constant 0 : index
    %c0_55 = arith.constant 0 : index
    %124 = vector.load %arg10[%c0_54, %c0_55] : memref<1x128xf32, #tpu.memory_space<vmem>>, vector<1x128xf32>
    %125 = vector.broadcast %124 : vector<1x128xf32> to vector<128x128xf32>
    %126 = arith.addf %123, %125 : vector<128x128xf32>
    %127 = vector.shape_cast %126 : vector<128x128xf32> to vector<1x128x128xf32>
    %c0_56 = arith.constant 0 : index
    %c0_57 = arith.constant 0 : index
    %c0_58 = arith.constant 0 : index
    %128 = vector.load %arg11[%c0_56, %c0_57, %c0_58] : memref<1x128x128xf32, #tpu.memory_space<vmem>>, vector<1x128x128xf32>
    tpu.vector_store %arg11[%c0_56, %c0_57, %c0_58], %127 {strides = array<i32>} : memref<1x128x128xf32, #tpu.memory_space<vmem>>, vector<1x128x128xf32>,
    return
  }
  func.func @transform_0(%arg0: i32) -> (i32, i32, i32) {
    %c0_i32 = arith.constant 0 : i32
    %c0_i32_0 = arith.constant 0 : i32
    %c0_i32_1 = arith.constant 0 : i32
    return %arg0, %c0_i32, %c0_i32_0 : i32, i32, i32
  }
  func.func @transform_1(%arg0: i32) -> (i32, i32, i32) {
    %c0_i32 = arith.constant 0 : i32
    %c0_i32_0 = arith.constant 0 : i32
    %c0_i32_1 = arith.constant 0 : i32
    return %arg0, %c0_i32, %c0_i32_0 : i32, i32, i32
  }
  func.func @transform_2(%arg0: i32) -> (i32, i32) {
    %c0_i32 = arith.constant 0 : i32
    %c0_i32_0 = arith.constant 0 : i32
    %c0_i32_1 = arith.constant 0 : i32
    return %c0_i32, %c0_i32_0 : i32, i32
  }
  func.func @transform_3(%arg0: i32) -> (i32, i32) {
    %c0_i32 = arith.constant 0 : i32
    %c0_i32_0 = arith.constant 0 : i32
    %c0_i32_1 = arith.constant 0 : i32
    return %c0_i32, %c0_i32_0 : i32, i32
  }
  func.func @transform_4(%arg0: i32) -> (i32, i32) {
    %c0_i32 = arith.constant 0 : i32
    %c0_i32_0 = arith.constant 0 : i32
    %c0_i32_1 = arith.constant 0 : i32
    return %c0_i32, %c0_i32_0 : i32, i32
  }
  func.func @transform_5(%arg0: i32) -> (i32, i32) {
    %c0_i32 = arith.constant 0 : i32
    %c0_i32_0 = arith.constant 0 : i32
    %c0_i32_1 = arith.constant 0 : i32
    return %c0_i32, %c0_i32_0 : i32, i32
  }
  func.func @transform_6(%arg0: i32) -> (i32, i32) {
    %c0_i32 = arith.constant 0 : i32
    %c0_i32_0 = arith.constant 0 : i32
    %c0_i32_1 = arith.constant 0 : i32
    return %c0_i32, %c0_i32_0 : i32, i32
  }
  func.func @transform_7(%arg0: i32) -> (i32, i32) {
    %c0_i32 = arith.constant 0 : i32
    %c0_i32_0 = arith.constant 0 : i32
    %c0_i32_1 = arith.constant 0 : i32
    return %c0_i32, %c0_i32_0 : i32, i32
  }
  func.func @transform_8(%arg0: i32) -> (i32, i32) {
    %c0_i32 = arith.constant 0 : i32
    %c0_i32_0 = arith.constant 0 : i32
    %c0_i32_1 = arith.constant 0 : i32
    return %c0_i32, %c0_i32_0 : i32, i32
  }
  func.func @transform_9(%arg0: i32) -> (i32, i32) {
    %c0_i32 = arith.constant 0 : i32
    %c0_i32_0 = arith.constant 0 : i32
    %c0_i32_1 = arith.constant 0 : i32
    return %c0_i32, %c0_i32_0 : i32, i32
  }
  func.func @transform_10(%arg0: i32) -> (i32, i32, i32) {
    %c0_i32 = arith.constant 0 : i32
    %c0_i32_0 = arith.constant 0 : i32
    %c0_i32_1 = arith.constant 0 : i32
    return %arg0, %c0_i32, %c0_i32_0 : i32, i32, i32
  }
}

</mosaic_0001>

<bundles_post_ra>
// kernel: tpu_custom_call.1
= control target key start
LH: loop header
LB: loop body
LE: loop exit
PB: predicated region body
PF: predicated region fallthrough
CT: control target
= control target key end

     0   :  { %s6432_s0 = inlined_call_operand.hbm [shape: f32[2,128,128], index: 0, kind: input, shape index: {}]   ;;  %s6433_s1 = inlined_call_operand.hbm [shape: f32[2,128,128], index: 1, kind: input, shape index: {}]   ;;  %s6434_s2 = inlined_call_operand.hbm [shape: bf16[128,256], index: 2, kind: input, shape index: {}]   ;;  %s6435_s3 = inlined_call_operand.hbm [shape: bf16[128,128], index: 3, kind: input, shape index: {}]   ;;  %s6436_s4 = inlined_call_operand.hbm [shape: bf16[128,128], index: 4, kind: input, shape index: {}]   ;;  %s6437_s5 = inlined_call_operand.vmem [shape: f32[1,256], index: 5, kind: input, shape index: {}]   ;;  %s6438_s6 = inlined_call_operand.vmem [shape: f32[1,128], index: 6, kind: input, shape index: {}]   ;;  %s6439_s7 = inlined_call_operand.vmem [shape: f32[1,128], index: 7, kind: input, shape index: {}]   ;;  %s6440_s8 = inlined_call_operand.vmem [shape: f32[1,128], index: 8, kind: input, shape index: {}]   ;;  %s6441_s9 = inlined_call_operand.vmem [shape: f32[1,128], index: 9, kind: input, shape index: {}]   ;;  %s6442_s10 = inlined_call_operand.hbm [shape: f32[2,128,128], index: 10, kind: output, shape index: {}]  }
   0x1   :  { %6459 = sst [smem:[#allocation27_spill]] %s6432_s0 }
   0x2   :  { %6460 = sst [smem:[#allocation28_spill]] %s6434_s2 }
   0x3   :  { %6461 = sst [smem:[#allocation29_spill]] %s6435_s3 }
   0x4   :  { %6462 = sst [smem:[#allocation30_spill]] %s6436_s4 }
   0x5   :  { %6463 = sst [smem:[#allocation31_spill]] %s6441_s9 }
   0x6   :  { %6464 = sst [smem:[#allocation32_spill]] %s6442_s10 }
   0x7   :  { %15 = vsyncpa [#allocation4], 0 }
   0x8   :  { %17 = vsyncpa [#allocation4 + $0x1], 0 }
   0x9   :  { %18 = vsyncpa [#allocation7], 0 }
   0xa   :  { %20 = vsyncpa [#allocation7 + $0x1], 0 }
   0xb   :  { %21 = vsyncpa [#allocation10], 0 }
   0xc   :  { %22 = vsyncpa [#allocation5], 0 }
   0xd   :  { %24 = vsyncpa [#allocation5 + $0x1], 0  ;;  %s4794_s13 = smov 0   ;;  %s4796_s14 = smov 0  }
   0xe   :  { %s4798_s15 = smov 0   ;;  %s4800_s16 = smov 0  }
   0xf LB: > { %6465 = sst [smem:[#allocation18_spill]] %s4709_s13  ;;  %s4815_s17 = sadd.s32 4294967295, %s4721_s16   ;;  %s4721_s16 = sphi %s4800_s16, %s6523_s16   ;;  %s4717_s15 = sphi %s4798_s15, %s6522_s15   ;;  %s4713_s14 = sphi %s4796_s14, %s6521_s14   ;;  %s4709_s13 = sphi %s4794_s13, %s6520_s13  }
  0x10   : > { %s3440_s18 = sadd.s32 4294967294, %s4721_s16   ;;  %p50_p0 = scmp.ne.s32.totalorder %s4713_s14, %s4709_s13 }
  0x11   : > { %p6443_p1 = scmp.eq.s32.totalorder %s4815_s17, 0  ;;  %p274_p3 = scmp.eq.s32.totalorder %s3440_s18, 1 }
  0x12   : > { %p3441_p5 = scmp.ge.s32.totalorder %s4721_s16, 1  ;;  %p281_p7 = scmp.lt.s32.totalorder %s4721_s16, 3 }
  0x13   : > { %p4824_p4 = por %p6443_p1, %p50_p0  ;;  %p4829_p6 = por %p274_p3, %p50_p0 }
  0x14   : > { %p4834_p8 = pnand %p3441_p5, %p281_p7  ;;  %s4723_s22 = smov [#allocation8]  }
  0x15   : > { %s6466_s19 = scalar_select %p4824_p4, 1, 0 }
  0x16   : > { %s6467_s20 = scalar_select %p4829_p6, 1, 0 }
  0x17   : > { %s6469_s21 = scalar_select %p4834_p8, 1, 0 }
  0x18   : > { %6468 = sst [smem:[#allocation19_spill]] %s6467_s20  ;;  %s293_s23 = sshll.u32 %s4723_s22, 4  ;;  %s4838_s23 = int_to_ptr.vmem [resolvable:$true] %s293_s23 }
  0x19   : > { %p4081_p9 = pneg %p4834_p8  ;;  %s4724_s25 = smov [#allocation9]  }
  0x1a   : > { %s306_s26 = sshll.u32 %s4724_s25, 4  ;;  %s6471_s2 = sld [smem:[#allocation28_spill]]  ;;  %s4849_s26 = int_to_ptr.vmem [resolvable:$true] %s306_s26 }
  0x1b   : > { %p4845_p11 = pnand %p4081_p9, %p6443_p1 }
  0x1d   : > { %p4859_p13 = pneg %p4845_p11 }
  0x20   : > { %s4499_s29 = scalar_lea.hbm %s6471_s2, 2048 }
  0x21   : > { %p4500_p12 = scmp.ne.s32.totalorder %s6471_s2, %s4499_s29  ;;  %p4506_p5 = scmp.lt.u32.totalorder %s4499_s29, %s6471_s2 }
  0x23   : > { %p4502_p0 = pnand %p4859_p13, %p4500_p12 }
  0x25   : > { %p4503_p3 = pneg %p4502_p0 }
  0x27   : > { %p4508_p7 = pnand %p4506_p5, %p4503_p3 }
  0x29   : > { %4511 = shalt.err (!%p4508_p7)
}
  0x2a   : > { %s4512_s25 = scalar_lea.vmem %s4838_s23, 2048  ;;  %p4520_p2 = scmp.lt.s32.totalorder %s4838_s23, %s4838_s23 }
  0x2b   : > { %p4513_p9 = scmp.ne.s32.totalorder %s4838_s23, %s4512_s25  ;;  %p4521_p6 = scmp.lt.s32.totalorder %s4512_s25, %s4512_s25 }
  0x2d   : > { %p4515_p10 = pnand %p4513_p9, %p4859_p13  ;;  %p4522_p12 = por %p4521_p6, %p4520_p2 }
  0x2f   : > { %p4516_p1 = pneg %p4515_p10 }
  0x31   : > { %p4523_p0 = pnand %p4522_p12, %p4516_p1 }
  0x33   : > { %4526 = shalt.err (!%p4523_p0)
}
  0x34   : > { %s6447_s27 = smov 128   ;;  %s6449_s28 = smov 8  }
  0x35   : > { %4084 = dma.hbm_to_vmem [thread:$0]  (!%p4845_p11), %s6471_s2, 2048, %s4838_s23, [#allocation7], %s6447_s27, %s6447_s27, %s6449_s28  }
  0x36   : > { %s6473_s3 = sld [smem:[#allocation29_spill]] }
  0x3c   : > { %s4527_s22 = scalar_lea.hbm %s6473_s3, 1024 }
  0x3d   : > { %p4528_p1 = scmp.ne.s32.totalorder %s6473_s3, %s4527_s22  ;;  %p4534_p10 = scmp.lt.u32.totalorder %s4527_s22, %s6473_s3 }
  0x3f   : > { %p4530_p2 = pnand %p4528_p1, %p4859_p13 }
  0x41   : > { %p4531_p6 = pneg %p4530_p2 }
  0x43   : > { %p4536_p3 = pnand %p4534_p10, %p4531_p6 }
  0x45   : > { %4539 = shalt.err (!%p4536_p3)
}
  0x46   : > { %s4540_s23 = scalar_lea.vmem %s4849_s26, 1024  ;;  %p4548_p12 = scmp.lt.s32.totalorder %s4849_s26, %s4849_s26 }
  0x47   : > { %p4541_p5 = scmp.ne.s32.totalorder %s4849_s26, %s4540_s23  ;;  %p4549_p0 = scmp.lt.s32.totalorder %s4540_s23, %s4540_s23 }
  0x49   : > { %p4543_p7 = pnand %p4541_p5, %p4859_p13  ;;  %p4550_p1 = por %p4549_p0, %p4548_p12 }
  0x4b   : > { %p4544_p9 = pneg %p4543_p7 }
  0x4d   : > { %p4551_p2 = pnand %p4550_p1, %p4544_p9 }
  0x4f   : > { %4554 = shalt.err (!%p4551_p2)
}
  0x50   : > { %s4727_s20 = smov 64   ;;  %s4728_s10 = smov 4  }
  0x51   : > { %4087 = dma.hbm_to_vmem [thread:$0]  (!%p4845_p11), %s6473_s3, 1024, %s4849_s26, [#allocation10], %s4727_s20, %s4727_s20, %s4728_s10  }
  0x52   : > { %s4729_s30 = smov [#allocation11]   ;;  %s4907_s18 = sadd.s32 1, %s4721_s16  }
  0x53   : > { %s319_s11 = sshll.u32 %s4729_s30, 4  ;;  %s6474_s4 = sld [smem:[#allocation30_spill]]  ;;  %s320_s11 = int_to_ptr.vmem [resolvable:$true] %s319_s11 }
  0x59   : > { %s4555_s23 = scalar_lea.hbm %s6474_s4, 1024 }
  0x5a   : > { %p4556_p6 = scmp.ne.s32.totalorder %s6474_s4, %s4555_s23  ;;  %p4562_p5 = scmp.lt.u32.totalorder %s4555_s23, %s6474_s4 }
  0x5c   : > { %p4558_p10 = pnand %p4556_p6, %p4859_p13 }
  0x5e   : > { %p4559_p3 = pneg %p4558_p10 }
  0x60   : > { %p4564_p7 = pnand %p4562_p5, %p4559_p3 }
  0x62   : > { %4567 = shalt.err (!%p4564_p7)
}
  0x63   : > { %s4568_s26 = scalar_lea.vmem %s320_s11, 1024  ;;  %p4576_p1 = scmp.lt.s32.totalorder %s320_s11, %s320_s11 }
  0x64   : > { %p4569_p9 = scmp.ne.s32.totalorder %s320_s11, %s4568_s26  ;;  %p4577_p2 = scmp.lt.s32.totalorder %s4568_s26, %s4568_s26 }
  0x66   : > { %p4571_p12 = pnand %p4569_p9, %p4859_p13  ;;  %p4578_p4 = por %p4577_p2, %p4576_p1 }
  0x68   : > { %p4572_p0 = pneg %p4571_p12 }
  0x6a   : > { %p4579_p8 = pnand %p4578_p4, %p4572_p0 }
  0x6c   : > { %4582 = shalt.err (!%p4579_p8)
}
  0x6d   : > { %4090 = dma.hbm_to_vmem [thread:$0]  (!%p4845_p11), %s6474_s4, 1024, %s320_s11, [#allocation10], %s4727_s20, %s4727_s20, %s4728_s10  }
  0x6e   : > { %s34_s2 = ssub.s32 %s4721_s16, %s4907_s18  ;;  %s37_s9 = sadd.s32 1, %s4717_s15 }
  0x6f   : > { %p35_p4 = scmp.eq.s32.totalorder %s34_s2, 0  ;;  %p44_p8 = scmp.ne.s32.totalorder %s4717_s15, %s4713_s14 }
  0x70   : > { %p45_p13 = scmp.eq.s32.totalorder %s4721_s16, 0  ;;  %p4105_p6 = scmp.lt.s32.totalorder %s4721_s16, 2 }
  0x71   : > { %s4935_s24 = scalar_select %p35_p4, %s4717_s15, %s37_s9  }
  0x72   : > { %p46_p10 = por %p45_p13, %p44_p8  ;;  %p6476_p3 = scmp.eq.s32.totalorder %s4815_s17, 1 }
  0x73   : > { %6475 = sst [smem:[#allocation20_spill]] %s4935_s24  ;;  %s348_s13 = sand.u32 1, %s4717_s15  }
  0x74   : > { %p4939_p5 = por %p6476_p3, %p44_p8  ;;  %s3532_s29 = sshll.u32 %s4721_s16, 11 }
  0x75   : > { %s4945_s30 = sshll.u32 %s348_s13, 7  ;;  %s6478_s0 = sld [smem:[#allocation27_spill]] }
  0x76   : > { %s352_s11 = scalar_lea.vmem [#allocation3], %s4945_s30  ;;  %p4953_p11 = pnand %p4105_p6, %p46_p10 }
  0x77   : > { %s359_s25 = sshll.u32 %s352_s11, 4  ;;  %s4962_s28 = scalar_lea.hbm %s6433_s1, %s3532_s29  ;;  %s4957_s25 = int_to_ptr.vmem [resolvable:$true] %s359_s25 }
  0x78   : > { %s4964_s2 = scalar_lea.sflag [#allocation4], %s348_s13  ;;  %p4585_p9 = pneg %p4953_p11 }
  0x7b   : > { %s4950_s10 = scalar_lea.hbm %s6478_s0, %s3532_s29  ;;  %s4588_s11 = scalar_lea.hbm %s6478_s0, 4096 }
  0x7c   : > { %s4583_s9 = scalar_lea.hbm %s4950_s10, 2048  ;;  %p4589_p1 = scmp.lt.u32.totalorder %s4950_s10, %s6478_s0 }
  0x7d   : > { %p4584_p7 = scmp.ne.s32.totalorder %s4950_s10, %s4583_s9  ;;  %p4590_p2 = scmp.lt.u32.totalorder %s4588_s11, %s4583_s9 }
  0x7e   : > { %p4592_p8 = scmp.lt.u32.totalorder %s4583_s9, %s4950_s10 }
  0x7f   : > { %p4586_p12 = pnand %p4585_p9, %p4584_p7  ;;  %p4591_p4 = por %p4590_p2, %p4589_p1 }
  0x81   : > { %p4587_p0 = pneg %p4586_p12  ;;  %p4593_p13 = por %p4592_p8, %p4591_p4 }
  0x83   : > { %p4594_p6 = pnand %p4593_p13, %p4587_p0 }
  0x85   : > { %4597 = shalt.err (!%p4594_p6)
}
  0x86   : > { %s4598_s13 = scalar_lea.vmem %s4957_s25, 2048  ;;  %s4730_s29 = smov [#allocation3]  }
  0x87   : > { %p4599_p10 = scmp.ne.s32.totalorder %s4957_s25, %s4598_s13  ;;  %s4603_s26 = sshll.u32 %s4730_s29, 4  ;;  %s4604_s26 = int_to_ptr.vmem [resolvable:$false] %s4603_s26 }
  0x88   : > { %s4605_s3 = scalar_lea.vmem %s4604_s26, 4096  ;;  %p4606_p12 = scmp.lt.s32.totalorder %s4957_s25, %s4604_s26 }
  0x89   : > { %p4601_p3 = pnand %p4599_p10, %p4585_p9  ;;  %p4607_p1 = scmp.lt.s32.totalorder %s4605_s3, %s4598_s13 }
  0x8b   : > { %p4602_p7 = pneg %p4601_p3  ;;  %p4608_p2 = por %p4607_p1, %p4606_p12 }
  0x8d   : > { %p4609_p4 = pnand %p4608_p2, %p4602_p7 }
  0x8f   : > { %4612 = shalt.err (!%p4609_p4)
}
  0x90   : > { %s6480_s4 = smov 8   ;;  %s6481_s27 = smov 128  }
  0x91   : > { %4094 = dma.hbm_to_vmem [thread:$0]  (!%p4953_p11), %s4950_s10, 2048, %s4957_s25, %s4964_s2, %s6481_s27, %s6481_s27, %s6480_s4  }
  0x92   : > { %s373_s9 = scalar_lea.vmem [#allocation6], %s4945_s30  ;;  %s369_s20 = sand.u32 1, %s4721_s16  }
  0x93   : > { %s380_s22 = sshll.u32 %s373_s9, 4  ;;  %s4999_s11 = scalar_lea.sflag [#allocation7], %s369_s20  ;;  %s4997_s22 = int_to_ptr.vmem [resolvable:$true] %s380_s22 }
  0x94   : > { %s4613_s13 = scalar_lea.hbm %s4962_s28, 2048  ;;  %s4618_s3 = scalar_lea.hbm %s6433_s1, 4096 }
  0x95   : > { %p4614_p0 = scmp.ne.s32.totalorder %s4962_s28, %s4613_s13  ;;  %p4619_p6 = scmp.lt.u32.totalorder %s4962_s28, %s6433_s1 }
  0x96   : > { %p4620_p10 = scmp.lt.u32.totalorder %s4618_s3, %s4613_s13  ;;  %p4622_p7 = scmp.lt.u32.totalorder %s4613_s13, %s4962_s28 }
  0x97   : > { %p4616_p8 = pnand %p4614_p0, %p4585_p9 }
  0x98   : > { %p4621_p3 = por %p4620_p10, %p4619_p6 }
  0x99   : > { %p4617_p13 = pneg %p4616_p8 }
  0x9a   : > { %p4623_p12 = por %p4622_p7, %p4621_p3 }
  0x9c   : > { %p4624_p1 = pnand %p4623_p12, %p4617_p13 }
  0x9e   : > { %4627 = shalt.err (!%p4624_p1)
}
  0x9f   : > { %s4628_s30 = scalar_lea.vmem %s4997_s22, 2048  ;;  %s4731_s10 = smov [#allocation6]  }
  0xa0   : > { %p4629_p2 = scmp.ne.s32.totalorder %s4997_s22, %s4628_s30  ;;  %s4633_s25 = sshll.u32 %s4731_s10, 4  ;;  %s4634_s25 = int_to_ptr.vmem [resolvable:$false] %s4633_s25 }
  0xa1   : > { %s4635_s0 = scalar_lea.vmem %s4634_s25, 4096  ;;  %p4636_p8 = scmp.lt.s32.totalorder %s4997_s22, %s4634_s25 }
  0xa2   : > { %p4631_p4 = pnand %p4629_p2, %p4585_p9  ;;  %p4637_p6 = scmp.lt.s32.totalorder %s4635_s0, %s4628_s30 }
  0xa4   : > { %p4632_p0 = pneg %p4631_p4  ;;  %p4638_p10 = por %p4637_p6, %p4636_p8 }
  0xa6   : > { %p4639_p3 = pnand %p4638_p10, %p4632_p0 }
  0xa8   : > { %4642 = shalt.err (!%p4639_p3)
}
  0xa9   : > { %4097 = dma.hbm_to_vmem [thread:$0]  (!%p4953_p11), %s4962_s28, 2048, %s4997_s22, %s4999_s11, %s6481_s27, %s6481_s27, %s6480_s4  }
  0xaa   : > { %p6482_p9 = scmp.ne.s32.totalorder %s6469_s21, 0 }
  0xac   : > { %392 = sbr.rel (%p6482_p9) target bundleno = 3881 (0xf29), region = 60 }
  0xb3   : > { %s5031_s24 = sand.u32 1, %s4713_s14   ;;  %p6483_p13 = scmp.ne.s32.totalorder %s6466_s19, 0 }
  0xb4   : > { %s5034_s2 = sshll.u32 %s5031_s24, 7  ;;  %s395_s23 = scalar_lea.sflag [#allocation4], %s5031_s24 }
  0xb5   : > { %s5038_s9 = scalar_lea.vmem [#allocation3], %s5034_s2 }
  0xb6   : > { %4688 = dma.done.wait (%p6483_p13), %s395_s23, 2048  }
  0xb7   : > { %4690 = vsyncadd (%p6483_p13), %s395_s23, 4294965248  ;;  %s403_s21 = sand.u32 1, %s4815_s17   ;;  %s5046_s4 = scalar_lea.vmem [#allocation6], %s5034_s2 }
  0xb8   : > { %s404_s28 = scalar_lea.sflag [#allocation7], %s403_s21 }
  0xb9   : > { %4692 = dma.done.wait (%p6483_p13), %s404_s28, 2048  }
  0xba   : > { %4694 = vsyncadd (%p6483_p13), %s404_s28, 4294965248  ;;  %p6484_p11 = scmp.eq.s32.totalorder %s4815_s17, 0 }
  0xbc   : > { %4696 = dma.done.wait (%p6484_p11), [#allocation7], 2048   ;;  %p6485_p7 = pmov %p6484_p11 }
  0xbe   : > { %4698 = vsyncadd (%p6485_p7), [#allocation7], 4294965248  ;;  %p6486_p12 = pmov %p6485_p7 }
  0xbf   : > { %p6487_p1 = pmov %p6485_p7 }
  0xc0   : > { %4700 = dma.done.wait (%p6486_p12), [#allocation10], 2048  }
  0xc1   : > { %4702 = vsyncadd (%p6487_p1), [#allocation10], 4294965248  ;;  %v4732_v0 = vmov 0   ;;  %v4155_v1 = vld [vmem:[#allocation8 + $0x4] ss:$8 sps:$4 sm:$0xff]   ;;  %v4181_v23 = vld [vmem:[#allocation9 + $0x10] sm:$0xff]  }
  0xc2   : > { %658 = vmatprep.mubr.bf16.mxu0 %v4732_v0  ;;  %v4157_v2 = vld [vmem:[#allocation8] ss:$8 sps:$4 sm:$0xff]   ;;  %626 = vmatprep.subr.bf16.mxu0 %v4155_v1  ;;  %v4158_v3 = vld [vmem:[#allocation8 + $0x14] ss:$8 sps:$4 sm:$0xff]   ;;  %v4160_v4 = vld [vmem:[#allocation8 + $0x10] ss:$8 sps:$4 sm:$0xff]  }
  0xc3   : > { %627 = vmatpush1.bf16.msra.mxu0 %v4157_v2  ;;  %v4161_v5 = vld [vmem:[#allocation8 + $0x24] ss:$8 sps:$4 sm:$0xff]   ;;  %v4163_v6 = vld [vmem:[#allocation8 + $0x20] ss:$8 sps:$4 sm:$0xff]   ;;  %v4164_v7 = vld [vmem:[#allocation8 + $0x34] ss:$8 sps:$4 sm:$0xff]  }
  0xc4   : > { %628 = vmatprep.subr.bf16.mxu0 %v4158_v3  ;;  %v4166_v8 = vld [vmem:[#allocation8 + $0x30] ss:$8 sps:$4 sm:$0xff]   ;;  %v462_v9 = vld [vmem:[%s5038_s9] sm:$0xff]  ;;  %v463_v10 = vld [vmem:[%s5038_s9 + $0x8] sm:$0xff]  ;;  %vm939_vm0 = vcmask 261120   ;;  %s4733_s22 = smov 96  }
  0xc5   : > { %v4167_v11 = vld [vmem:[#allocation8 + $0x44] ss:$8 sps:$4 sm:$0xff]   ;;  %v739_v12 = vpack.c.bf16 %v463_v10, %v462_v9  ;;  %v4169_v13 = vld [vmem:[#allocation8 + $0x40] ss:$8 sps:$4 sm:$0xff]   ;;  %v4170_v14 = vld [vmem:[#allocation8 + $0x54] ss:$8 sps:$4 sm:$0xff]  }
  0xc6   : > { %v4172_v15 = vld [vmem:[#allocation8 + $0x50] ss:$8 sps:$4 sm:$0xff]   ;;  %v4173_v16 = vld [vmem:[#allocation8 + $0x64] ss:$8 sps:$4 sm:$0xff]   ;;  %v4175_v18 = vld [vmem:[#allocation8 + $0x60] ss:$8 sps:$4 sm:$0xff]  }
  0xc7   : > { %629 = vmatpush1.bf16.msra.mxu0 %v4160_v4  ;;  %3711 = vmatprep.mubr.bf16.mxu1 %v739_v12  ;;  %v4179_v17 = vld [vmem:[#allocation9] sm:$0xff]   ;;  %v4176_v20 = vld [vmem:[#allocation8 + $0x74] ss:$8 sps:$4 sm:$0xff]   ;;  %v479_v21 = vld [vmem:[%s5046_s4 + $0x8] sm:$0xff]  ;;  %s4734_s13 = smov 64   ;;  %s4735_s29 = smov 32  }
  0xc8   : > { %630 = vmatprep.subr.bf16.mxu0 %v4161_v5  ;;  %v478_v19 = vld [vmem:[%s5046_s4] sm:$0xff]  ;;  %3695 = vmatprep.subr.bf16.mxu1 %v4179_v17  ;;  %v4180_v22 = vld [vmem:[#allocation9 + $0x8] sm:$0xff]   ;;  %v495_v25 = vadd.f32 %v479_v21, %v463_v10  ;;  %v4178_v26 = vld [vmem:[#allocation8 + $0x70] ss:$8 sps:$4 sm:$0xff]   ;;  %vm1864_vm1 = vcmask 523520   ;;  %vm2363_vm2 = vcmask 785920  }
  0xc9   : > { %3696 = vmatpush3.bf16.msra.mxu1 %v4179_v17  ;;  %v494_v24 = vadd.f32 %v478_v19, %v462_v9  ;;  %v4182_v27 = vld [vmem:[#allocation9 + $0x18] sm:$0xff]   ;;  %v464_v28 = vld [vmem:[%s5038_s9 + $0x10] sm:$0xff]  ;;  %v4183_v33 = vld [vmem:[#allocation9 + $0x20] sm:$0xff]   ;;  %vm2862_vm3 = vcmask 1048320   ;;  %s6513_s23 = sld [smem:[#allocation31_spill]]  ;;  %s6514_s19 = sld [smem:[#allocation32_spill]] }
  0xca   : > { %3697 = vmatprep.subr.bf16.mxu1 %v4180_v22  ;;  %v465_v29 = vld [vmem:[%s5038_s9 + $0x18] sm:$0xff]  ;;  %v480_v30 = vld [vmem:[%s5046_s4 + $0x10] sm:$0xff]  ;;  %v4184_v36 = vld [vmem:[#allocation9 + $0x28] sm:$0xff]   ;;  %s4736_s20 = smov [#allocation12]  }
  0xcb   : > { %631 = vmatpush1.bf16.msra.mxu0 %v4163_v6  ;;  %v481_v31 = vld [vmem:[%s5046_s4 + $0x18] sm:$0xff]  ;;  %v510_v32 = vpack.c.bf16 %v495_v25, %v494_v24  ;;  %v496_v34 = vadd.f32 %v480_v30, %v464_v28  ;;  %v466_v38 = vld [vmem:[%s5038_s9 + $0x20] sm:$0xff]  ;;  %v467_v39 = vld [vmem:[%s5038_s9 + $0x28] sm:$0xff]  ;;  %v740_v53 = vpack.c.bf16 %v465_v29, %v464_v28  ;;  %s4647_s11 = sshll.u32 %s4736_s20, 4  ;;  %s4648_s11 = int_to_ptr.vmem [resolvable:$false] %s4647_s11 }
  0xcc   : > { %632 = vmatprep.subr.bf16.mxu0 %v4164_v7  ;;  %v497_v35 = vadd.f32 %v481_v31, %v465_v29  ;;  %v482_v40 = vld [vmem:[%s5046_s4 + $0x20] sm:$0xff]  ;;  %v483_v41 = vld [vmem:[%s5046_s4 + $0x28] sm:$0xff]  ;;  %v4185_v42 = vld [vmem:[#allocation9 + $0x30] sm:$0xff]   ;;  %v741_v54 = vpack.c.bf16 %v467_v39, %v466_v38 }
  0xcd   : > { %3698 = vmatpush3.bf16.msra.mxu1 %v4180_v22  ;;  %v498_v43 = vadd.f32 %v482_v40, %v466_v38  ;;  %v499_v44 = vadd.f32 %v483_v41, %v467_v39  ;;  %v4186_v45 = vld [vmem:[#allocation9 + $0x38] sm:$0xff]   ;;  %v468_v47 = vld [vmem:[%s5038_s9 + $0x30] sm:$0xff]  ;;  %v470_v56 = vld [vmem:[%s5038_s9 + $0x40] sm:$0xff] }
  0xce   : > { %3699 = vmatprep.subr.bf16.mxu1 %v4181_v23  ;;  %v511_v37 = vpack.c.bf16 %v497_v35, %v496_v34  ;;  %v469_v48 = vld [vmem:[%s5038_s9 + $0x38] sm:$0xff]  ;;  %v484_v49 = vld [vmem:[%s5046_s4 + $0x30] sm:$0xff]  ;;  %v471_v57 = vld [vmem:[%s5038_s9 + $0x48] sm:$0xff] }
  0xcf   : > { %633 = vmatpush1.bf16.msra.mxu0 %v4166_v8  ;;  %v512_v46 = vpack.c.bf16 %v499_v44, %v498_v43  ;;  %v485_v50 = vld [vmem:[%s5046_s4 + $0x38] sm:$0xff]  ;;  %v500_v51 = vadd.f32 %v484_v49, %v468_v47  ;;  %v486_v58 = vld [vmem:[%s5046_s4 + $0x40] sm:$0xff]  ;;  %v487_v59 = vld [vmem:[%s5046_s4 + $0x48] sm:$0xff]  ;;  %v742_v62 = vpack.c.bf16 %v469_v48, %v468_v47  ;;  %v743_v63 = vpack.c.bf16 %v471_v57, %v470_v56 }
  0xd0   : > { %634 = vmatprep.subr.bf16.mxu0 %v4167_v11  ;;  %v501_v52 = vadd.f32 %v485_v50, %v469_v48  ;;  %v502_v60 = vadd.f32 %v486_v58, %v470_v56  ;;  %v503_v61 = vadd.f32 %v487_v59, %v471_v57  ;;  %v472_v2 = vld [vmem:[%s5038_s9 + $0x50] sm:$0xff]  ;;  %v473_v3 = vld [vmem:[%s5038_s9 + $0x58] sm:$0xff]  ;;  %v474_v8 = vld [vmem:[%s5038_s9 + $0x60] sm:$0xff] }
  0xd1   : > { %3700 = vmatpush3.bf16.msra.mxu1 %v4181_v23  ;;  %v488_v4 = vld [vmem:[%s5046_s4 + $0x50] sm:$0xff]  ;;  %v489_v5 = vld [vmem:[%s5046_s4 + $0x58] sm:$0xff]  ;;  %v475_v9 = vld [vmem:[%s5038_s9 + $0x68] sm:$0xff]  ;;  %v744_v10 = vpack.c.bf16 %v473_v3, %v472_v2 }
  0xd2   : > { %3701 = vmatprep.subr.bf16.mxu1 %v4182_v27  ;;  %v513_v55 = vpack.c.bf16 %v501_v52, %v500_v51  ;;  %v514_v1 = vpack.c.bf16 %v503_v61, %v502_v60  ;;  %v504_v6 = vadd.f32 %v488_v4, %v472_v2  ;;  %v505_v7 = vadd.f32 %v489_v5, %v473_v3  ;;  %v492_v21 = vld [vmem:[%s5046_s4 + $0x70] sm:$0xff]  ;;  %v493_v22 = vld [vmem:[%s5046_s4 + $0x78] sm:$0xff]  ;;  %v534_v29 = vld [vmem:[%s6437_s5] sm:$0x3] }
  0xd3   : > { %635 = vmatpush1.bf16.msra.mxu0 %v4169_v13  ;;  %v745_v11 = vpack.c.bf16 %v475_v9, %v474_v8  ;;  %v490_v13 = vld [vmem:[%s5046_s4 + $0x60] sm:$0xff] }
  0xd4   : > { %636 = vmatprep.subr.bf16.mxu0 %v4170_v14  ;;  %v515_v12 = vpack.c.bf16 %v505_v7, %v504_v6  ;;  %v491_v14 = vld [vmem:[%s5046_s4 + $0x68] sm:$0xff]  ;;  %v506_v17 = vadd.f32 %v490_v13, %v474_v8  ;;  %v5142_v60 = vld [vmem:[%s6438_s6] ss:$0 sm:$0xff] }
  0xd5   : > { %3702 = vmatpush3.bf16.msra.mxu1 %v4182_v27 }
  0xd6   : > { %3703 = vmatprep.subr.bf16.mxu1 %v4183_v33 }
  0xd7   : > { %637 = vmatpush1.bf16.msra.mxu0 %v4172_v15  ;;  %v476_v15 = vld [vmem:[%s5038_s9 + $0x70] sm:$0xff] }
  0xd8   : > { %638 = vmatprep.subr.bf16.mxu0 %v4173_v16  ;;  %v477_v16 = vld [vmem:[%s5038_s9 + $0x78] sm:$0xff]  ;;  %v508_v23 = vadd.f32 %v492_v21, %v476_v15 }
  0xd9   : > { %3704 = vmatpush3.bf16.msra.mxu1 %v4183_v33  ;;  %v746_v19 = vpack.c.bf16 %v477_v16, %v476_v15  ;;  %v509_v24 = vadd.f32 %v493_v22, %v477_v16 }
  0xda   : > { %3705 = vmatprep.subr.bf16.mxu1 %v4184_v36 }
  0xdb   : > { %639 = vmatpush1.bf16.msra.mxu0 %v4175_v18  ;;  %v507_v18 = vadd.f32 %v491_v14, %v475_v9  ;;  %v517_v25 = vpack.c.bf16 %v509_v24, %v508_v23 }
  0xdc   : > { %640 = vmatprep.subr.bf16.mxu0 %v4176_v20 }
  0xdd   : > { %3706 = vmatpush3.bf16.msra.mxu1 %v4184_v36  ;;  %v516_v20 = vpack.c.bf16 %v507_v18, %v506_v17 }
  0xde   : > { %3707 = vmatprep.subr.bf16.mxu1 %v4185_v42 }
  0xdf   : > { %641 = vmatpush1.bf16.msra.mxu0 %v4178_v26  ;;  %v536_v26 = vlaneseq }
  0xe1   : > { %3708 = vmatpush3.bf16.msra.mxu1 %v4185_v42  ;;  %v537_v27 = vshrl.u32 %v536_v26, 7 }
  0xe2   : > { %659 = vmatmul.mubr.bf16.vlgmr.msra.gmra.mrb[0].mxu0 %v510_v32  ;;  %3709 = vmatprep.subr.bf16.mxu1 %v4186_v45 }
  0xe3   : > { %668 = vmatprep.mubr.bf16.mxu0 %v4732_v0  ;;  %v538_v28 = vsub.s32 0, %v537_v27  ;;  %v542_v30 = vsub.s32 1, %v537_v27 }
  0xe5   : > { %3710 = vmatpush3.bf16.msra.mxu1 %v4186_v45  ;;  %v5103_v31 = vrot.slane %v534_v29, %v538_v28  ;;  %v5105_v33 = vrot.slane %v534_v29, %v542_v30 }
  0xe8   : > { %3712 = vmatmul.mubr.bf16.vlgmr.msra.gmra.mrb[0].mxu1 %v740_v53 }
  0xe9   : > { %3715 = vmatprep.mubr.bf16.mxu1 %v741_v54 }
  0xea   : > { %669 = vmatmul.mubr.bf16.gmra.mrb[4].mxu0 %v511_v37 }
  0xeb   : > { %678 = vmatprep.mubr.bf16.mxu0 %v4732_v0 }
  0xf0   : > { %3716 = vmatmul.mubr.bf16.gmra.mrb[4].mxu1 %v742_v62 }
  0xf1   : > { %3719 = vmatprep.mubr.bf16.mxu1 %v743_v63 }
  0xf2   : > { %679 = vmatmul.mubr.bf16.gmra.mrb[8].mxu0 %v512_v46 }
  0xf3   : > { %688 = vmatprep.mubr.bf16.mxu0 %v4732_v0 }
  0xf8   : > { %3720 = vmatmul.mubr.bf16.gmra.mrb[8].mxu1 %v744_v10 }
  0xf9   : > { %3723 = vmatprep.mubr.bf16.mxu1 %v745_v11 }
  0xfa   : > { %689 = vmatmul.mubr.bf16.gmra.mrb[12].mxu0 %v513_v55 }
  0xfb   : > { %698 = vmatprep.mubr.bf16.mxu0 %v4732_v0 }
 0x100   : > { %3724 = vmatmul.mubr.bf16.gmra.mrb[12].mxu1 %v746_v19 }
 0x102   : > { %699 = vmatmul.mubr.bf16.gmra.mrb[16].mxu0 %v514_v1 }
 0x103   : > { %708 = vmatprep.mubr.bf16.mxu0 %v4732_v0 }
 0x10a   : > { %709 = vmatmul.mubr.bf16.gmra.mrb[20].mxu0 %v515_v12 }
 0x10b   : > { %718 = vmatprep.mubr.bf16.mxu0 %v4732_v0 }
 0x112   : > { %719 = vmatmul.mubr.bf16.gmra.mrb[24].mxu0 %v516_v20 }
 0x113   : > { %728 = vmatprep.mubr.bf16.mxu0 %v4732_v0 }
 0x11a   : > { %729 = vmatmul.mubr.bf16.gmra.mrb[28].mxu0 %v517_v25 }
 0x1b5   : > { %v660_v32 = vpop.f32.mrb[0].mxu0 }
 0x1b6   : > { %v662_v34 = vpop.f32.mrb[1].mxu0  ;;  %v661_v36 = vadd.f32 %v660_v32, %v5103_v31 }
 0x1b7   : > { %v664_v35 = vpop.f32.mrb[2].mxu0  ;;  %v663_v38 = vadd.f32 %v662_v34, %v5105_v33 }
 0x1b8   : > { %v665_v0 = vadd.f32 %v664_v35, %v5103_v31  ;;  %v666_v37 = vpop.f32.mrb[3].mxu0 }
 0x1b9   : > { %v667_v39 = vadd.f32 %v666_v37, %v5105_v33 }
 0x1ba   : > { %v5111_v40 = vpack.c.bf16 %v665_v0, %v661_v36 }
 0x1bb   : > { %v5113_v41 = vpack.c.bf16 %v667_v39, %v663_v38  ;;  %v3713_v63 = vpop.f32.mrb[0].mxu1 }
 0x1bc   : > { %3743 = vmatprep.mubr.msk.bf16.mxu0 %vm939_vm0, %v5111_v40  ;;  %v861_v2 = vadd.f32 %v3713_v63, %v5142_v60  ;;  %v852_v3 = vpop.f32.mrb[1].mxu1 }
 0x1bd   : > { %v670_v42 = vpop.f32.mrb[4].mxu0  ;;  %1382 = vrot.lane.b32.xlu0 %v5113_v41, %s4733_s22  ;;  %4031 = vmatprep.subr.msk.bf16.mxu0 %vm939_vm0, %v5113_v41  ;;  %v965_v43 = vsel %vm939_vm0, %v5113_v41, 0  ;;  %v853_v5 = vadd.f32 %v5142_v60, %v852_v3  ;;  %v3714_v6 = vpop.f32.mrb[2].mxu1 }
 0x1be   : > { %v671_v44 = vadd.f32 %v670_v42, %v5103_v31  ;;  %v672_v45 = vpop.f32.mrb[5].mxu0  ;;  %3728 = vmatpush3.bf16.xpose.msra.mxu0 %v965_v43  ;;  %v864_v7 = vadd.f32 %v3714_v6, %v5142_v60  ;;  %v855_v8 = vpop.f32.mrb[3].mxu1 }
 0x1bf   : > { %v674_v46 = vpop.f32.mrb[6].mxu0  ;;  %v673_v49 = vadd.f32 %v672_v45, %v5105_v33  ;;  %v856_v11 = vadd.f32 %v5142_v60, %v855_v8 }
 0x1c0   : > { %v675_v47 = vadd.f32 %v674_v46, %v5103_v31  ;;  %v676_v48 = vpop.f32.mrb[7].mxu0  ;;  %v5159_v14 = vpack.c.bf16 %v864_v7, %v861_v2 }
 0x1c1   : > { %v677_v50 = vadd.f32 %v676_v48, %v5105_v33  ;;  %v5161_v16 = vpack.c.bf16 %v856_v11, %v853_v5 }
 0x1c2   : > { %v5127_v51 = vpack.c.bf16 %v675_v47, %v671_v44 }
 0x1c3   : > { %v5129_v52 = vpack.c.bf16 %v677_v50, %v673_v49  ;;  %v3717_v21 = vpop.f32.mrb[4].mxu1  ;;  %3759 = vmatprep.subr.bf16.mxu1 %v5161_v16 }
 0x1c4   : > { %v877_v23 = vadd.f32 %v3717_v21, %v5142_v60  ;;  %v868_v24 = vpop.f32.mrb[5].mxu1  ;;  %3760 = vmatpush3.bf16.msra.mxu1 %v5161_v16 }
 0x1c5   : > { %v680_v53 = vpop.f32.mrb[8].mxu0  ;;  %1384 = vrot.lane.b32.xlu1 %v5129_v52, %s4733_s22  ;;  %4032 = vmatprep.subr.msk.bf16.mxu0 %vm939_vm0, %v5129_v52  ;;  %v968_v54 = vsel %vm939_vm0, %v5129_v52, 0  ;;  %v869_v26 = vadd.f32 %v5142_v60, %v868_v24  ;;  %v3718_v27 = vpop.f32.mrb[6].mxu1 }
 0x1c6   : > { %v681_v55 = vadd.f32 %v680_v53, %v5103_v31  ;;  %v682_v56 = vpop.f32.mrb[9].mxu0  ;;  %3730 = vmatpush3.bf16.xpose.msra.mxu0 %v968_v54  ;;  %3761 = vmatprep.subr.bf16.mxu1 %v5159_v14  ;;  %v880_v28 = vadd.f32 %v3718_v27, %v5142_v60  ;;  %v871_v29 = vpop.f32.mrb[7].mxu1 }
 0x1c7   : > { %v684_v57 = vpop.f32.mrb[10].mxu0  ;;  %v683_v61 = vadd.f32 %v682_v56, %v5105_v33  ;;  %v872_v34 = vadd.f32 %v5142_v60, %v871_v29 }
 0x1c8   : > { %v685_v58 = vadd.f32 %v684_v57, %v5103_v31  ;;  %v686_v59 = vpop.f32.mrb[11].mxu0  ;;  %v5182_v0 = vpack.c.bf16 %v880_v28, %v877_v23  ;;  %3762 = vmatpush3.bf16.msra.mxu1 %v5159_v14 }
 0x1c9   : > { %v687_v62 = vadd.f32 %v686_v59, %v5105_v33  ;;  %v5185_v38 = vpack.c.bf16 %v872_v34, %v869_v26 }
 0x1ca   : > { %v5146_v1 = vpack.c.bf16 %v685_v58, %v681_v55 }
 0x1cb   : > { %v5149_v4 = vpack.c.bf16 %v687_v62, %v683_v61  ;;  %v3721_v45 = vpop.f32.mrb[8].mxu1  ;;  %3763 = vmatprep.subr.bf16.mxu1 %v5185_v38 }
 0x1cc   : > { %v893_v47 = vadd.f32 %v3721_v45, %v5142_v60  ;;  %v884_v48 = vpop.f32.mrb[9].mxu1  ;;  %3764 = vmatpush3.bf16.msra.mxu1 %v5185_v38 }
 0x1cd   : > { %v690_v9 = vpop.f32.mrb[12].mxu0  ;;  %4033 = vmatprep.subr.msk.bf16.mxu0 %vm939_vm0, %v5149_v4  ;;  %v971_v10 = vsel %vm939_vm0, %v5149_v4, 0  ;;  %v885_v50 = vadd.f32 %v5142_v60, %v884_v48  ;;  %v3722_v53 = vpop.f32.mrb[10].mxu1  ;;  %3765 = vmatprep.subr.bf16.mxu1 %v5182_v0 }
 0x1ce   : > { %v691_v12 = vadd.f32 %v690_v9, %v5103_v31  ;;  %v692_v13 = vpop.f32.mrb[13].mxu0  ;;  %3732 = vmatpush3.bf16.xpose.msra.mxu0 %v971_v10  ;;  %v896_v54 = vadd.f32 %v3722_v53, %v5142_v60  ;;  %v887_v55 = vpop.f32.mrb[11].mxu1 }
 0x1cf   : > { %v694_v15 = vpop.f32.mrb[14].mxu0  ;;  %v693_v19 = vadd.f32 %v692_v13, %v5105_v33  ;;  %v888_v58 = vadd.f32 %v5142_v60, %v887_v55 }
 0x1d0   : > { %v695_v17 = vadd.f32 %v694_v15, %v5103_v31  ;;  %v696_v18 = vpop.f32.mrb[15].mxu0  ;;  %v5206_v62 = vpack.c.bf16 %v896_v54, %v893_v47  ;;  %3766 = vmatpush3.bf16.msra.mxu1 %v5182_v0 }
 0x1d1   : > { %v697_v20 = vadd.f32 %v696_v18, %v5105_v33  ;;  %v5209_v2 = vpack.c.bf16 %v888_v58, %v885_v50 }
 0x1d2   : > { %v5167_v22 = vpack.c.bf16 %v695_v17, %v691_v12 }
 0x1d3   : > { %v5171_v25 = vpack.c.bf16 %v697_v20, %v693_v19  ;;  %v3725_v8 = vpop.f32.mrb[12].mxu1  ;;  %3767 = vmatprep.subr.bf16.mxu1 %v5209_v2 }
 0x1d4   : > { %v909_v10 = vadd.f32 %v3725_v8, %v5142_v60  ;;  %v900_v11 = vpop.f32.mrb[13].mxu1  ;;  %3768 = vmatpush3.bf16.msra.mxu1 %v5209_v2 }
 0x1d5   : > { %v700_v30 = vpop.f32.mrb[16].mxu0  ;;  %4034 = vmatprep.subr.msk.bf16.mxu0 %vm939_vm0, %v5171_v25  ;;  %v974_v32 = vsel %vm939_vm0, %v5171_v25, 0  ;;  %v901_v13 = vadd.f32 %v5142_v60, %v900_v11  ;;  %v3726_v15 = vpop.f32.mrb[14].mxu1  ;;  %3769 = vmatprep.subr.bf16.mxu1 %v5206_v62 }
 0x1d6   : > { %v701_v35 = vadd.f32 %v700_v30, %v5103_v31  ;;  %v702_v36 = vpop.f32.mrb[17].mxu0  ;;  %3734 = vmatpush3.bf16.xpose.msra.mxu0 %v974_v32  ;;  %v912_v17 = vadd.f32 %v3726_v15, %v5142_v60  ;;  %v903_v18 = vpop.f32.mrb[15].mxu1 }
 0x1d7   : > { %v704_v37 = vpop.f32.mrb[18].mxu0  ;;  %v703_v43 = vadd.f32 %v702_v36, %v5105_v33  ;;  %v904_v21 = vadd.f32 %v5142_v60, %v903_v18 }
 0x1d8   : > { %v705_v39 = vadd.f32 %v704_v37, %v5103_v31  ;;  %v706_v42 = vpop.f32.mrb[19].mxu0  ;;  %v5230_v26 = vpack.c.bf16 %v912_v17, %v909_v10  ;;  %3770 = vmatpush3.bf16.msra.mxu1 %v5206_v62 }
 0x1d9   : > { %v707_v44 = vadd.f32 %v706_v42, %v5105_v33  ;;  %v5233_v28 = vpack.c.bf16 %v904_v21, %v901_v13 }
 0x1da   : > { %v5191_v46 = vpack.c.bf16 %v705_v39, %v701_v35 }
 0x1db   : > { %v5195_v49 = vpack.c.bf16 %v707_v44, %v703_v43  ;;  %3771 = vmatprep.subr.bf16.mxu1 %v5233_v28 }
 0x1dc   : > { %3772 = vmatpush3.bf16.msra.mxu1 %v5233_v28 }
 0x1dd   : > { %v710_v56 = vpop.f32.mrb[20].mxu0  ;;  %4035 = vmatprep.subr.msk.bf16.mxu0 %vm939_vm0, %v5195_v49  ;;  %v977_v57 = vsel %vm939_vm0, %v5195_v49, 0  ;;  %3773 = vmatprep.subr.bf16.mxu1 %v5230_v26 }
 0x1de   : > { %v711_v59 = vadd.f32 %v710_v56, %v5103_v31  ;;  %v712_v61 = vpop.f32.mrb[21].mxu0  ;;  %3736 = vmatpush3.bf16.xpose.msra.mxu0 %v977_v57 }
 0x1df   : > { %v714_v63 = vpop.f32.mrb[22].mxu0  ;;  %v713_v6 = vadd.f32 %v712_v61, %v5105_v33 }
 0x1e0   : > { %v715_v3 = vadd.f32 %v714_v63, %v5103_v31  ;;  %v716_v5 = vpop.f32.mrb[23].mxu0  ;;  %3774 = vmatpush3.bf16.msra.mxu1 %v5230_v26 }
 0x1e1   : > { %v717_v7 = vadd.f32 %v716_v5, %v5105_v33 }
 0x1e2   : > { %v5215_v9 = vpack.c.bf16 %v715_v3, %v711_v59 }
 0x1e3   : > { %v5219_v12 = vpack.c.bf16 %v717_v7, %v713_v6 }
 0x1e5   : > { %v720_v19 = vpop.f32.mrb[24].mxu0  ;;  %4036 = vmatprep.subr.msk.bf16.mxu0 %vm939_vm0, %v5219_v12  ;;  %v980_v20 = vsel %vm939_vm0, %v5219_v12, 0 }
 0x1e6   : > { %v721_v23 = vadd.f32 %v720_v19, %v5103_v31  ;;  %v722_v24 = vpop.f32.mrb[25].mxu0  ;;  %3738 = vmatpush3.bf16.xpose.msra.mxu0 %v980_v20 }
 0x1e7   : > { %v724_v27 = vpop.f32.mrb[26].mxu0  ;;  %v723_v32 = vadd.f32 %v722_v24, %v5105_v33 }
 0x1e8   : > { %v725_v29 = vadd.f32 %v724_v27, %v5103_v31  ;;  %v726_v30 = vpop.f32.mrb[27].mxu0 }
 0x1e9   : > { %v727_v34 = vadd.f32 %v726_v30, %v5105_v33 }
 0x1ea   : > { %v5239_v60 = vpack.c.bf16 %v725_v29, %v721_v23 }
 0x1eb   : > { %v5242_v35 = vpack.c.bf16 %v727_v34, %v723_v32 }
 0x1ed   : > { %v730_v36 = vpop.f32.mrb[28].mxu0  ;;  %4037 = vmatprep.subr.msk.bf16.mxu0 %vm939_vm0, %v5242_v35  ;;  %v983_v37 = vsel %vm939_vm0, %v5242_v35, 0 }
 0x1ee   : > { %v731_v39 = vadd.f32 %v730_v36, %v5103_v31  ;;  %v732_v42 = vpop.f32.mrb[29].mxu0  ;;  %3740 = vmatpush3.bf16.xpose.msra.mxu0 %v983_v37 }
 0x1ef   : > { %v734_v43 = vpop.f32.mrb[30].mxu0  ;;  %v733_v47 = vadd.f32 %v732_v42, %v5105_v33 }
 0x1f0   : > { %v735_v44 = vadd.f32 %v734_v43, %v5103_v31  ;;  %v736_v45 = vpop.f32.mrb[31].mxu0 }
 0x1f1   : > { %v737_v48 = vadd.f32 %v736_v45, %v5105_v33 }
 0x1f2   : > { %v5254_v50 = vpack.c.bf16 %v735_v44, %v731_v39 }
 0x1f3   : > { %v5256_v53 = vpack.c.bf16 %v737_v48, %v733_v47 }
 0x1f5   : > { %4038 = vmatprep.subr.msk.bf16.mxu0 %vm939_vm0, %v5256_v53  ;;  %v986_v54 = vsel %vm939_vm0, %v5256_v53, 0 }
 0x1f6   : > { %3742 = vmatpush3.bf16.xpose.msra.mxu0 %v986_v54 }
 0x1fd   : > { %3744 = vmatmul.mubr.msk.bf16.vlgmr.msra.gmra.mrb[32].mxu0 %vm939_vm0, %v5127_v51 }
 0x1fe   : > { %3747 = vmatprep.mubr.msk.bf16.mxu0 %vm939_vm0, %v5146_v1 }
 0x205   : > { %3748 = vmatmul.mubr.msk.bf16.gmra.mrb[36].mxu0 %vm939_vm0, %v5167_v22 }
 0x206   : > { %3751 = vmatprep.mubr.msk.bf16.mxu0 %vm939_vm0, %v5191_v46 }
 0x20d   : > { %3752 = vmatmul.mubr.msk.bf16.gmra.mrb[40].mxu0 %vm939_vm0, %v5215_v9 }
 0x20e   : > { %3755 = vmatprep.mubr.msk.bf16.mxu0 %vm939_vm0, %v5239_v60 }
 0x215   : > { %3756 = vmatmul.mubr.msk.bf16.gmra.mrb[44].mxu0 %vm939_vm0, %v5254_v50 }
 0x22f   : > { %v5276_v31 = vpop.permute.xlu0 %1382 }
 0x230   : > { %4039 = vmatprep.subr.msk.bf16.mxu1 %vm939_vm0, %v5276_v31 }
 0x237   : > { %v5314_v15 = vpop.permute.xlu1 %1384 }
 0x2d0   : > { %v3745_v33 = vpop.f32.mrb[32].mxu0 }
 0x2d1   : > { %1089 = vmax.xlane.f32.xlu1 %v3745_v33  ;;  %v1022_v55 = vpop.f32.mrb[33].mxu0 }
 0x2d2   : > { %1085 = vmax.xlane.f32.xlu0 %v1022_v55  ;;  %v3746_v56 = vpop.f32.mrb[34].mxu0 }
 0x2d3   : > { %v1025_v57 = vpop.f32.mrb[35].mxu0 }
 0x2d5   : > { %1091 = vmax.xlane.f32.xlu1 %v3746_v56 }
 0x2d6   : > { %1087 = vmax.xlane.f32.xlu0 %v1025_v57 }
 0x2d8   : > { %v3749_v58 = vpop.f32.mrb[36].mxu0 }
 0x2d9   : > { %v5280_v59 = vpop.f32.mrb[37].mxu0 }
 0x2da   : > { %1097 = vmax.xlane.f32.xlu0 %v3749_v58  ;;  %v5282_v61 = vpop.f32.mrb[38].mxu0 }
 0x2db   : > { %1099 = vmax.xlane.f32.xlu1 %v5282_v61  ;;  %v5285_v63 = vpop.f32.mrb[39].mxu0 }
 0x2de   : > { %1093 = vmax.xlane.f32.xlu0 %v5280_v59 }
 0x2df   : > { %1095 = vmax.xlane.f32.xlu1 %v5285_v63 }
 0x2e0   : > { %v5289_v3 = vpop.f32.mrb[40].mxu0 }
 0x2e1   : > { %v5291_v5 = vpop.f32.mrb[41].mxu0 }
 0x2e2   : > { %1105 = vmax.xlane.f32.xlu0 %v5289_v3  ;;  %v5294_v6 = vpop.f32.mrb[42].mxu0 }
 0x2e3   : > { %1107 = vmax.xlane.f32.xlu1 %v5294_v6  ;;  %v5297_v7 = vpop.f32.mrb[43].mxu0 }
 0x2e6   : > { %1101 = vmax.xlane.f32.xlu0 %v5291_v5 }
 0x2e7   : > { %1103 = vmax.xlane.f32.xlu1 %v5297_v7 }
 0x2e8   : > { %v3757_v8 = vpop.f32.mrb[44].mxu0 }
 0x2e9   : > { %v5301_v10 = vpop.f32.mrb[45].mxu0 }
 0x2ea   : > { %1113 = vmax.xlane.f32.xlu0 %v3757_v8  ;;  %v5303_v11 = vpop.f32.mrb[46].mxu0 }
 0x2eb   : > { %v5305_v13 = vpop.f32.mrb[47].mxu0 }
 0x2ee   : > { %1109 = vmax.xlane.f32.xlu0 %v5301_v10 }
 0x2f8   : > { %1388 = vrot.lane.b32.xlu1 %v5171_v25, %s4733_s22 }
 0x304   : > { %1386 = vrot.lane.b32.xlu0 %v5149_v4, %s4733_s22 }
 0x31c   : > { %1115 = vmax.xlane.f32.xlu1 %v5303_v11 }
 0x320   : > { %1111 = vmax.xlane.f32.xlu1 %v5305_v13 }
 0x35e   : > { %v1090_v17 = vpop.xlane.xlu1 %1089 }
 0x35f   : > { %v1119_v18 = vsub.f32 %v3745_v33, %v1090_v17  ;;  %v1086_v19 = vpop.xlane.xlu0 %1085 }
 0x360   : > { %v1117_v20 = vsub.f32 %v1022_v55, %v1086_v19 }
 0x361   : > { %v1137_v21 = vmul.f32 1.442695, %v1119_v18 }
 0x362   : > { %v1133_v23 = vmul.f32 1.442695, %v1117_v20  ;;  %v1092_v24 = vpop.xlane.xlu1 %1091 }
 0x363   : > { %4195 = vpow2.f32 %v1137_v21  ;;  %v1120_v27 = vsub.f32 %v3746_v56, %v1092_v24  ;;  %v1088_v29 = vpop.xlane.xlu0 %1087 }
 0x364   : > { %v1118_v30 = vsub.f32 %v1025_v57, %v1088_v29  ;;  %4197 = vpow2.f32 %v1133_v23 }
 0x365   : > { %v1139_v32 = vmul.f32 1.442695, %v1120_v27 }
 0x366   : > { %v1135_v34 = vmul.f32 1.442695, %v1118_v30 }
 0x367   : > { %4199 = vpow2.f32 %v1139_v32  ;;  %v1098_v43 = vpop.xlane.xlu0 %1097 }
 0x368   : > { %4201 = vpow2.f32 %v1135_v34  ;;  %v1100_v47 = vpop.xlane.xlu1 %1099  ;;  %v1123_v33 = vsub.f32 %v3749_v58, %v1098_v43 }
 0x369   : > { %v1124_v19 = vsub.f32 %v5282_v61, %v1100_v47 }
 0x36a   : > { %v1145_v57 = vmul.f32 1.442695, %v1123_v33 }
 0x36b   : > { %v1094_v44 = vpop.xlane.xlu0 %1093  ;;  %v1147_v27 = vmul.f32 1.442695, %v1124_v19 }
 0x36c   : > { %v1096_v54 = vpop.xlane.xlu1 %1095  ;;  %v1121_v55 = vsub.f32 %v5280_v59, %v1094_v44  ;;  %4203 = vpow2.f32 %v1145_v57 }
 0x36d   : > { %v5316_v36 = vpop.eup %4195  ;;  %v1122_v17 = vsub.f32 %v5285_v63, %v1096_v54 }
 0x36e   : > { %1169 = vadd.xlane.f32.xlu0 %v5316_v36  ;;  %v5319_v37 = vpop.eup %4197  ;;  %v1141_v20 = vmul.f32 1.442695, %v1121_v55 }
 0x36f   : > { %v1106_v45 = vpop.xlane.xlu0 %1105  ;;  %v1143_v21 = vmul.f32 1.442695, %v1122_v17 }
 0x370   : > { %v1108_v18 = vpop.xlane.xlu1 %1107  ;;  %4205 = vpow2.f32 %v1141_v20  ;;  %v1127_v29 = vsub.f32 %v5289_v3, %v1106_v45 }
 0x371   : > { %v5321_v39 = vpop.eup %4199  ;;  %4207 = vpow2.f32 %v1143_v21  ;;  %v1128_v3 = vsub.f32 %v5294_v6, %v1108_v18 }
 0x372   : > { %1165 = vadd.xlane.f32.xlu0 %v5319_v37  ;;  %1171 = vadd.xlane.f32.xlu1 %v5321_v39  ;;  %v5325_v42 = vpop.eup %4201  ;;  %4209 = vpow2.f32 %v1147_v27  ;;  %v1153_v32 = vmul.f32 1.442695, %v1127_v29 }
 0x373   : > { %v1102_v48 = vpop.xlane.xlu0 %1101  ;;  %v1155_v47 = vmul.f32 1.442695, %v1128_v3 }
 0x374   : > { %v1104_v30 = vpop.xlane.xlu1 %1103  ;;  %v1125_v63 = vsub.f32 %v5291_v5, %v1102_v48 }
 0x375   : > { %v1126_v48 = vsub.f32 %v5297_v7, %v1104_v30 }
 0x376   : > { %1167 = vadd.xlane.f32.xlu1 %v5325_v42  ;;  %v5340_v43 = vpop.eup %4203 }
 0x377   : > { %v1114_v56 = vpop.xlane.xlu0 %1113 }
 0x378   : > { %v1131_v23 = vsub.f32 %v3757_v8, %v1114_v56  ;;  %v5338_v34 = vpop.permute.xlu1 %1388  ;;  %v1149_v8 = vmul.f32 1.442695, %v1125_v63 }
 0x37a   : > { %v1161_v58 = vmul.f32 1.442695, %v1131_v23  ;;  %v5344_v44 = vpop.eup %4205 }
 0x37b   : > { %v1110_v24 = vpop.xlane.xlu0 %1109  ;;  %v5346_v45 = vpop.eup %4207 }
 0x37c   : > { %v1129_v59 = vsub.f32 %v5301_v10, %v1110_v24  ;;  %4211 = vpow2.f32 %v1161_v58  ;;  %v5352_v33 = vpop.eup %4209 }
 0x37d   : > { %4213 = vpow2.f32 %v1153_v32 }
 0x37e   : > { %v1157_v61 = vmul.f32 1.442695, %v1129_v59 }
 0x37f   : > { %v1387_v23 = vpop.permute.xlu0 %1386 }
 0x380   : > { %4215 = vpow2.f32 %v1157_v61 }
 0x381   : > { %4217 = vpow2.f32 %v1149_v8 }
 0x386   : > { %v5354_v55 = vpop.eup %4211 }
 0x387   : > { %1392 = vrot.lane.b32.xlu1 %v5219_v12, %s4733_s22  ;;  %v5359_v57 = vpop.eup %4213 }
 0x388   : > { %1390 = vrot.lane.b32.xlu0 %v5195_v49, %s4733_s22 }
 0x38a   : > { %v5361_v17 = vpop.eup %4215 }
 0x38b   : > { %v5365_v18 = vpop.eup %4217 }
 0x3a7   : > { %1177 = vadd.xlane.f32.xlu0 %v5340_v43 }
 0x3a9   : > { %v1116_v10 = vpop.xlane.xlu1 %1115 }
 0x3aa   : > { %v1132_v5 = vsub.f32 %v5303_v11, %v1116_v10  ;;  %v1151_v11 = vmul.f32 1.442695, %v1126_v48  ;;  %v1423_v48 = vsel %vm939_vm0, %v5276_v31, 0 }
 0x3ab   : > { %1175 = vadd.xlane.f32.xlu0 %v5346_v45  ;;  %1173 = vadd.xlane.f32.xlu1 %v5344_v44 }
 0x3ac   : > { %v1163_v54 = vmul.f32 1.442695, %v1132_v5 }
 0x3ad   : > { %v1112_v6 = vpop.xlane.xlu1 %1111 }
 0x3ae   : > { %4219 = vpow2.f32 %v1163_v54  ;;  %v1130_v56 = vsub.f32 %v5305_v13, %v1112_v6 }
 0x3af   : > { %1193 = vadd.xlane.f32.xlu0 %v5354_v55  ;;  %1179 = vadd.xlane.f32.xlu1 %v5352_v33  ;;  %4221 = vpow2.f32 %v1155_v47 }
 0x3b0   : > { %4223 = vpow2.f32 %v1151_v11  ;;  %v1159_v7 = vmul.f32 1.442695, %v1130_v56 }
 0x3b2   : > { %4225 = vpow2.f32 %v1159_v7 }
 0x3b3   : > { %1189 = vadd.xlane.f32.xlu0 %v5361_v17  ;;  %1185 = vadd.xlane.f32.xlu1 %v5359_v57 }
 0x3b7   : > { %1181 = vadd.xlane.f32.xlu1 %v5365_v18 }
 0x3b8   : > { %v5368_v19 = vpop.eup %4219 }
 0x3b9   : > { %1195 = vadd.xlane.f32.xlu0 %v5368_v19  ;;  %v5371_v13 = vpop.eup %4221 }
 0x3ba   : > { %v5374_v20 = vpop.eup %4223 }
 0x3bb   : > { %1187 = vadd.xlane.f32.xlu1 %v5371_v13 }
 0x3bc   : > { %v5377_v21 = vpop.eup %4225 }
 0x3bf   : > { %1183 = vadd.xlane.f32.xlu1 %v5374_v20 }
 0x3c3   : > { %1191 = vadd.xlane.f32.xlu1 %v5377_v21 }
 0x3cf   : > { %1394 = vrot.lane.b32.xlu0 %v5242_v35, %s4733_s22 }
 0x3d3   : > { %1358 = vrot.lane.b32.xlu0 %v5111_v40, %s4733_s22 }
 0x3d4   : > { %1396 = vrot.lane.b32.xlu1 %v5256_v53, %s4733_s22 }
 0x3d7   : > { %1362 = vrot.lane.b32.xlu0 %v5146_v1, %s4733_s22 }
 0x3d8   : > { %1360 = vrot.lane.b32.xlu1 %v5127_v51, %s4733_s22 }
 0x3db   : > { %1366 = vrot.lane.b32.xlu0 %v5191_v46, %s4733_s22 }
 0x3dc   : > { %1364 = vrot.lane.b32.xlu1 %v5167_v22, %s4733_s22 }
 0x3df   : > { %1370 = vrot.lane.b32.xlu0 %v5239_v60, %s4733_s22 }
 0x3e0   : > { %1368 = vrot.lane.b32.xlu1 %v5215_v9, %s4733_s22 }
 0x3e3   : > { %1703 = vrot.lane.b32.xlu0 %v5161_v16, %s4733_s22 }
 0x3e4   : > { %1372 = vrot.lane.b32.xlu1 %v5254_v50, %s4733_s22 }
 0x3e7   : > { %1707 = vrot.lane.b32.xlu0 %v5185_v38, %s4733_s22 }
 0x3e8   : > { %1705 = vrot.lane.b32.xlu1 %v5159_v14, %s4733_s22 }
 0x3eb   : > { %1711 = vrot.lane.b32.xlu0 %v5209_v2, %s4733_s22 }
 0x3ec   : > { %1709 = vrot.lane.b32.xlu1 %v5182_v0, %s4733_s22 }
 0x3ef   : > { %1715 = vrot.lane.b32.xlu0 %v5233_v28, %s4733_s22 }
 0x3f0   : > { %1713 = vrot.lane.b32.xlu1 %v5206_v62, %s4733_s22 }
 0x3f3   : > { %1889 = vrot.lane.b32.xlu0 %v5113_v41, %s4734_s13 }
 0x3f4   : > { %1717 = vrot.lane.b32.xlu1 %v5230_v26, %s4733_s22 }
 0x3f8   : > { %1891 = vrot.lane.b32.xlu1 %v5129_v52, %s4734_s13 }
 0x3fb   : > { %v1170_v24 = vpop.xlane.xlu0 %1169 }
 0x3ff   : > { %v1166_v27 = vpop.xlane.xlu0 %1165  ;;  %v1172_v29 = vpop.xlane.xlu1 %1171 }
 0x400   : > { %4227 = vrcp.f32 %v1172_v29 }
 0x401   : > { %4229 = vrcp.f32 %v1166_v27 }
 0x402   : > { %4231 = vrcp.f32 %v1170_v24 }
 0x403   : > { %v1168_v30 = vpop.xlane.xlu1 %1167  ;;  %v1391_v31 = vpop.permute.xlu0 %1390 }
 0x404   : > { %4233 = vrcp.f32 %v1168_v30 }
 0x40a   : > { %v4228_v58 = vpop.eup %4227 }
 0x40b   : > { %v4230_v59 = vpop.eup %4229  ;;  %v1216_v61 = vmul.f32 %v4228_v58, %v5321_v39  ;;  %v1426_v39 = vsel %vm939_vm0, %v5314_v15, 0 }
 0x40c   : > { %v4232_v32 = vpop.eup %4231  ;;  %v1213_v3 = vmul.f32 %v4230_v59, %v5319_v37  ;;  %v1429_v37 = vsel %vm939_vm0, %v1387_v23, 0 }
 0x40d   : > { %v1215_v10 = vmul.f32 %v4232_v32, %v5316_v36  ;;  %v1432_v36 = vsel %vm939_vm0, %v5338_v34, 0 }
 0x40e   : > { %v4234_v63 = vpop.eup %4233 }
 0x40f   : > { %v1214_v8 = vmul.f32 %v4234_v63, %v5325_v42  ;;  %v1230_v47 = vpack.c.bf16 %v1216_v61, %v1215_v10  ;;  %v1393_v42 = vpop.permute.xlu1 %1392 }
 0x410   : > { %v1438_v7 = vsel %vm939_vm0, %v1393_v42, 0 }
 0x411   : > { %v1229_v5 = vpack.c.bf16 %v1214_v8, %v1213_v3 }
 0x413   : > { %3775 = vmatprep.mubr.bf16.mxu1 %v1229_v5 }
 0x414   : > { %3776 = vmatmul.mubr.bf16.vlgmr.msra.gmra.mrb[16].mxu1 %v1230_v47 }
 0x415   : > { %3792 = vmatpush3.bf16.xpose.msra.mxu1 %v1423_v48 }
 0x416   : > { %4040 = vmatprep.subr.msk.bf16.mxu1 %vm939_vm0, %v5314_v15  ;;  %v1435_v15 = vsel %vm939_vm0, %v1391_v31, 0 }
 0x41d   : > { %3794 = vmatpush3.bf16.xpose.msra.mxu1 %v1426_v39 }
 0x41e   : > { %4041 = vmatprep.subr.msk.bf16.mxu1 %vm939_vm0, %v1387_v23 }
 0x425   : > { %3796 = vmatpush3.bf16.xpose.msra.mxu1 %v1429_v37 }
 0x426   : > { %4042 = vmatprep.subr.msk.bf16.mxu1 %vm939_vm0, %v5338_v34 }
 0x42d   : > { %3798 = vmatpush3.bf16.xpose.msra.mxu1 %v1432_v36 }
 0x42e   : > { %4043 = vmatprep.subr.msk.bf16.mxu1 %vm939_vm0, %v1391_v31 }
 0x434   : > { %v1178_v54 = vpop.xlane.xlu0 %1177 }
 0x435   : > { %3800 = vmatpush3.bf16.xpose.msra.mxu1 %v1435_v15 }
 0x436   : > { %4044 = vmatprep.subr.msk.bf16.mxu1 %vm939_vm0, %v1393_v42 }
 0x438   : > { %v1176_v6 = vpop.xlane.xlu0 %1175  ;;  %v1174_v11 = vpop.xlane.xlu1 %1173 }
 0x439   : > { %4235 = vrcp.f32 %v1176_v6 }
 0x43a   : > { %4237 = vrcp.f32 %v1174_v11 }
 0x43b   : > { %4239 = vrcp.f32 %v1178_v54 }
 0x43c   : > { %v1194_v56 = vpop.xlane.xlu0 %1193  ;;  %v1180_v34 = vpop.xlane.xlu1 %1179 }
 0x43d   : > { %3802 = vmatpush3.bf16.xpose.msra.mxu1 %v1438_v7  ;;  %4241 = vrcp.f32 %v1180_v34 }
 0x440   : > { %v1186_v23 = vpop.xlane.xlu1 %1185  ;;  %v1190_v24 = vpop.xlane.xlu0 %1189 }
 0x443   : > { %v4236_v27 = vpop.eup %4235 }
 0x444   : > { %v4238_v29 = vpop.eup %4237  ;;  %v1182_v30 = vpop.xlane.xlu1 %1181  ;;  %v1218_v58 = vmul.f32 %v4236_v27, %v5346_v45 }
 0x445   : > { %v1217_v59 = vmul.f32 %v4238_v29, %v5344_v44  ;;  %v4240_v32 = vpop.eup %4239 }
 0x446   : > { %v1196_v63 = vpop.xlane.xlu0 %1195  ;;  %v1219_v10 = vmul.f32 %v4240_v32, %v5340_v43 }
 0x447   : > { %v1231_v61 = vpack.c.bf16 %v1218_v58, %v1217_v59  ;;  %v4242_v3 = vpop.eup %4241 }
 0x448   : > { %v1188_v8 = vpop.xlane.xlu1 %1187  ;;  %v1220_v5 = vmul.f32 %v4242_v3, %v5352_v33 }
 0x449   : > { %3779 = vmatprep.mubr.bf16.mxu1 %v1231_v61  ;;  %4243 = vrcp.f32 %v1188_v8 }
 0x44a   : > { %v1395_v47 = vpop.permute.xlu0 %1394  ;;  %4245 = vrcp.f32 %v1182_v30  ;;  %v1232_v48 = vpack.c.bf16 %v1220_v5, %v1219_v10 }
 0x44b   : > { %4045 = vmatprep.subr.msk.bf16.mxu1 %vm939_vm0, %v1395_v47  ;;  %v1441_v45 = vsel %vm939_vm0, %v1395_v47, 0  ;;  %4247 = vrcp.f32 %v1186_v23 }
 0x44c   : > { %3804 = vmatpush3.bf16.xpose.msra.mxu1 %v1441_v45  ;;  %v1184_v44 = vpop.xlane.xlu1 %1183 }
 0x44d   : > { %3780 = vmatmul.mubr.bf16.gmra.mrb[20].mxu1 %v1232_v48  ;;  %4249 = vrcp.f32 %v1184_v44 }
 0x44e   : > { %v1359_v39 = vpop.permute.xlu0 %1358  ;;  %4251 = vrcp.f32 %v1190_v24 }
 0x450   : > { %v1192_v37 = vpop.xlane.xlu1 %1191 }
 0x451   : > { %4253 = vrcp.f32 %v1192_v37 }
 0x452   : > { %4255 = vrcp.f32 %v1196_v63  ;;  %v1363_v43 = vpop.permute.xlu0 %1362 }
 0x453   : > { %v4244_v33 = vpop.eup %4243  ;;  %4257 = vrcp.f32 %v1194_v56 }
 0x454   : > { %v1397_v36 = vpop.permute.xlu1 %1396  ;;  %v4246_v31 = vpop.eup %4245  ;;  %v1224_v11 = vmul.f32 %v4244_v33, %v5371_v13 }
 0x455   : > { %4046 = vmatprep.subr.msk.bf16.mxu1 %vm939_vm0, %v1397_v36  ;;  %v1444_v42 = vsel %vm939_vm0, %v1397_v36, 0  ;;  %v4248_v54 = vpop.eup %4247  ;;  %v1221_v34 = vmul.f32 %v4246_v31, %v5365_v18 }
 0x456   : > { %v1367_v15 = vpop.permute.xlu0 %1366  ;;  %3806 = vmatpush3.bf16.xpose.msra.mxu1 %v1444_v42  ;;  %v1223_v56 = vmul.f32 %v4248_v54, %v5359_v57 }
 0x457   : > { %v4250_v6 = vpop.eup %4249 }
 0x458   : > { %v1361_v7 = vpop.permute.xlu1 %1360  ;;  %v1222_v23 = vmul.f32 %v4250_v6, %v5374_v20  ;;  %v4252_v24 = vpop.eup %4251  ;;  %v1234_v58 = vpack.c.bf16 %v1224_v11, %v1223_v56 }
 0x459   : > { %v1225_v63 = vmul.f32 %v4252_v24, %v5361_v17 }
 0x45a   : > { %v1371_v27 = vpop.permute.xlu0 %1370  ;;  %v1233_v29 = vpack.c.bf16 %v1222_v23, %v1221_v34 }
 0x45b   : > { %v4254_v30 = vpop.eup %4253 }
 0x45c   : > { %v4256_v59 = vpop.eup %4255  ;;  %3783 = vmatprep.mubr.bf16.mxu1 %v1233_v29  ;;  %v1365_v32 = vpop.permute.xlu1 %1364  ;;  %v1226_v61 = vmul.f32 %v4254_v30, %v5377_v21 }
 0x45d   : > { %3784 = vmatmul.mubr.bf16.gmra.mrb[24].mxu1 %v1234_v58  ;;  %v4258_v13 = vpop.eup %4257  ;;  %v1228_v20 = vmul.f32 %v4256_v59, %v5368_v19 }
 0x45e   : > { %v1704_v3 = vpop.permute.xlu0 %1703  ;;  %v1235_v18 = vpack.c.bf16 %v1226_v61, %v1225_v63  ;;  %v1227_v8 = vmul.f32 %v4258_v13, %v5354_v55 }
 0x45f   : > { %3823 = vmatprep.subr.bf16.mxu0 %v1704_v3 }
 0x460   : > { %3787 = vmatprep.mubr.bf16.mxu1 %v1235_v18  ;;  %v1369_v57 = vpop.permute.xlu1 %1368  ;;  %3824 = vmatpush3.bf16.msra.mxu0 %v1704_v3  ;;  %v1236_v10 = vpack.c.bf16 %v1228_v20, %v1227_v8 }
 0x462   : > { %v1708_v21 = vpop.permute.xlu0 %1707 }
 0x464   : > { %v1373_v5 = vpop.permute.xlu1 %1372 }
 0x465   : > { %3788 = vmatmul.mubr.bf16.gmra.mrb[28].mxu1 %v1236_v10 }
 0x466   : > { %3807 = vmatprep.mubr.msk.bf16.mxu1 %vm939_vm0, %v1359_v39  ;;  %v1712_v19 = vpop.permute.xlu0 %1711 }
 0x468   : > { %v1706_v17 = vpop.permute.xlu1 %1705 }
 0x469   : > { %3825 = vmatprep.subr.bf16.mxu0 %v1706_v17 }
 0x46a   : > { %3826 = vmatpush3.bf16.msra.mxu0 %v1706_v17  ;;  %v1716_v48 = vpop.permute.xlu0 %1715 }
 0x46b   : > { %3827 = vmatprep.subr.bf16.mxu0 %v1708_v21 }
 0x46c   : > { %v1710_v47 = vpop.permute.xlu1 %1709 }
 0x46d   : > { %3808 = vmatmul.mubr.msk.bf16.vlgmr.msra.gmra.mrb[32].mxu1 %vm939_vm0, %v1361_v7 }
 0x46e   : > { %3811 = vmatprep.mubr.msk.bf16.mxu1 %vm939_vm0, %v1363_v43  ;;  %3828 = vmatpush3.bf16.msra.mxu0 %v1708_v21  ;;  %v5463_v44 = vpop.permute.xlu0 %1889 }
 0x46f   : > { %3829 = vmatprep.subr.bf16.mxu0 %v1710_v47 }
 0x470   : > { %v1714_v55 = vpop.permute.xlu1 %1713 }
 0x472   : > { %3830 = vmatpush3.bf16.msra.mxu0 %v1710_v47 }
 0x473   : > { %3831 = vmatprep.subr.bf16.mxu0 %v1712_v19 }
 0x474   : > { %v1718_v45 = vpop.permute.xlu1 %1717 }
 0x475   : > { %3812 = vmatmul.mubr.msk.bf16.gmra.mrb[36].mxu1 %vm939_vm0, %v1365_v32 }
 0x476   : > { %3815 = vmatprep.mubr.msk.bf16.mxu1 %vm939_vm0, %v1367_v15  ;;  %3832 = vmatpush3.bf16.msra.mxu0 %v1712_v19 }
 0x477   : > { %3833 = vmatprep.subr.bf16.mxu0 %v1714_v55 }
 0x47a   : > { %3834 = vmatpush3.bf16.msra.mxu0 %v1714_v55 }
 0x47b   : > { %3835 = vmatprep.subr.bf16.mxu0 %v1716_v48 }
 0x47d   : > { %3816 = vmatmul.mubr.msk.bf16.gmra.mrb[40].mxu1 %vm939_vm0, %v1369_v57 }
 0x47e   : > { %3819 = vmatprep.mubr.msk.bf16.mxu1 %vm939_vm0, %v1371_v27  ;;  %3836 = vmatpush3.bf16.msra.mxu0 %v1716_v48 }
 0x47f   : > { %3837 = vmatprep.subr.bf16.mxu0 %v1718_v45 }
 0x482   : > { %3838 = vmatpush3.bf16.msra.mxu0 %v1718_v45 }
 0x483   : > { %4047 = vmatprep.subr.msk.bf16.mxu0 %vm939_vm0, %v5463_v44 }
 0x485   : > { %3820 = vmatmul.mubr.msk.bf16.gmra.mrb[44].mxu1 %vm939_vm0, %v1373_v5 }
 0x4e7   : > { %v3777_v39 = vpop.f32.mrb[16].mxu1 }
 0x4e8   : > { %v1271_v37 = vpop.f32.mrb[17].mxu1 }
 0x4e9   : > { %v3778_v43 = vpop.f32.mrb[18].mxu1 }
 0x4ea   : > { %v1335_v33 = vpack.c.bf16 %v3778_v43, %v3777_v39  ;;  %v1274_v36 = vpop.f32.mrb[19].mxu1 }
 0x4eb   : > { %v1334_v31 = vpack.c.bf16 %v1274_v36, %v1271_v37  ;;  %v5513_v37 = vpop.permute.xlu1 %1891 }
 0x4ec   : > { %1343 = vst.msk [vmem:[#allocation2 + $0x8] sm:$0xff] %vm939_vm0, %v1335_v33 }
 0x4ed   : > { %1342 = vst.msk [vmem:[#allocation2] sm:$0xff] %vm939_vm0, %v1334_v31 }
 0x520   : > { %v3781_v42 = vpop.f32.mrb[20].mxu1 }
 0x521   : > { %v1287_v54 = vpop.f32.mrb[21].mxu1 }
 0x522   : > { %v3782_v15 = vpop.f32.mrb[22].mxu1 }
 0x523   : > { %v1337_v6 = vpack.c.bf16 %v3782_v15, %v3781_v42  ;;  %v1290_v11 = vpop.f32.mrb[23].mxu1 }
 0x524   : > { %v1336_v7 = vpack.c.bf16 %v1290_v11, %v1287_v54 }
 0x525   : > { %1345 = vst.msk [vmem:[#allocation2 + $0x18] sm:$0xff] %vm939_vm0, %v1337_v6 }
 0x526   : > { %1344 = vst.msk [vmem:[#allocation2 + $0x10] sm:$0xff] %vm939_vm0, %v1336_v7 }
 0x530   : > { %v3785_v34 = vpop.f32.mrb[24].mxu1 }
 0x531   : > { %v1303_v23 = vpop.f32.mrb[25].mxu1 }
 0x532   : > { %v3786_v24 = vpop.f32.mrb[26].mxu1 }
 0x533   : > { %v1339_v56 = vpack.c.bf16 %v3786_v24, %v3785_v34  ;;  %v1306_v27 = vpop.f32.mrb[27].mxu1 }
 0x534   : > { %v1338_v29 = vpack.c.bf16 %v1306_v27, %v1303_v23 }
 0x535   : > { %1347 = vst.msk [vmem:[#allocation2 + $0x28] sm:$0xff] %vm939_vm0, %v1339_v56 }
 0x536   : > { %1346 = vst.msk [vmem:[#allocation2 + $0x20] sm:$0xff] %vm939_vm0, %v1338_v29 }
 0x538   : > { %v3789_v30 = vpop.f32.mrb[28].mxu1 }
 0x539   : > { %v1319_v58 = vpop.f32.mrb[29].mxu1 }
 0x53a   : > { %v3790_v59 = vpop.f32.mrb[30].mxu1 }
 0x53b   : > { %v1341_v32 = vpack.c.bf16 %v3790_v59, %v3789_v30  ;;  %v1322_v63 = vpop.f32.mrb[31].mxu1 }
 0x53c   : > { %v1340_v61 = vpack.c.bf16 %v1322_v63, %v1319_v58 }
 0x53d   : > { %1349 = vst.msk [vmem:[#allocation2 + $0x38] sm:$0xff] %vm939_vm0, %v1341_v32 }
 0x53e   : > { %1348 = vst.msk [vmem:[#allocation2 + $0x30] sm:$0xff] %vm939_vm0, %v1340_v61 }
 0x540   : > { %v3809_v13 = vpop.f32.mrb[32].mxu1 }
 0x541   : > { %1547 = vmax.xlane.f32.xlu0 %v3809_v13  ;;  %v1480_v3 = vpop.f32.mrb[33].mxu1 }
 0x542   : > { %v3810_v18 = vpop.f32.mrb[34].mxu1 }
 0x543   : > { %v1483_v20 = vpop.f32.mrb[35].mxu1 }
 0x544   : > { %1545 = vmax.xlane.f32.xlu1 %v1483_v20 }
 0x545   : > { %1543 = vmax.xlane.f32.xlu0 %v1480_v3 }
 0x548   : > { %v3813_v57 = vpop.f32.mrb[36].mxu1 }
 0x549   : > { %1549 = vmax.xlane.f32.xlu0 %v3810_v18  ;;  %v5476_v8 = vpop.f32.mrb[37].mxu1 }
 0x54a   : > { %v5478_v10 = vpop.f32.mrb[38].mxu1 }
 0x54b   : > { %1557 = vmax.xlane.f32.xlu1 %v5478_v10  ;;  %v5481_v5 = vpop.f32.mrb[39].mxu1 }
 0x54d   : > { %1555 = vmax.xlane.f32.xlu0 %v3813_v57 }
 0x54f   : > { %1553 = vmax.xlane.f32.xlu1 %v5481_v5 }
 0x550   : > { %v5484_v17 = vpop.f32.mrb[40].mxu1 }
 0x551   : > { %1551 = vmax.xlane.f32.xlu0 %v5476_v8  ;;  %v5487_v21 = vpop.f32.mrb[41].mxu1 }
 0x552   : > { %v5489_v47 = vpop.f32.mrb[42].mxu1 }
 0x553   : > { %1565 = vmax.xlane.f32.xlu1 %v5489_v47  ;;  %v5492_v19 = vpop.f32.mrb[43].mxu1 }
 0x555   : > { %1563 = vmax.xlane.f32.xlu0 %v5484_v17 }
 0x557   : > { %1561 = vmax.xlane.f32.xlu1 %v5492_v19 }
 0x558   : > { %v5496_v55 = vpop.f32.mrb[44].mxu1 }
 0x559   : > { %1559 = vmax.xlane.f32.xlu0 %v5487_v21  ;;  %v5499_v48 = vpop.f32.mrb[45].mxu1 }
 0x55a   : > { %v5501_v45 = vpop.f32.mrb[46].mxu1 }
 0x55b   : > { %v5503_v39 = vpop.f32.mrb[47].mxu1 }
 0x55d   : > { %1571 = vmax.xlane.f32.xlu0 %v5496_v55 }
 0x561   : > { %1567 = vmax.xlane.f32.xlu0 %v5499_v48 }
 0x568   : > { %1895 = vrot.lane.b32.xlu1 %v5171_v25, %s4734_s13 }
 0x577   : > { %1893 = vrot.lane.b32.xlu0 %v5149_v4, %s4734_s13 }
 0x58c   : > { %1573 = vmax.xlane.f32.xlu1 %v5501_v45 }
 0x590   : > { %1569 = vmax.xlane.f32.xlu1 %v5503_v39 }
 0x5ce   : > { %v1548_v43 = vpop.xlane.xlu0 %1547 }
 0x5cf   : > { %v1577_v33 = vsub.f32 %v3809_v13, %v1548_v43 }
 0x5d1   : > { %v1595_v36 = vmul.f32 1.442695, %v1577_v33  ;;  %v1546_v31 = vpop.xlane.xlu1 %1545 }
 0x5d2   : > { %v1576_v42 = vsub.f32 %v1483_v20, %v1546_v31  ;;  %v1544_v54 = vpop.xlane.xlu0 %1543 }
 0x5d3   : > { %4259 = vpow2.f32 %v1595_v36  ;;  %v1575_v15 = vsub.f32 %v1480_v3, %v1544_v54 }
 0x5d4   : > { %v1593_v6 = vmul.f32 1.442695, %v1576_v42 }
 0x5d5   : > { %v1591_v11 = vmul.f32 1.442695, %v1575_v15 }
 0x5d6   : > { %4261 = vpow2.f32 %v1593_v6  ;;  %v1550_v7 = vpop.xlane.xlu0 %1549 }
 0x5d7   : > { %4263 = vpow2.f32 %v1591_v11  ;;  %v1578_v34 = vsub.f32 %v3810_v18, %v1550_v7 }
 0x5d8   : > { %v1558_v59 = vpop.xlane.xlu1 %1557 }
 0x5d9   : > { %v1597_v23 = vmul.f32 1.442695, %v1578_v34  ;;  %v1582_v36 = vsub.f32 %v5478_v10, %v1558_v59 }
 0x5da   : > { %v1556_v30 = vpop.xlane.xlu0 %1555 }
 0x5db   : > { %4265 = vpow2.f32 %v1597_v23  ;;  %v1581_v63 = vsub.f32 %v3813_v57, %v1556_v30  ;;  %v1605_v15 = vmul.f32 1.442695, %v1582_v36 }
 0x5dc   : > { %v1554_v61 = vpop.xlane.xlu1 %1553 }
 0x5dd   : > { %v5515_v24 = vpop.eup %4259  ;;  %v1603_v3 = vmul.f32 1.442695, %v1581_v63  ;;  %v1580_v20 = vsub.f32 %v5481_v5, %v1554_v61 }
 0x5de   : > { %1627 = vadd.xlane.f32.xlu1 %v5515_v24  ;;  %v1552_v58 = vpop.xlane.xlu0 %1551 }
 0x5df   : > { %v1579_v18 = vsub.f32 %v5476_v8, %v1552_v58  ;;  %4267 = vpow2.f32 %v1603_v3  ;;  %v1601_v42 = vmul.f32 1.442695, %v1580_v20 }
 0x5e0   : > { %v5518_v56 = vpop.eup %4261  ;;  %v1566_v43 = vpop.xlane.xlu1 %1565 }
 0x5e1   : > { %v5520_v27 = vpop.eup %4263  ;;  %1625 = vadd.xlane.f32.xlu0 %v5518_v56  ;;  %v1599_v31 = vmul.f32 1.442695, %v1579_v18  ;;  %v1586_v10 = vsub.f32 %v5489_v47, %v1566_v43 }
 0x5e2   : > { %1623 = vadd.xlane.f32.xlu1 %v5520_v27  ;;  %v1564_v32 = vpop.xlane.xlu0 %1563 }
 0x5e3   : > { %v1585_v54 = vsub.f32 %v5484_v17, %v1564_v32  ;;  %4269 = vpow2.f32 %v1599_v31  ;;  %v1613_v58 = vmul.f32 1.442695, %v1586_v10 }
 0x5e4   : > { %v1562_v6 = vpop.xlane.xlu1 %1561  ;;  %4271 = vpow2.f32 %v1601_v42 }
 0x5e5   : > { %v5524_v29 = vpop.eup %4265  ;;  %v1611_v11 = vmul.f32 1.442695, %v1585_v54  ;;  %4273 = vpow2.f32 %v1605_v15 }
 0x5e6   : > { %1629 = vadd.xlane.f32.xlu1 %v5524_v29  ;;  %v1560_v13 = vpop.xlane.xlu0 %1559 }
 0x5e7   : > { %v1583_v8 = vsub.f32 %v5487_v21, %v1560_v13  ;;  %4275 = vpow2.f32 %v1611_v11  ;;  %v1584_v21 = vsub.f32 %v5492_v19, %v1562_v6 }
 0x5e8   : > { %v5541_v17 = vpop.permute.xlu1 %1895 }
 0x5e9   : > { %v1607_v23 = vmul.f32 1.442695, %v1583_v8  ;;  %v5539_v30 = vpop.eup %4267  ;;  %v1609_v63 = vmul.f32 1.442695, %v1584_v21  ;;  %v1930_v21 = vsel %vm939_vm0, %v5463_v44, 0 }
 0x5ea   : > { %v1572_v33 = vpop.xlane.xlu0 %1571 }
 0x5eb   : > { %v1589_v57 = vsub.f32 %v5496_v55, %v1572_v33 }
 0x5ed   : > { %v1619_v5 = vmul.f32 1.442695, %v1589_v57  ;;  %v5545_v59 = vpop.eup %4269 }
 0x5ee   : > { %v1568_v7 = vpop.xlane.xlu0 %1567 }
 0x5ef   : > { %v1587_v34 = vsub.f32 %v5499_v48, %v1568_v7  ;;  %4277 = vpow2.f32 %v1619_v5  ;;  %v5547_v48 = vpop.eup %4271 }
 0x5f0   : > { %4279 = vpow2.f32 %v1607_v23  ;;  %v5552_v13 = vpop.eup %4273 }
 0x5f1   : > { %v1615_v55 = vmul.f32 1.442695, %v1587_v34  ;;  %v5554_v19 = vpop.eup %4275 }
 0x5f2   : > { %v1894_v54 = vpop.permute.xlu0 %1893 }
 0x5f3   : > { %4281 = vpow2.f32 %v1615_v55 }
 0x5f4   : > { %4283 = vpow2.f32 %v1613_v58 }
 0x5f7   : > { %1899 = vrot.lane.b32.xlu1 %v5219_v12, %s4734_s13  ;;  %1897 = vrot.lane.b32.xlu0 %v5195_v49, %s4734_s13 }
 0x5f9   : > { %v5559_v20 = vpop.eup %4277 }
 0x5fa   : > { %v5561_v43 = vpop.eup %4279 }
 0x5fd   : > { %v5565_v33 = vpop.eup %4281 }
 0x5fe   : > { %v5567_v36 = vpop.eup %4283 }
 0x616   : > { %1635 = vadd.xlane.f32.xlu0 %v5539_v30 }
 0x619   : > { %v1574_v32 = vpop.xlane.xlu1 %1573 }
 0x61a   : > { %v1590_v47 = vsub.f32 %v5501_v45, %v1574_v32  ;;  %1631 = vadd.xlane.f32.xlu0 %v5545_v59 }
 0x61b   : > { %1633 = vadd.xlane.f32.xlu1 %v5547_v48 }
 0x61c   : > { %v1621_v61 = vmul.f32 1.442695, %v1590_v47 }
 0x61d   : > { %v1570_v3 = vpop.xlane.xlu1 %1569 }
 0x61e   : > { %4285 = vpow2.f32 %v1621_v61  ;;  %v1588_v18 = vsub.f32 %v5503_v39, %v1570_v3  ;;  %1637 = vadd.xlane.f32.xlu0 %v5552_v13 }
 0x61f   : > { %1643 = vadd.xlane.f32.xlu1 %v5554_v19  ;;  %4287 = vpow2.f32 %v1609_v63 }
 0x620   : > { %v1617_v45 = vmul.f32 1.442695, %v1588_v18 }
 0x622   : > { %1651 = vadd.xlane.f32.xlu0 %v5559_v20  ;;  %4289 = vpow2.f32 %v1617_v45 }
 0x623   : > { %1639 = vadd.xlane.f32.xlu1 %v5561_v43 }
 0x626   : > { %1647 = vadd.xlane.f32.xlu0 %v5565_v33 }
 0x627   : > { %1645 = vadd.xlane.f32.xlu1 %v5567_v36 }
 0x628   : > { %v5571_v39 = vpop.eup %4285 }
 0x629   : > { %v5573_v31 = vpop.eup %4287 }
 0x62a   : > { %1653 = vadd.xlane.f32.xlu0 %v5571_v39 }
 0x62b   : > { %1641 = vadd.xlane.f32.xlu1 %v5573_v31 }
 0x62c   : > { %v5577_v42 = vpop.eup %4289 }
 0x62f   : > { %1649 = vadd.xlane.f32.xlu1 %v5577_v42 }
 0x640   : > { %1901 = vrot.lane.b32.xlu0 %v5242_v35, %s4734_s13  ;;  %1903 = vrot.lane.b32.xlu1 %v5256_v53, %s4734_s13 }
 0x644   : > { %1873 = vrot.lane.b32.xlu0 %v5111_v40, %s4734_s13  ;;  %1875 = vrot.lane.b32.xlu1 %v5127_v51, %s4734_s13 }
 0x648   : > { %1877 = vrot.lane.b32.xlu0 %v5146_v1, %s4734_s13  ;;  %1879 = vrot.lane.b32.xlu1 %v5167_v22, %s4734_s13 }
 0x64c   : > { %1881 = vrot.lane.b32.xlu0 %v5191_v46, %s4734_s13  ;;  %1883 = vrot.lane.b32.xlu1 %v5215_v9, %s4734_s13 }
 0x650   : > { %1885 = vrot.lane.b32.xlu0 %v5239_v60, %s4734_s13  ;;  %1887 = vrot.lane.b32.xlu1 %v5254_v50, %s4734_s13 }
 0x654   : > { %2202 = vrot.lane.b32.xlu0 %v5161_v16, %s4734_s13  ;;  %2204 = vrot.lane.b32.xlu1 %v5159_v14, %s4734_s13 }
 0x658   : > { %2206 = vrot.lane.b32.xlu0 %v5185_v38, %s4734_s13  ;;  %2208 = vrot.lane.b32.xlu1 %v5182_v0, %s4734_s13 }
 0x65c   : > { %2210 = vrot.lane.b32.xlu0 %v5209_v2, %s4734_s13  ;;  %2212 = vrot.lane.b32.xlu1 %v5206_v62, %s4734_s13 }
 0x660   : > { %2214 = vrot.lane.b32.xlu0 %v5233_v28, %s4734_s13  ;;  %2216 = vrot.lane.b32.xlu1 %v5230_v26, %s4734_s13 }
 0x664   : > { %2388 = vrot.lane.b32.xlu0 %v5113_v41, %s4735_s29  ;;  %2390 = vrot.lane.b32.xlu1 %v5129_v52, %s4735_s29 }
 0x66b   : > { %v1628_v15 = vpop.xlane.xlu1 %1627 }
 0x66e   : > { %v1626_v6 = vpop.xlane.xlu0 %1625 }
 0x66f   : > { %4291 = vrcp.f32 %v1626_v6  ;;  %v1624_v57 = vpop.xlane.xlu1 %1623 }
 0x670   : > { %4293 = vrcp.f32 %v1624_v57 }
 0x671   : > { %4295 = vrcp.f32 %v1628_v15 }
 0x672   : > { %v1898_v44 = vpop.permute.xlu0 %1897 }
 0x673   : > { %v1630_v11 = vpop.xlane.xlu1 %1629  ;;  %v1942_v32 = vsel %vm939_vm0, %v1898_v44, 0 }
 0x674   : > { %4297 = vrcp.f32 %v1630_v11 }
 0x679   : > { %v4292_v8 = vpop.eup %4291 }
 0x67a   : > { %v4294_v7 = vpop.eup %4293  ;;  %v1672_v5 = vmul.f32 %v4292_v8, %v5518_v56  ;;  %v1933_v56 = vsel %vm939_vm0, %v5513_v37, 0 }
 0x67b   : > { %v1671_v34 = vmul.f32 %v4294_v7, %v5520_v27  ;;  %v4296_v10 = vpop.eup %4295  ;;  %v1939_v27 = vsel %vm939_vm0, %v5541_v17, 0 }
 0x67c   : > { %v1673_v52 = vmul.f32 %v4296_v10, %v5515_v24  ;;  %v1936_v24 = vsel %vm939_vm0, %v1894_v54, 0 }
 0x67d   : > { %v1687_v41 = vpack.c.bf16 %v1672_v5, %v1671_v34 }
 0x67e   : > { %v4298_v23 = vpop.eup %4297 }
 0x67f   : > { %v1674_v55 = vmul.f32 %v4298_v23, %v5524_v29  ;;  %3839 = vmatprep.mubr.bf16.mxu0 %v1687_v41 }
 0x681   : > { %v1688_v58 = vpack.c.bf16 %v1674_v55, %v1673_v52 }
 0x683   : > { %3840 = vmatmul.mubr.bf16.vlgmr.msra.gmra.mrb[48].mxu0 %v1688_v58 }
 0x684   : > { %3856 = vmatpush3.bf16.xpose.msra.mxu0 %v1930_v21 }
 0x685   : > { %4048 = vmatprep.subr.msk.bf16.mxu0 %vm939_vm0, %v5513_v37  ;;  %v1900_v37 = vpop.permute.xlu1 %1899 }
 0x686   : > { %v1945_v3 = vsel %vm939_vm0, %v1900_v37, 0 }
 0x68c   : > { %3858 = vmatpush3.bf16.xpose.msra.mxu0 %v1933_v56 }
 0x68d   : > { %4049 = vmatprep.subr.msk.bf16.mxu0 %vm939_vm0, %v1894_v54 }
 0x694   : > { %3860 = vmatpush3.bf16.xpose.msra.mxu0 %v1936_v24 }
 0x695   : > { %4050 = vmatprep.subr.msk.bf16.mxu0 %vm939_vm0, %v5541_v17 }
 0x69c   : > { %3862 = vmatpush3.bf16.xpose.msra.mxu0 %v1939_v27 }
 0x69d   : > { %4051 = vmatprep.subr.msk.bf16.mxu0 %vm939_vm0, %v1898_v44 }
 0x6a3   : > { %v1636_v29 = vpop.xlane.xlu0 %1635 }
 0x6a4   : > { %3864 = vmatpush3.bf16.xpose.msra.mxu0 %v1942_v32 }
 0x6a5   : > { %4052 = vmatprep.subr.msk.bf16.mxu0 %vm939_vm0, %v1900_v37 }
 0x6a7   : > { %v1632_v47 = vpop.xlane.xlu0 %1631 }
 0x6a8   : > { %4299 = vrcp.f32 %v1632_v47  ;;  %v1634_v63 = vpop.xlane.xlu1 %1633 }
 0x6a9   : > { %4301 = vrcp.f32 %v1634_v63 }
 0x6aa   : > { %4303 = vrcp.f32 %v1636_v29 }
 0x6ab   : > { %v1638_v61 = vpop.xlane.xlu0 %1637 }
 0x6ac   : > { %4305 = vrcp.f32 %v1638_v61  ;;  %3866 = vmatpush3.bf16.xpose.msra.mxu0 %v1945_v3  ;;  %v1644_v17 = vpop.xlane.xlu1 %1643 }
 0x6af   : > { %v1652_v18 = vpop.xlane.xlu0 %1651 }
 0x6b0   : > { %v1640_v45 = vpop.xlane.xlu1 %1639 }
 0x6b2   : > { %v4300_v54 = vpop.eup %4299 }
 0x6b3   : > { %v4302_v15 = vpop.eup %4301  ;;  %v1648_v6 = vpop.xlane.xlu0 %1647  ;;  %v1675_v57 = vmul.f32 %v4300_v54, %v5545_v59 }
 0x6b4   : > { %v4304_v11 = vpop.eup %4303  ;;  %v1646_v8 = vpop.xlane.xlu1 %1645  ;;  %v1676_v7 = vmul.f32 %v4302_v15, %v5547_v48 }
 0x6b5   : > { %4307 = vrcp.f32 %v1646_v8  ;;  %v1677_v41 = vmul.f32 %v4304_v11, %v5539_v30 }
 0x6b6   : > { %v4306_v5 = vpop.eup %4305  ;;  %v1689_v34 = vpack.c.bf16 %v1676_v7, %v1675_v57  ;;  %4309 = vrcp.f32 %v1640_v45 }
 0x6b7   : > { %v1654_v10 = vpop.xlane.xlu0 %1653  ;;  %v1678_v23 = vmul.f32 %v4306_v5, %v5552_v13  ;;  %4311 = vrcp.f32 %v1644_v17 }
 0x6b8   : > { %3843 = vmatprep.mubr.bf16.mxu0 %v1689_v34  ;;  %v1642_v52 = vpop.xlane.xlu1 %1641 }
 0x6b9   : > { %4313 = vrcp.f32 %v1642_v52  ;;  %v1690_v55 = vpack.c.bf16 %v1678_v23, %v1677_v41 }
 0x6ba   : > { %4315 = vrcp.f32 %v1648_v6 }
 0x6bb   : > { %v1902_v59 = vpop.permute.xlu0 %1901  ;;  %3844 = vmatmul.mubr.bf16.gmra.mrb[52].mxu0 %v1690_v55 }
 0x6bc   : > { %4053 = vmatprep.subr.msk.bf16.mxu0 %vm939_vm0, %v1902_v59  ;;  %v1650_v48 = vpop.xlane.xlu1 %1649  ;;  %v1948_v58 = vsel %vm939_vm0, %v1902_v59, 0 }
 0x6bd   : > { %4317 = vrcp.f32 %v1650_v48  ;;  %3868 = vmatpush3.bf16.xpose.msra.mxu0 %v1948_v58 }
 0x6be   : > { %4319 = vrcp.f32 %v1654_v10 }
 0x6bf   : > { %v1874_v21 = vpop.permute.xlu0 %1873  ;;  %v4308_v30 = vpop.eup %4307  ;;  %4321 = vrcp.f32 %v1652_v18 }
 0x6c0   : > { %v1904_v13 = vpop.permute.xlu1 %1903  ;;  %v4310_v56 = vpop.eup %4309  ;;  %v1682_v29 = vmul.f32 %v4308_v30, %v5567_v36 }
 0x6c1   : > { %4054 = vmatprep.subr.msk.bf16.mxu0 %vm939_vm0, %v1904_v13  ;;  %v4312_v24 = vpop.eup %4311  ;;  %v1951_v37 = vsel %vm939_vm0, %v1904_v13, 0  ;;  %v1679_v47 = vmul.f32 %v4310_v56, %v5561_v43 }
 0x6c2   : > { %v1681_v3 = vmul.f32 %v4312_v24, %v5554_v19 }
 0x6c3   : > { %v4314_v27 = vpop.eup %4313  ;;  %v1878_v44 = vpop.permute.xlu0 %1877 }
 0x6c4   : > { %v1876_v32 = vpop.permute.xlu1 %1875  ;;  %v1680_v63 = vmul.f32 %v4314_v27, %v5573_v31  ;;  %v4316_v61 = vpop.eup %4315  ;;  %v1692_v54 = vpack.c.bf16 %v1682_v29, %v1681_v3 }
 0x6c5   : > { %3870 = vmatpush3.bf16.xpose.msra.mxu0 %v1951_v37  ;;  %v1683_v36 = vmul.f32 %v4316_v61, %v5565_v33 }
 0x6c6   : > { %v1691_v17 = vpack.c.bf16 %v1680_v63, %v1679_v47 }
 0x6c7   : > { %v4318_v18 = vpop.eup %4317  ;;  %v1882_v45 = vpop.permute.xlu0 %1881 }
 0x6c8   : > { %v4320_v15 = vpop.eup %4319  ;;  %3847 = vmatprep.mubr.bf16.mxu0 %v1691_v17  ;;  %v1880_v6 = vpop.permute.xlu1 %1879  ;;  %v1684_v57 = vmul.f32 %v4318_v18, %v5577_v42 }
 0x6c9   : > { %3848 = vmatmul.mubr.bf16.gmra.mrb[56].mxu0 %v1692_v54  ;;  %v4322_v11 = vpop.eup %4321  ;;  %v1686_v31 = vmul.f32 %v4320_v15, %v5571_v39 }
 0x6ca   : > { %v1693_v43 = vpack.c.bf16 %v1684_v57, %v1683_v36  ;;  %v1685_v19 = vmul.f32 %v4322_v11, %v5559_v20 }
 0x6cb   : > { %v1886_v8 = vpop.permute.xlu0 %1885 }
 0x6cc   : > { %3851 = vmatprep.mubr.bf16.mxu0 %v1693_v43  ;;  %v1884_v7 = vpop.permute.xlu1 %1883  ;;  %v1694_v34 = vpack.c.bf16 %v1686_v31, %v1685_v19 }
 0x6cf   : > { %v2203_v5 = vpop.permute.xlu0 %2202 }
 0x6d0   : > { %3887 = vmatprep.subr.bf16.mxu1 %v2203_v5  ;;  %v1888_v10 = vpop.permute.xlu1 %1887 }
 0x6d1   : > { %3852 = vmatmul.mubr.bf16.gmra.mrb[60].mxu0 %v1694_v34  ;;  %3888 = vmatpush3.bf16.msra.mxu1 %v2203_v5 }
 0x6d2   : > { %3871 = vmatprep.mubr.msk.bf16.mxu0 %vm939_vm0, %v1874_v21 }
 0x6d3   : > { %v2207_v42 = vpop.permute.xlu0 %2206 }
 0x6d4   : > { %v2205_v33 = vpop.permute.xlu1 %2204 }
 0x6d5   : > { %3889 = vmatprep.subr.bf16.mxu1 %v2205_v33 }
 0x6d6   : > { %3890 = vmatpush3.bf16.msra.mxu1 %v2205_v33 }
 0x6d7   : > { %3891 = vmatprep.subr.bf16.mxu1 %v2207_v42  ;;  %v2211_v20 = vpop.permute.xlu0 %2210 }
 0x6d8   : > { %v2209_v39 = vpop.permute.xlu1 %2208 }
 0x6d9   : > { %3872 = vmatmul.mubr.msk.bf16.vlgmr.msra.gmra.mrb[64].mxu0 %vm939_vm0, %v1876_v32 }
 0x6da   : > { %3875 = vmatprep.mubr.msk.bf16.mxu0 %vm939_vm0, %v1878_v44  ;;  %3892 = vmatpush3.bf16.msra.mxu1 %v2207_v42 }
 0x6db   : > { %3893 = vmatprep.subr.bf16.mxu1 %v2209_v39  ;;  %v2215_v23 = vpop.permute.xlu0 %2214 }
 0x6dc   : > { %v2213_v41 = vpop.permute.xlu1 %2212 }
 0x6de   : > { %3894 = vmatpush3.bf16.msra.mxu1 %v2209_v39 }
 0x6df   : > { %3895 = vmatprep.subr.bf16.mxu1 %v2211_v20  ;;  %v5663_v55 = vpop.permute.xlu0 %2388 }
 0x6e0   : > { %v2217_v52 = vpop.permute.xlu1 %2216 }
 0x6e1   : > { %3876 = vmatmul.mubr.msk.bf16.gmra.mrb[68].mxu0 %vm939_vm0, %v1880_v6 }
 0x6e2   : > { %3879 = vmatprep.mubr.msk.bf16.mxu0 %vm939_vm0, %v1882_v45  ;;  %3896 = vmatpush3.bf16.msra.mxu1 %v2211_v20 }
 0x6e3   : > { %3897 = vmatprep.subr.bf16.mxu1 %v2213_v41 }
 0x6e6   : > { %3898 = vmatpush3.bf16.msra.mxu1 %v2213_v41 }
 0x6e7   : > { %3899 = vmatprep.subr.bf16.mxu1 %v2215_v23 }
 0x6e9   : > { %3880 = vmatmul.mubr.msk.bf16.gmra.mrb[72].mxu0 %vm939_vm0, %v1884_v7 }
 0x6ea   : > { %3883 = vmatprep.mubr.msk.bf16.mxu0 %vm939_vm0, %v1886_v8  ;;  %3900 = vmatpush3.bf16.msra.mxu1 %v2215_v23 }
 0x6eb   : > { %3901 = vmatprep.subr.bf16.mxu1 %v2217_v52 }
 0x6ee   : > { %3902 = vmatpush3.bf16.msra.mxu1 %v2217_v52  ;;  %v5753_v52 = vpop.permute.xlu1 %2390 }
 0x6ef   : > { %4055 = vmatprep.subr.msk.bf16.mxu1 %vm939_vm0, %v5663_v55 }
 0x6f1   : > { %3884 = vmatmul.mubr.msk.bf16.gmra.mrb[76].mxu0 %vm939_vm0, %v1888_v10 }
 0x756   : > { %v5668_v59 = vpop.f32.mrb[48].mxu0 }
 0x757   : > { %v5670_v48 = vpop.f32.mrb[49].mxu0 }
 0x758   : > { %6488 = vst [vmem:[#allocation21_spill] sm:$0xff] %v5670_v48  ;;  %v5672_v58 = vpop.f32.mrb[50].mxu0 }
 0x759   : > { %v5676_v30 = vpop.f32.mrb[51].mxu0 }
 0x75a   : > { %6489 = vst [vmem:[#allocation22_spill] sm:$0xff] %v5676_v30 }
 0x78e   : > { %v5680_v56 = vpop.f32.mrb[52].mxu0 }
 0x78f   : > { %6490 = vst [vmem:[#allocation23_spill] sm:$0xff] %v5680_v56  ;;  %v5682_v24 = vpop.f32.mrb[53].mxu0 }
 0x790   : > { %6491 = vst [vmem:[#allocation24_spill] sm:$0xff] %v5682_v24  ;;  %v5684_v27 = vpop.f32.mrb[54].mxu0 }
 0x791   : > { %6492 = vst [vmem:[#allocation25_spill] sm:$0xff] %v5684_v27  ;;  %v5688_v29 = vpop.f32.mrb[55].mxu0 }
 0x792   : > { %6493 = vst [vmem:[#allocation26_spill] sm:$0xff] %v5688_v29 }
 0x79c   : > { %v5692_v37 = vpop.f32.mrb[56].mxu0 }
 0x79d   : > { %v5694_v47 = vpop.f32.mrb[57].mxu0 }
 0x79e   : > { %v5696_v63 = vpop.f32.mrb[58].mxu0 }
 0x79f   : > { %v5700_v3 = vpop.f32.mrb[59].mxu0 }
 0x7a4   : > { %v5704_v18 = vpop.f32.mrb[60].mxu0 }
 0x7a5   : > { %v5706_v45 = vpop.f32.mrb[61].mxu0 }
 0x7a6   : > { %v5708_v54 = vpop.f32.mrb[62].mxu0 }
 0x7a7   : > { %v5712_v6 = vpop.f32.mrb[63].mxu0 }
 0x7ac   : > { %v3873_v57 = vpop.f32.mrb[64].mxu0 }
 0x7ad   : > { %2054 = vmax.xlane.f32.xlu0 %v3873_v57  ;;  %v1987_v11 = vpop.f32.mrb[65].mxu0 }
 0x7ae   : > { %v3874_v43 = vpop.f32.mrb[66].mxu0 }
 0x7af   : > { %v1990_v8 = vpop.f32.mrb[67].mxu0 }
 0x7b0   : > { %2052 = vmax.xlane.f32.xlu1 %v1990_v8 }
 0x7b1   : > { %2050 = vmax.xlane.f32.xlu0 %v1987_v11 }
 0x7b4   : > { %v3877_v31 = vpop.f32.mrb[68].mxu0 }
 0x7b5   : > { %2056 = vmax.xlane.f32.xlu0 %v3874_v43  ;;  %v5716_v7 = vpop.f32.mrb[69].mxu0 }
 0x7b6   : > { %v5718_v19 = vpop.f32.mrb[70].mxu0 }
 0x7b7   : > { %2064 = vmax.xlane.f32.xlu1 %v5718_v19  ;;  %v5721_v5 = vpop.f32.mrb[71].mxu0 }
 0x7b9   : > { %2062 = vmax.xlane.f32.xlu0 %v3877_v31 }
 0x7bb   : > { %2060 = vmax.xlane.f32.xlu1 %v5721_v5 }
 0x7bc   : > { %v5724_v34 = vpop.f32.mrb[72].mxu0 }
 0x7bd   : > { %2058 = vmax.xlane.f32.xlu0 %v5716_v7  ;;  %v5727_v10 = vpop.f32.mrb[73].mxu0 }
 0x7be   : > { %v5729_v33 = vpop.f32.mrb[74].mxu0 }
 0x7bf   : > { %2072 = vmax.xlane.f32.xlu1 %v5729_v33  ;;  %v5732_v42 = vpop.f32.mrb[75].mxu0 }
 0x7c1   : > { %2070 = vmax.xlane.f32.xlu0 %v5724_v34 }
 0x7c3   : > { %2068 = vmax.xlane.f32.xlu1 %v5732_v42 }
 0x7c4   : > { %v5736_v39 = vpop.f32.mrb[76].mxu0 }
 0x7c5   : > { %2066 = vmax.xlane.f32.xlu0 %v5727_v10  ;;  %v5739_v20 = vpop.f32.mrb[77].mxu0 }
 0x7c6   : > { %v5741_v41 = vpop.f32.mrb[78].mxu0 }
 0x7c7   : > { %v5743_v23 = vpop.f32.mrb[79].mxu0 }
 0x7c9   : > { %2078 = vmax.xlane.f32.xlu0 %v5736_v39 }
 0x7cd   : > { %2074 = vmax.xlane.f32.xlu0 %v5739_v20 }
 0x7d4   : > { %2394 = vrot.lane.b32.xlu1 %v5171_v25, %s4735_s29 }
 0x7e3   : > { %2392 = vrot.lane.b32.xlu0 %v5149_v4, %s4735_s29 }
 0x7f8   : > { %2080 = vmax.xlane.f32.xlu1 %v5741_v41 }
 0x7fc   : > { %2076 = vmax.xlane.f32.xlu1 %v5743_v23 }
 0x83a   : > { %v2055_v44 = vpop.xlane.xlu0 %2054 }
 0x83b   : > { %v2084_v32 = vsub.f32 %v3873_v57, %v2055_v44 }
 0x83d   : > { %v2102_v13 = vmul.f32 1.442695, %v2084_v32  ;;  %v2053_v15 = vpop.xlane.xlu1 %2052 }
 0x83e   : > { %v2083_v36 = vsub.f32 %v1990_v8, %v2053_v15  ;;  %v2051_v61 = vpop.xlane.xlu0 %2050 }
 0x83f   : > { %4323 = vpow2.f32 %v2102_v13  ;;  %v2082_v21 = vsub.f32 %v1987_v11, %v2051_v61 }
 0x840   : > { %v2100_v17 = vmul.f32 1.442695, %v2083_v36 }
 0x841   : > { %v2098_v56 = vmul.f32 1.442695, %v2082_v21 }
 0x842   : > { %4325 = vpow2.f32 %v2100_v17  ;;  %v2057_v25 = vpop.xlane.xlu0 %2056 }
 0x843   : > { %4327 = vpow2.f32 %v2098_v56  ;;  %v2085_v4 = vsub.f32 %v3874_v43, %v2057_v25 }
 0x845   : > { %v2104_v27 = vmul.f32 1.442695, %v2085_v4 }
 0x846   : > { %v2063_v21 = vpop.xlane.xlu0 %2062 }
 0x847   : > { %4329 = vpow2.f32 %v2104_v27  ;;  %v2065_v27 = vpop.xlane.xlu1 %2064  ;;  %v2088_v61 = vsub.f32 %v3877_v31, %v2063_v21 }
 0x848   : > { %v2089_v25 = vsub.f32 %v5718_v19, %v2065_v27 }
 0x849   : > { %v5755_v24 = vpop.eup %4323  ;;  %v2110_v36 = vmul.f32 1.442695, %v2088_v61 }
 0x84a   : > { %2134 = vadd.xlane.f32.xlu1 %v5755_v24  ;;  %v2059_v56 = vpop.xlane.xlu0 %2058  ;;  %v2112_v48 = vmul.f32 1.442695, %v2089_v25 }
 0x84b   : > { %v2061_v17 = vpop.xlane.xlu1 %2060  ;;  %v2086_v57 = vsub.f32 %v5716_v7, %v2059_v56  ;;  %4331 = vpow2.f32 %v2110_v36 }
 0x84c   : > { %v5758_v29 = vpop.eup %4325  ;;  %v2087_v11 = vsub.f32 %v5721_v5, %v2061_v17 }
 0x84d   : > { %v5760_v44 = vpop.eup %4327  ;;  %2132 = vadd.xlane.f32.xlu0 %v5758_v29 }
 0x84e   : > { %2130 = vadd.xlane.f32.xlu1 %v5760_v44  ;;  %v2071_v32 = vpop.xlane.xlu0 %2070  ;;  %v2108_v4 = vmul.f32 1.442695, %v2087_v11 }
 0x84f   : > { %v2073_v43 = vpop.xlane.xlu1 %2072 }
 0x850   : > { %v2093_v19 = vsub.f32 %v5729_v33, %v2073_v43 }
 0x851   : > { %v5764_v13 = vpop.eup %4329 }
 0x852   : > { %2136 = vadd.xlane.f32.xlu1 %v5764_v13  ;;  %v2067_v15 = vpop.xlane.xlu0 %2066 }
 0x853   : > { %v2069_v30 = vpop.xlane.xlu1 %2068  ;;  %v2090_v7 = vsub.f32 %v5727_v10, %v2067_v15 }
 0x854   : > { %v2091_v10 = vsub.f32 %v5732_v42, %v2069_v30 }
 0x855   : > { %v2114_v27 = vmul.f32 1.442695, %v2090_v7  ;;  %v5779_v17 = vpop.eup %4331 }
 0x856   : > { %v2079_v8 = vpop.xlane.xlu0 %2078  ;;  %v2116_v36 = vmul.f32 1.442695, %v2091_v10 }
 0x857   : > { %v2096_v31 = vsub.f32 %v5736_v39, %v2079_v8 }
 0x859   : > { %v2126_v5 = vmul.f32 1.442695, %v2096_v31 }
 0x85a   : > { %v2075_v56 = vpop.xlane.xlu0 %2074 }
 0x85b   : > { %v2094_v61 = vsub.f32 %v5739_v20, %v2075_v56  ;;  %v2429_v56 = vsel %vm939_vm0, %v5663_v55, 0 }
 0x85d   : > { %v2122_v39 = vmul.f32 1.442695, %v2094_v61 }
 0x863   : > { %2398 = vrot.lane.b32.xlu1 %v5219_v12, %s4735_s29  ;;  %2396 = vrot.lane.b32.xlu0 %v5195_v49, %s4735_s29  ;;  %v2106_v12 = vmul.f32 1.442695, %v2086_v57  ;;  %v2092_v49 = vsub.f32 %v5724_v34, %v2071_v32  ;;  %v5781_v34 = vpop.permute.xlu1 %2394  ;;  %v2120_v32 = vmul.f32 1.442695, %v2093_v19 }
 0x865   : > { %4333 = vpow2.f32 %v2106_v12  ;;  %v2118_v21 = vmul.f32 1.442695, %v2092_v49 }
 0x866   : > { %4335 = vpow2.f32 %v2108_v4 }
 0x867   : > { %4337 = vpow2.f32 %v2112_v48 }
 0x868   : > { %4339 = vpow2.f32 %v2118_v21 }
 0x869   : > { %4341 = vpow2.f32 %v2126_v5 }
 0x86a   : > { %4343 = vpow2.f32 %v2114_v27 }
 0x86b   : > { %4345 = vpow2.f32 %v2122_v39 }
 0x86c   : > { %4347 = vpow2.f32 %v2120_v32 }
 0x86f   : > { %v5785_v48 = vpop.eup %4333 }
 0x870   : > { %v5787_v20 = vpop.eup %4335 }
 0x871   : > { %v5792_v11 = vpop.eup %4337 }
 0x872   : > { %v5794_v30 = vpop.eup %4339 }
 0x873   : > { %v5799_v8 = vpop.eup %4341 }
 0x874   : > { %v5801_v25 = vpop.eup %4343 }
 0x875   : > { %v5805_v12 = vpop.eup %4345 }
 0x876   : > { %v5807_v4 = vpop.eup %4347 }
 0x882   : > { %2142 = vadd.xlane.f32.xlu0 %v5779_v17 }
 0x885   : > { %v2081_v15 = vpop.xlane.xlu1 %2080 }
 0x886   : > { %v2097_v33 = vsub.f32 %v5741_v41, %v2081_v15  ;;  %2138 = vadd.xlane.f32.xlu0 %v5785_v48 }
 0x887   : > { %2140 = vadd.xlane.f32.xlu1 %v5787_v20 }
 0x888   : > { %v2128_v57 = vmul.f32 1.442695, %v2097_v33 }
 0x889   : > { %v2077_v43 = vpop.xlane.xlu1 %2076 }
 0x88a   : > { %4349 = vpow2.f32 %v2128_v57  ;;  %v2095_v42 = vsub.f32 %v5743_v23, %v2077_v43  ;;  %2144 = vadd.xlane.f32.xlu0 %v5792_v11 }
 0x88b   : > { %2150 = vadd.xlane.f32.xlu1 %v5794_v30  ;;  %4351 = vpow2.f32 %v2116_v36 }
 0x88c   : > { %v2124_v41 = vmul.f32 1.442695, %v2095_v42 }
 0x88e   : > { %2158 = vadd.xlane.f32.xlu0 %v5799_v8  ;;  %4353 = vpow2.f32 %v2124_v41 }
 0x88f   : > { %2146 = vadd.xlane.f32.xlu1 %v5801_v25 }
 0x892   : > { %2154 = vadd.xlane.f32.xlu0 %v5805_v12 }
 0x893   : > { %2152 = vadd.xlane.f32.xlu1 %v5807_v4 }
 0x894   : > { %v5811_v23 = vpop.eup %4349 }
 0x895   : > { %v5813_v49 = vpop.eup %4351 }
 0x896   : > { %2160 = vadd.xlane.f32.xlu0 %v5811_v23 }
 0x897   : > { %2148 = vadd.xlane.f32.xlu1 %v5813_v49 }
 0x898   : > { %v5817_v31 = vpop.eup %4353 }
 0x89b   : > { %2156 = vadd.xlane.f32.xlu1 %v5817_v31 }
 0x8ac   : > { %2400 = vrot.lane.b32.xlu0 %v5242_v35, %s4735_s29  ;;  %2402 = vrot.lane.b32.xlu1 %v5256_v53, %s4735_s29 }
 0x8b0   : > { %2372 = vrot.lane.b32.xlu0 %v5111_v40, %s4735_s29  ;;  %2374 = vrot.lane.b32.xlu1 %v5127_v51, %s4735_s29  ;;  %v2393_v40 = vpop.permute.xlu0 %2392 }
 0x8b4   : > { %2376 = vrot.lane.b32.xlu0 %v5146_v1, %s4735_s29  ;;  %2378 = vrot.lane.b32.xlu1 %v5167_v22, %s4735_s29 }
 0x8b8   : > { %2380 = vrot.lane.b32.xlu0 %v5191_v46, %s4735_s29  ;;  %2382 = vrot.lane.b32.xlu1 %v5215_v9, %s4735_s29 }
 0x8bc   : > { %2384 = vrot.lane.b32.xlu0 %v5239_v60, %s4735_s29  ;;  %2386 = vrot.lane.b32.xlu1 %v5254_v50, %s4735_s29 }
 0x8c0   : > { %2701 = vrot.lane.b32.xlu0 %v5161_v16, %s4735_s29  ;;  %2703 = vrot.lane.b32.xlu1 %v5159_v14, %s4735_s29 }
 0x8c4   : > { %2705 = vrot.lane.b32.xlu0 %v5185_v38, %s4735_s29 }
 0x8d7   : > { %v2135_v51 = vpop.xlane.xlu1 %2134 }
 0x8da   : > { %v2133_v1 = vpop.xlane.xlu0 %2132 }
 0x8db   : > { %4355 = vrcp.f32 %v2133_v1  ;;  %v2131_v22 = vpop.xlane.xlu1 %2130 }
 0x8dc   : > { %4357 = vrcp.f32 %v2131_v22 }
 0x8dd   : > { %4359 = vrcp.f32 %v2135_v51 }
 0x8de   : > { %v2397_v55 = vpop.permute.xlu0 %2396 }
 0x8df   : > { %v2137_v46 = vpop.xlane.xlu1 %2136  ;;  %v2441_v5 = vsel %vm939_vm0, %v2397_v55, 0 }
 0x8e0   : > { %4361 = vrcp.f32 %v2137_v46 }
 0x8e5   : > { %v4356_v9 = vpop.eup %4355 }
 0x8e6   : > { %v4358_v60 = vpop.eup %4357  ;;  %v2179_v35 = vmul.f32 %v4356_v9, %v5758_v29  ;;  %v2432_v29 = vsel %vm939_vm0, %v5753_v52, 0 }
 0x8e7   : > { %v2178_v16 = vmul.f32 %v4358_v60, %v5760_v44  ;;  %v4360_v50 = vpop.eup %4359  ;;  %v2438_v44 = vsel %vm939_vm0, %v5781_v34, 0 }
 0x8e8   : > { %v2180_v38 = vmul.f32 %v4360_v50, %v5755_v24  ;;  %v2435_v24 = vsel %vm939_vm0, %v2393_v40, 0 }
 0x8e9   : > { %v2194_v14 = vpack.c.bf16 %v2179_v35, %v2178_v16 }
 0x8ea   : > { %v4362_v53 = vpop.eup %4361 }
 0x8eb   : > { %v2181_v21 = vmul.f32 %v4362_v53, %v5764_v13  ;;  %3903 = vmatprep.mubr.bf16.mxu1 %v2194_v14 }
 0x8ed   : > { %v2195_v7 = vpack.c.bf16 %v2181_v21, %v2180_v38 }
 0x8ef   : > { %3904 = vmatmul.mubr.bf16.vlgmr.msra.gmra.mrb[48].mxu1 %v2195_v7 }
 0x8f0   : > { %3920 = vmatpush3.bf16.xpose.msra.mxu1 %v2429_v56 }
 0x8f1   : > { %4056 = vmatprep.subr.msk.bf16.mxu1 %vm939_vm0, %v5753_v52  ;;  %v2399_v52 = vpop.permute.xlu1 %2398 }
 0x8f2   : > { %v2444_v39 = vsel %vm939_vm0, %v2399_v52, 0 }
 0x8f8   : > { %3922 = vmatpush3.bf16.xpose.msra.mxu1 %v2432_v29 }
 0x8f9   : > { %4057 = vmatprep.subr.msk.bf16.mxu1 %vm939_vm0, %v2393_v40 }
 0x900   : > { %3924 = vmatpush3.bf16.xpose.msra.mxu1 %v2435_v24 }
 0x901   : > { %4058 = vmatprep.subr.msk.bf16.mxu1 %vm939_vm0, %v5781_v34 }
 0x908   : > { %3926 = vmatpush3.bf16.xpose.msra.mxu1 %v2438_v44 }
 0x909   : > { %4059 = vmatprep.subr.msk.bf16.mxu1 %vm939_vm0, %v2397_v55 }
 0x90f   : > { %v2143_v13 = vpop.xlane.xlu0 %2142 }
 0x910   : > { %3928 = vmatpush3.bf16.xpose.msra.mxu1 %v2441_v5 }
 0x911   : > { %4060 = vmatprep.subr.msk.bf16.mxu1 %vm939_vm0, %v2399_v52 }
 0x913   : > { %v2139_v61 = vpop.xlane.xlu0 %2138 }
 0x914   : > { %4363 = vrcp.f32 %v2139_v61  ;;  %v2141_v19 = vpop.xlane.xlu1 %2140 }
 0x915   : > { %4365 = vrcp.f32 %v2141_v19 }
 0x916   : > { %4367 = vrcp.f32 %v2143_v13 }
 0x917   : > { %v2145_v27 = vpop.xlane.xlu0 %2144 }
 0x918   : > { %4369 = vrcp.f32 %v2145_v27  ;;  %3930 = vmatpush3.bf16.xpose.msra.mxu1 %v2444_v39  ;;  %v2151_v34 = vpop.xlane.xlu1 %2150 }
 0x91b   : > { %v2159_v32 = vpop.xlane.xlu0 %2158 }
 0x91c   : > { %v2147_v10 = vpop.xlane.xlu1 %2146 }
 0x91e   : > { %v4364_v15 = vpop.eup %4363 }
 0x91f   : > { %v4366_v33 = vpop.eup %4365  ;;  %v2155_v36 = vpop.xlane.xlu0 %2154  ;;  %v2182_v57 = vmul.f32 %v4364_v15, %v5785_v48 }
 0x920   : > { %v4368_v43 = vpop.eup %4367  ;;  %v2153_v42 = vpop.xlane.xlu1 %2152  ;;  %v2183_v41 = vmul.f32 %v4366_v33, %v5787_v20 }
 0x921   : > { %4371 = vrcp.f32 %v2153_v42  ;;  %v2184_v22 = vmul.f32 %v4368_v43, %v5779_v17 }
 0x922   : > { %v4370_v40 = vpop.eup %4369  ;;  %v2196_v51 = vpack.c.bf16 %v2183_v41, %v2182_v57  ;;  %4373 = vrcp.f32 %v2147_v10 }
 0x923   : > { %v2161_v1 = vpop.xlane.xlu0 %2160  ;;  %v2185_v46 = vmul.f32 %v4370_v40, %v5792_v11  ;;  %4375 = vrcp.f32 %v2151_v34 }
 0x924   : > { %3907 = vmatprep.mubr.bf16.mxu1 %v2196_v51  ;;  %v2149_v9 = vpop.xlane.xlu1 %2148 }
 0x925   : > { %4377 = vrcp.f32 %v2149_v9  ;;  %v2197_v60 = vpack.c.bf16 %v2185_v46, %v2184_v22 }
 0x926   : > { %4379 = vrcp.f32 %v2155_v36 }
 0x927   : > { %v2401_v48 = vpop.permute.xlu0 %2400  ;;  %3908 = vmatmul.mubr.bf16.gmra.mrb[52].mxu1 %v2197_v60 }
 0x928   : > { %4061 = vmatprep.subr.msk.bf16.mxu1 %vm939_vm0, %v2401_v48  ;;  %v2157_v20 = vpop.xlane.xlu1 %2156  ;;  %v2447_v35 = vsel %vm939_vm0, %v2401_v48, 0 }
 0x929   : > { %4381 = vrcp.f32 %v2157_v20  ;;  %3932 = vmatpush3.bf16.xpose.msra.mxu1 %v2447_v35 }
 0x92a   : > { %4383 = vrcp.f32 %v2161_v1 }
 0x92b   : > { %v2373_v16 = vpop.permute.xlu0 %2372  ;;  %v4372_v17 = vpop.eup %4371  ;;  %4385 = vrcp.f32 %v2159_v32 }
 0x92c   : > { %v2403_v11 = vpop.permute.xlu1 %2402  ;;  %v4374_v50 = vpop.eup %4373  ;;  %v2189_v21 = vmul.f32 %v4372_v17, %v5807_v4 }
 0x92d   : > { %4062 = vmatprep.subr.msk.bf16.mxu1 %vm939_vm0, %v2403_v11  ;;  %v4376_v14 = vpop.eup %4375  ;;  %v2450_v56 = vsel %vm939_vm0, %v2403_v11, 0  ;;  %v2186_v29 = vmul.f32 %v4374_v50, %v5801_v25 }
 0x92e   : > { %v2188_v55 = vmul.f32 %v4376_v14, %v5794_v30 }
 0x92f   : > { %v4378_v53 = vpop.eup %4377  ;;  %v2377_v38 = vpop.permute.xlu0 %2376 }
 0x930   : > { %v2375_v7 = vpop.permute.xlu1 %2374  ;;  %v2187_v24 = vmul.f32 %v4378_v53, %v5813_v49  ;;  %v4380_v44 = vpop.eup %4379  ;;  %v2199_v61 = vpack.c.bf16 %v2189_v21, %v2188_v55 }
 0x931   : > { %3934 = vmatpush3.bf16.xpose.msra.mxu1 %v2450_v56  ;;  %v2190_v4 = vmul.f32 %v4380_v44, %v5805_v12 }
 0x932   : > { %v2198_v13 = vpack.c.bf16 %v2187_v24, %v2186_v29 }
 0x933   : > { %v4382_v5 = vpop.eup %4381  ;;  %v2381_v52 = vpop.permute.xlu0 %2380 }
 0x934   : > { %v4384_v19 = vpop.eup %4383  ;;  %3911 = vmatprep.mubr.bf16.mxu1 %v2198_v13  ;;  %v2379_v27 = vpop.permute.xlu1 %2378  ;;  %v2191_v39 = vmul.f32 %v4382_v5, %v5817_v31 }
 0x935   : > { %3912 = vmatmul.mubr.bf16.gmra.mrb[56].mxu1 %v2199_v61  ;;  %v4386_v34 = vpop.eup %4385  ;;  %v2193_v49 = vmul.f32 %v4384_v19, %v5811_v23 }
 0x936   : > { %v2200_v25 = vpack.c.bf16 %v2191_v39, %v2190_v4  ;;  %v2192_v30 = vmul.f32 %v4386_v34, %v5799_v8 }
 0x937   : > { %v2385_v32 = vpop.permute.xlu0 %2384 }
 0x938   : > { %3915 = vmatprep.mubr.bf16.mxu1 %v2200_v25  ;;  %v2383_v10 = vpop.permute.xlu1 %2382  ;;  %v2201_v33 = vpack.c.bf16 %v2193_v49, %v2192_v30 }
 0x93b   : > { %v2702_v15 = vpop.permute.xlu0 %2701 }
 0x93c   : > { %3951 = vmatprep.subr.bf16.mxu0 %v2702_v15  ;;  %v2387_v36 = vpop.permute.xlu1 %2386 }
 0x93d   : > { %3916 = vmatmul.mubr.bf16.gmra.mrb[60].mxu1 %v2201_v33  ;;  %3952 = vmatpush3.bf16.msra.mxu0 %v2702_v15 }
 0x93e   : > { %3935 = vmatprep.mubr.msk.bf16.mxu1 %vm939_vm0, %v2373_v16 }
 0x93f   : > { %v2706_v31 = vpop.permute.xlu0 %2705 }
 0x940   : > { %v2704_v12 = vpop.permute.xlu1 %2703 }
 0x941   : > { %3953 = vmatprep.subr.bf16.mxu0 %v2704_v12 }
 0x942   : > { %3954 = vmatpush3.bf16.msra.mxu0 %v2704_v12 }
 0x943   : > { %3955 = vmatprep.subr.bf16.mxu0 %v2706_v31 }
 0x945   : > { %3936 = vmatmul.mubr.msk.bf16.vlgmr.msra.gmra.mrb[64].mxu1 %vm939_vm0, %v2375_v7 }
 0x946   : > { %3939 = vmatprep.mubr.msk.bf16.mxu1 %vm939_vm0, %v2377_v38  ;;  %3956 = vmatpush3.bf16.msra.mxu0 %v2706_v31 }
 0x94d   : > { %3940 = vmatmul.mubr.msk.bf16.gmra.mrb[68].mxu1 %vm939_vm0, %v2379_v27 }
 0x94e   : > { %3943 = vmatprep.mubr.msk.bf16.mxu1 %vm939_vm0, %v2381_v52 }
 0x955   : > { %3944 = vmatmul.mubr.msk.bf16.gmra.mrb[72].mxu1 %vm939_vm0, %v2383_v10 }
 0x956   : > { %3947 = vmatprep.mubr.msk.bf16.mxu1 %vm939_vm0, %v2385_v32 }
 0x95d   : > { %3948 = vmatmul.mubr.msk.bf16.gmra.mrb[76].mxu1 %vm939_vm0, %v2387_v36 }
 0x9c2   : > { %v5890_v8 = vpop.f32.mrb[48].mxu1 }
 0x9c3   : > { %v5892_v23 = vpop.f32.mrb[49].mxu1 }
 0x9c4   : > { %v5894_v57 = vpop.f32.mrb[50].mxu1 }
 0x9c5   : > { %v5898_v42 = vpop.f32.mrb[51].mxu1 }
 0x9fa   : > { %v5902_v40 = vpop.f32.mrb[52].mxu1 }
 0x9fb   : > { %v5904_v51 = vpop.f32.mrb[53].mxu1 }
 0x9fc   : > { %v5906_v1 = vpop.f32.mrb[54].mxu1 }
 0x9fd   : > { %v5910_v46 = vpop.f32.mrb[55].mxu1 }
 0xa08   : > { %v5914_v60 = vpop.f32.mrb[56].mxu1 }
 0xa09   : > { %v5916_v48 = vpop.f32.mrb[57].mxu1 }
 0xa0a   : > { %v5918_v20 = vpop.f32.mrb[58].mxu1 }
 0xa0b   : > { %v2328_v35 = vpack.c.bf16 %v5918_v20, %v5914_v60  ;;  %v5922_v16 = vpop.f32.mrb[59].mxu1 }
 0xa0c   : > { %v2327_v17 = vpack.c.bf16 %v5922_v16, %v5916_v48  ;;  %v6505_v16 = vld [vmem:[#allocation24_spill] sm:$0xff] }
 0xa10   : > { %v5926_v11 = vpop.f32.mrb[60].mxu1 }
 0xa11   : > { %v5928_v50 = vpop.f32.mrb[61].mxu1 }
 0xa12   : > { %v5930_v14 = vpop.f32.mrb[62].mxu1 }
 0xa13   : > { %v5934_v38 = vpop.f32.mrb[63].mxu1 }
 0xa14   : > { %v2329_v21 = vpack.c.bf16 %v5934_v38, %v5928_v50  ;;  %v6507_v50 = vld [vmem:[#allocation25_spill] sm:$0xff]  ;;  %v6508_v38 = vld [vmem:[#allocation23_spill] sm:$0xff] }
 0xa18   : > { %v3937_v7 = vpop.f32.mrb[64].mxu1 }
 0xa19   : > { %2553 = vmax.xlane.f32.xlu0 %v3937_v7  ;;  %v2486_v56 = vpop.f32.mrb[65].mxu1 }
 0xa1a   : > { %v3938_v29 = vpop.f32.mrb[66].mxu1 }
 0xa1b   : > { %v2489_v24 = vpop.f32.mrb[67].mxu1 }
 0xa1c   : > { %2551 = vmax.xlane.f32.xlu1 %v2489_v24 }
 0xa1d   : > { %2549 = vmax.xlane.f32.xlu0 %v2486_v56 }
 0xa20   : > { %v3941_v44 = vpop.f32.mrb[68].mxu1 }
 0xa21   : > { %2555 = vmax.xlane.f32.xlu0 %v3938_v29  ;;  %v2502_v55 = vpop.f32.mrb[69].mxu1 }
 0xa22   : > { %v3942_v13 = vpop.f32.mrb[70].mxu1 }
 0xa23   : > { %2563 = vmax.xlane.f32.xlu1 %v3942_v13  ;;  %v2505_v5 = vpop.f32.mrb[71].mxu1 }
 0xa25   : > { %2561 = vmax.xlane.f32.xlu0 %v3941_v44 }
 0xa27   : > { %2559 = vmax.xlane.f32.xlu1 %v2505_v5 }
 0xa28   : > { %v3945_v52 = vpop.f32.mrb[72].mxu1 }
 0xa29   : > { %2557 = vmax.xlane.f32.xlu0 %v2502_v55  ;;  %v5938_v61 = vpop.f32.mrb[73].mxu1 }
 0xa2a   : > { %v5940_v19 = vpop.f32.mrb[74].mxu1 }
 0xa2b   : > { %2571 = vmax.xlane.f32.xlu1 %v5940_v19  ;;  %v5943_v27 = vpop.f32.mrb[75].mxu1 }
 0xa2d   : > { %2569 = vmax.xlane.f32.xlu0 %v3945_v52 }
 0xa2f   : > { %2567 = vmax.xlane.f32.xlu1 %v5943_v27 }
 0xa30   : > { %v5946_v4 = vpop.f32.mrb[76].mxu1 }
 0xa31   : > { %2565 = vmax.xlane.f32.xlu0 %v5938_v61  ;;  %v5949_v39 = vpop.f32.mrb[77].mxu1 }
 0xa32   : > { %v5951_v34 = vpop.f32.mrb[78].mxu1 }
 0xa33   : > { %v5953_v25 = vpop.f32.mrb[79].mxu1 }
 0xa35   : > { %2577 = vmax.xlane.f32.xlu0 %v5946_v4 }
 0xa39   : > { %2573 = vmax.xlane.f32.xlu0 %v5949_v39 }
 0xa40   : > { %2709 = vrot.lane.b32.xlu1 %v5209_v2, %s4735_s29 }
 0xa4f   : > { %2707 = vrot.lane.b32.xlu0 %v5182_v0, %s4735_s29 }
 0xa64   : > { %2579 = vmax.xlane.f32.xlu1 %v5951_v34 }
 0xa68   : > { %2575 = vmax.xlane.f32.xlu1 %v5953_v25 }
 0xa79   : > { %2711 = vrot.lane.b32.xlu1 %v5206_v62, %s4735_s29 }
 0xaa6   : > { %v2554_v32 = vpop.xlane.xlu0 %2553 }
 0xaa7   : > { %v2583_v49 = vsub.f32 %v3937_v7, %v2554_v32 }
 0xaa9   : > { %v2601_v10 = vmul.f32 1.442695, %v2583_v49  ;;  %v2552_v15 = vpop.xlane.xlu1 %2551 }
 0xaaa   : > { %v2550_v30 = vpop.xlane.xlu0 %2549  ;;  %v2582_v12 = vsub.f32 %v2489_v24, %v2552_v15 }
 0xaab   : > { %4387 = vpow2.f32 %v2601_v10  ;;  %v2581_v33 = vsub.f32 %v2486_v56, %v2550_v30 }
 0xaac   : > { %v2599_v22 = vmul.f32 1.442695, %v2582_v12 }
 0xaad   : > { %v2597_v36 = vmul.f32 1.442695, %v2581_v33 }
 0xaae   : > { %v2556_v2 = vpop.xlane.xlu0 %2555 }
 0xaaf   : > { %4389 = vpow2.f32 %v2597_v36  ;;  %v2584_v31 = vsub.f32 %v3938_v29, %v2556_v2 }
 0xab0   : > { %v2564_v0 = vpop.xlane.xlu1 %2563 }
 0xab1   : > { %v2603_v53 = vmul.f32 1.442695, %v2584_v31  ;;  %v2588_v56 = vsub.f32 %v3942_v13, %v2564_v0 }
 0xab2   : > { %v2562_v9 = vpop.xlane.xlu0 %2561 }
 0xab3   : > { %4391 = vpow2.f32 %v2603_v53  ;;  %v2587_v43 = vsub.f32 %v3941_v44, %v2562_v9  ;;  %v2611_v9 = vmul.f32 1.442695, %v2588_v56 }
 0xab4   : > { %v2560_v41 = vpop.xlane.xlu1 %2559  ;;  %4393 = vpow2.f32 %v2599_v22 }
 0xab5   : > { %v5965_v62 = vpop.eup %4387  ;;  %v2609_v7 = vmul.f32 1.442695, %v2587_v43  ;;  %v2586_v32 = vsub.f32 %v2505_v5, %v2560_v41 }
 0xab6   : > { %v2558_v49 = vpop.xlane.xlu0 %2557  ;;  %2633 = vadd.xlane.f32.xlu1 %v5965_v62 }
 0xab7   : > { %4395 = vpow2.f32 %v2609_v7  ;;  %v2607_v24 = vmul.f32 1.442695, %v2586_v32  ;;  %v2585_v10 = vsub.f32 %v2502_v55, %v2558_v49 }
 0xab8   : > { %v2572_v15 = vpop.xlane.xlu1 %2571 }
 0xab9   : > { %v5968_v29 = vpop.eup %4389  ;;  %v2605_v30 = vmul.f32 1.442695, %v2585_v10  ;;  %4397 = vpow2.f32 %v2607_v24  ;;  %v2592_v22 = vsub.f32 %v5940_v19, %v2572_v15 }
 0xaba   : > { %v2570_v53 = vpop.xlane.xlu0 %2569  ;;  %2629 = vadd.xlane.f32.xlu1 %v5968_v29 }
 0xabb   : > { %4399 = vpow2.f32 %v2605_v30  ;;  %v2591_v43 = vsub.f32 %v3945_v52, %v2570_v53  ;;  %v2619_v2 = vmul.f32 1.442695, %v2592_v22  ;;  %v6494_v22 = vpack.c.bf16 %v5700_v3, %v5694_v47 }
 0xabc   : > { %4401 = vpow2.f32 %v2611_v9  ;;  %v2568_v55 = vpop.xlane.xlu1 %2567  ;;  %v6498_v3 = vpack.c.bf16 %v5708_v54, %v5704_v18  ;;  %v6502_v18 = vpack.c.bf16 %v5898_v42, %v5892_v23  ;;  %v6503_v54 = vpack.c.bf16 %v5894_v57, %v5890_v8 }
 0xabd   : > { %v5971_v41 = vpop.eup %4391  ;;  %v2617_v44 = vmul.f32 1.442695, %v2591_v43  ;;  %v2590_v52 = vsub.f32 %v5943_v27, %v2568_v55  ;;  %v6496_v55 = vpack.c.bf16 %v5696_v63, %v5692_v37  ;;  %v6497_v37 = vpack.c.bf16 %v5712_v6, %v5706_v45  ;;  %v6499_v45 = vld [vmem:[#allocation22_spill] sm:$0xff]  ;;  %v6500_v6 = vld [vmem:[#allocation21_spill] sm:$0xff] }
 0xabe   : > { %v2566_v13 = vpop.xlane.xlu0 %2565  ;;  %2635 = vadd.xlane.f32.xlu1 %v5971_v41  ;;  %v5976_v33 = vpop.eup %4393  ;;  %v6501_v20 = vpack.c.bf16 %v6499_v45, %v6500_v6  ;;  %v6510_v23 = vpack.c.bf16 %v5910_v46, %v5904_v51 }
 0xabf   : > { %v2589_v5 = vsub.f32 %v5938_v61, %v2566_v13  ;;  %4403 = vpow2.f32 %v2617_v44  ;;  %v2615_v32 = vmul.f32 1.442695, %v2590_v52  ;;  %v6495_v44 = vpack.c.bf16 %v5672_v58, %v5668_v59 }
 0xac0   : > { %v2710_v30 = vpop.permute.xlu1 %2709 }
 0xac1   : > { %v5978_v36 = vpop.eup %4395  ;;  %v2613_v12 = vmul.f32 1.442695, %v2589_v5 }
 0xac2   : > { %v2578_v31 = vpop.xlane.xlu0 %2577  ;;  %2641 = vadd.xlane.f32.xlu0 %v5978_v36  ;;  %2631 = vadd.xlane.f32.xlu1 %v5976_v33 }
 0xac3   : > { %4405 = vpow2.f32 %v2613_v12  ;;  %v2595_v19 = vsub.f32 %v5946_v4, %v2578_v31  ;;  %v5984_v0 = vpop.eup %4397 }
 0xac4   : > { %4407 = vpow2.f32 %v2619_v2 }
 0xac5   : > { %v5986_v61 = vpop.eup %4399  ;;  %v2625_v7 = vmul.f32 1.442695, %v2595_v19 }
 0xac6   : > { %2637 = vadd.xlane.f32.xlu0 %v5986_v61  ;;  %v2574_v49 = vpop.xlane.xlu0 %2573  ;;  %2639 = vadd.xlane.f32.xlu1 %v5984_v0  ;;  %v5991_v56 = vpop.eup %4401 }
 0xac7   : > { %4409 = vpow2.f32 %v2625_v7  ;;  %v2593_v27 = vsub.f32 %v5949_v39, %v2574_v49 }
 0xac8   : > { %4411 = vpow2.f32 %v2615_v32 }
 0xac9   : > { %v2621_v24 = vmul.f32 1.442695, %v2593_v27  ;;  %v5994_v10 = vpop.eup %4403 }
 0xaca   : > { %v2708_v4 = vpop.permute.xlu0 %2707  ;;  %2643 = vadd.xlane.f32.xlu0 %v5991_v56 }
 0xacb   : > { %4413 = vpow2.f32 %v2621_v24  ;;  %3957 = vmatprep.subr.bf16.mxu0 %v2708_v4 }
 0xacc   : > { %3958 = vmatpush3.bf16.msra.mxu0 %v2708_v4 }
 0xacd   : > { %v5996_v15 = vpop.eup %4405  ;;  %3959 = vmatprep.subr.bf16.mxu0 %v2710_v30 }
 0xace   : > { %2649 = vadd.xlane.f32.xlu0 %v5994_v10  ;;  %2645 = vadd.xlane.f32.xlu1 %v5996_v15  ;;  %v6000_v39 = vpop.eup %4407 }
 0xad0   : > { %3960 = vmatpush3.bf16.msra.mxu0 %v2710_v30 }
 0xad1   : > { %v6002_v53 = vpop.eup %4409 }
 0xad2   : > { %2657 = vadd.xlane.f32.xlu1 %v6002_v53  ;;  %2651 = vadd.xlane.f32.xlu0 %v6000_v39  ;;  %v6006_v9 = vpop.eup %4411 }
 0xad5   : > { %v6008_v43 = vpop.eup %4413 }
 0xad6   : > { %2653 = vadd.xlane.f32.xlu1 %v6008_v43  ;;  %2647 = vadd.xlane.f32.xlu0 %v6006_v9 }
 0xae7   : > { %2715 = vrot.lane.b32.xlu1 %v5230_v26, %s4735_s29 }
 0xaeb   : > { %1848 = vrot.lane.b32.xlu1 %v6494_v22, %s4735_s29 }
 0xaec   : > { %2713 = vrot.lane.b32.xlu0 %v5233_v28, %s4735_s29 }
 0xaef   : > { %1842 = vrot.lane.b32.xlu1 %v6495_v44, %s4735_s29 }
 0xaf1   : > { %v2580_v13 = vpop.xlane.xlu1 %2579 }
 0xaf2   : > { %v2596_v59 = vsub.f32 %v5951_v34, %v2580_v13 }
 0xaf3   : > { %1850 = vrot.lane.b32.xlu1 %v6496_v55, %s4735_s29 }
 0xaf4   : > { %v2627_v63 = vmul.f32 1.442695, %v2596_v59 }
 0xaf5   : > { %v2576_v26 = vpop.xlane.xlu1 %2575 }
 0xaf6   : > { %v2594_v47 = vsub.f32 %v5953_v25, %v2576_v26 }
 0xaf7   : > { %2347 = vrot.lane.b32.xlu1 %v2327_v17, %s4734_s13 }
 0xaf8   : > { %v2623_v58 = vmul.f32 1.442695, %v2594_v47 }
 0xaf9   : > { %v2712_v28 = vpop.permute.xlu1 %2711 }
 0xafa   : > { %3961 = vmatprep.subr.bf16.mxu0 %v2712_v28  ;;  %4415 = vpow2.f32 %v2623_v58 }
 0xafb   : > { %2349 = vrot.lane.b32.xlu1 %v2328_v35, %s4734_s13  ;;  %3962 = vmatpush3.bf16.msra.mxu0 %v2712_v28  ;;  %4417 = vpow2.f32 %v2627_v63  ;;  %v6504_v35 = vld [vmem:[#allocation26_spill] sm:$0xff] }
 0xafc   : > { %v6506_v17 = vpack.c.bf16 %v6504_v35, %v6505_v16 }
 0xaff   : > { %1852 = vrot.lane.b32.xlu1 %v6497_v37, %s4735_s29 }
 0xb03   : > { %1854 = vrot.lane.b32.xlu1 %v6498_v3, %s4735_s29 }
 0xb04   : > { %v6050_v60 = vpop.eup %4415 }
 0xb05   : > { %v6053_v48 = vpop.eup %4417 }
 0xb07   : > { %2351 = vrot.lane.b32.xlu1 %v2329_v21, %s4734_s13  ;;  %v6509_v21 = vpack.c.bf16 %v6507_v50, %v6508_v38 }
 0xb0b   : > { %2655 = vadd.xlane.f32.xlu0 %v6050_v60 }
 0xb0f   : > { %2659 = vadd.xlane.f32.xlu0 %v6053_v48 }
 0xb25   : > { %1840 = vrot.lane.b32.xlu0 %v6501_v20, %s4735_s29 }
 0xb29   : > { %2339 = vrot.lane.b32.xlu0 %v6502_v18, %s4734_s13 }
 0xb2d   : > { %2341 = vrot.lane.b32.xlu0 %v6503_v54, %s4734_s13 }
 0xb31   : > { %1844 = vrot.lane.b32.xlu0 %v6506_v17, %s4735_s29 }
 0xb35   : > { %1846 = vrot.lane.b32.xlu0 %v6509_v21, %s4735_s29 }
 0xb39   : > { %2343 = vrot.lane.b32.xlu0 %v6510_v23, %s4734_s13 }
 0xb43   : > { %v2634_v42 = vpop.xlane.xlu1 %2633 }
 0xb47   : > { %v2630_v34 = vpop.xlane.xlu1 %2629 }
 0xb48   : > { %4419 = vrcp.f32 %v2630_v34 }
 0xb4b   : > { %v2636_v25 = vpop.xlane.xlu1 %2635 }
 0xb4f   : > { %v2642_v8 = vpop.xlane.xlu0 %2641  ;;  %v2632_v57 = vpop.xlane.xlu1 %2631 }
 0xb50   : > { %4421 = vrcp.f32 %v2632_v57 }
 0xb51   : > { %4423 = vrcp.f32 %v2636_v25 }
 0xb52   : > { %v4420_v52 = vpop.eup %4419 }
 0xb53   : > { %v2638_v5 = vpop.xlane.xlu0 %2637  ;;  %v2640_v12 = vpop.xlane.xlu1 %2639  ;;  %v2677_v32 = vmul.f32 %v4420_v52, %v5968_v29 }
 0xb54   : > { %4425 = vrcp.f32 %v2638_v5 }
 0xb55   : > { %4427 = vrcp.f32 %v2640_v12 }
 0xb56   : > { %4429 = vrcp.f32 %v2634_v42 }
 0xb57   : > { %v2644_v2 = vpop.xlane.xlu0 %2643 }
 0xb58   : > { %4431 = vrcp.f32 %v2644_v2 }
 0xb5a   : > { %v4422_v31 = vpop.eup %4421 }
 0xb5b   : > { %v2650_v19 = vpop.xlane.xlu0 %2649  ;;  %v2646_v7 = vpop.xlane.xlu1 %2645  ;;  %v2678_v51 = vmul.f32 %v4422_v31, %v5976_v33 }
 0xb5c   : > { %v4424_v30 = vpop.eup %4423 }
 0xb5d   : > { %v2693_v46 = vpack.c.bf16 %v2678_v51, %v2677_v32  ;;  %v2680_v55 = vmul.f32 %v4424_v30, %v5971_v41 }
 0xb5e   : > { %v4426_v22 = vpop.eup %4425 }
 0xb5f   : > { %v2652_v49 = vpop.xlane.xlu0 %2651  ;;  %v6082_v27 = vpop.xlane.xlu1 %2657  ;;  %3967 = vmatprep.mubr.bf16.mxu0 %v2693_v46  ;;  %v2681_v47 = vmul.f32 %v4426_v22, %v5986_v61  ;;  %v4187_v46 = vld [vmem:[#allocation11] sm:$0xff]   ;;  %v4194_v22 = vld [vmem:[#allocation11 + $0x38] sm:$0xff]  }
 0xb60   : > { %v4428_v29 = vpop.eup %4427  ;;  %4015 = vmatprep.subr.bf16.mxu1 %v4187_v46 }
 0xb61   : > { %v4430_v33 = vpop.eup %4429  ;;  %v2682_v28 = vmul.f32 %v4428_v29, %v5984_v0  ;;  %4023 = vmatpush3.bf16.msra.mxu1 %v4187_v46 }
 0xb62   : > { %v2679_v59 = vmul.f32 %v4430_v33, %v5965_v62  ;;  %v4432_v37 = vpop.eup %4431 }
 0xb63   : > { %v2648_v24 = vpop.xlane.xlu0 %2647  ;;  %v2654_v4 = vpop.xlane.xlu1 %2653  ;;  %v2695_v3 = vpack.c.bf16 %v2682_v28, %v2681_v47  ;;  %v2684_v0 = vmul.f32 %v4432_v37, %v5991_v56 }
 0xb64   : > { %4433 = vrcp.f32 %v2648_v24  ;;  %v2694_v58 = vpack.c.bf16 %v2680_v55, %v2679_v59  ;;  %v4192_v24 = vld [vmem:[#allocation11 + $0x28] sm:$0xff]  }
 0xb65   : > { %4435 = vrcp.f32 %v2642_v8 }
 0xb66   : > { %4437 = vrcp.f32 %v2646_v7 }
 0xb67   : > { %v2714_v44 = vpop.permute.xlu0 %2713  ;;  %v2716_v13 = vpop.permute.xlu1 %2715  ;;  %4439 = vrcp.f32 %v2652_v49  ;;  %v4188_v49 = vld [vmem:[#allocation11 + $0x8] sm:$0xff]  }
 0xb68   : > { %3963 = vmatprep.subr.bf16.mxu0 %v2714_v44  ;;  %4441 = vrcp.f32 %v2650_v19  ;;  %4016 = vmatprep.subr.bf16.mxu1 %v4188_v49 }
 0xb69   : > { %3964 = vmatpush3.bf16.msra.mxu0 %v2714_v44  ;;  %4443 = vrcp.f32 %v2654_v4  ;;  %4024 = vmatpush3.bf16.msra.mxu1 %v4188_v49  ;;  %v4193_v4 = vld [vmem:[#allocation11 + $0x30] sm:$0xff]  }
 0xb6a   : > { %3965 = vmatprep.subr.bf16.mxu0 %v2716_v13 }
 0xb6b   : > { %v1849_v26 = vpop.permute.xlu1 %1848 }
 0xb6c   : > { %1869 = vst.msk [vmem:[#allocation2 + $0x20] sm:$0xff] %vm1864_vm1, %v1849_v26 }
 0xb6d   : > { %3966 = vmatpush3.bf16.msra.mxu0 %v2716_v13 }
 0xb6e   : > { %v4434_v45 = vpop.eup %4433  ;;  %3983 = vmatprep.subr.bf16.mxu0 %v4187_v46 }
 0xb6f   : > { %v1843_v63 = vpop.permute.xlu1 %1842  ;;  %v4436_v41 = vpop.eup %4435  ;;  %v2686_v62 = vmul.f32 %v4434_v45, %v6006_v9 }
 0xb70   : > { %1866 = vst.msk [vmem:[#allocation2 + $0x8] sm:$0xff] %vm1864_vm1, %v1843_v63  ;;  %3968 = vmatmul.mubr.bf16.vlgmr.msra.gmra.mrb[80].mxu0 %v2694_v58  ;;  %v4438_v61 = vpop.eup %4437  ;;  %v2683_v20 = vmul.f32 %v4436_v41, %v5978_v36  ;;  %v6511_v63 = vpack.c.bf16 %v5906_v1, %v5902_v40 }
 0xb71   : > { %3971 = vmatprep.mubr.bf16.mxu0 %v2695_v3  ;;  %v2685_v18 = vmul.f32 %v4438_v61, %v5996_v15  ;;  %v4440_v35 = vpop.eup %4439  ;;  %3984 = vmatpush3.bf16.msra.mxu0 %v4187_v46  ;;  %v4485_v46 = vld [vmem:[%s5038_s9] sm:$0xff] }
 0xb72   : > { %v2696_v54 = vpack.c.bf16 %v2684_v0, %v2683_v20  ;;  %v4442_v50 = vpop.eup %4441  ;;  %v2688_v56 = vmul.f32 %v4440_v35, %v6000_v39  ;;  %3985 = vmatprep.subr.bf16.mxu0 %v4188_v49 }
 0xb73   : > { %v1851_v6 = vpop.permute.xlu1 %1850  ;;  %v2697_v17 = vpack.c.bf16 %v2686_v62, %v2685_v18  ;;  %v2687_v9 = vmul.f32 %v4442_v50, %v5994_v10  ;;  %v4444_v10 = vpop.eup %4443  ;;  %v6512_v62 = vpack.c.bf16 %v5930_v14, %v5926_v11 }
 0xb74   : > { %1870 = vst.msk [vmem:[#allocation2 + $0x28] sm:$0xff] %vm1864_vm1, %v1851_v6  ;;  %v2689_v57 = vmul.f32 %v4444_v10, %v6008_v43 }
 0xb75   : > { %v2698_v36 = vpack.c.bf16 %v2688_v56, %v2687_v9  ;;  %3986 = vmatpush3.bf16.msra.mxu0 %v4188_v49 }
 0xb77   : > { %v2348_v16 = vpop.permute.xlu1 %2347 }
 0xb78   : > { %2368 = vst.msk [vmem:[#allocation2 + $0x20] sm:$0xff] %vm2363_vm2, %v2348_v16  ;;  %3972 = vmatmul.mubr.bf16.gmra.mrb[84].mxu0 %v2696_v54 }
 0xb79   : > { %3975 = vmatprep.mubr.bf16.mxu0 %v2697_v17 }
 0xb7b   : > { %v2350_v38 = vpop.permute.xlu1 %2349 }
 0xb7c   : > { %2369 = vst.msk [vmem:[#allocation2 + $0x28] sm:$0xff] %vm2363_vm2, %v2350_v38 }
 0xb7f   : > { %v1853_v21 = vpop.permute.xlu1 %1852 }
 0xb80   : > { %1871 = vst.msk [vmem:[#allocation2 + $0x30] sm:$0xff] %vm1864_vm1, %v1853_v21  ;;  %3976 = vmatmul.mubr.bf16.gmra.mrb[88].mxu0 %v2698_v36 }
 0xb83   : > { %v1855_v15 = vpop.permute.xlu1 %1854 }
 0xb84   : > { %1872 = vst.msk [vmem:[#allocation2 + $0x38] sm:$0xff] %vm1864_vm1, %v1855_v15 }
 0xb87   : > { %v2352_v23 = vpop.permute.xlu1 %2351 }
 0xb88   : > { %2370 = vst.msk [vmem:[#allocation2 + $0x30] sm:$0xff] %vm2363_vm2, %v2352_v23 }
 0xb98   : > { %v2656_v42 = vpop.xlane.xlu0 %2655 }
 0xb99   : > { %4445 = vrcp.f32 %v2656_v42 }
 0xb9a   : > { %4447 = vrcp.f32 %v6082_v27  ;;  %v4191_v27 = vld [vmem:[#allocation11 + $0x20] sm:$0xff]  }
 0xb9c   : > { %v2660_v39 = vpop.xlane.xlu0 %2659 }
 0xb9d   : > { %4449 = vrcp.f32 %v2660_v39 }
 0xba0   : > { %v1841_v34 = vpop.permute.xlu0 %1840 }
 0xba1   : > { %1865 = vst.msk [vmem:[#allocation2] sm:$0xff] %vm1864_vm1, %v1841_v34 }
 0xba3   : > { %v4446_v25 = vpop.eup %4445 }
 0xba4   : > { %v2340_v8 = vpop.permute.xlu0 %2339  ;;  %v2690_v5 = vmul.f32 %v4446_v25, %v6050_v60  ;;  %v4448_v12 = vpop.eup %4447 }
 0xba5   : > { %2364 = vst.msk [vmem:[#allocation2] sm:$0xff] %vm2363_vm2, %v2340_v8  ;;  %v2691_v19 = vmul.f32 %v4448_v12, %v6002_v53  ;;  %v4189_v53 = vld [vmem:[#allocation11 + $0x10] sm:$0xff]  }
 0xba6   : > { %v2699_v2 = vpack.c.bf16 %v2690_v5, %v2689_v57  ;;  %3987 = vmatprep.subr.bf16.mxu0 %v4189_v53  ;;  %4017 = vmatprep.subr.bf16.mxu1 %v4189_v53  ;;  %v6142_v57 = vld [vmem:[%s6439_s7] ss:$0 sm:$0xff] }
 0xba7   : > { %v4450_v52 = vpop.eup %4449  ;;  %3988 = vmatpush3.bf16.msra.mxu0 %v4189_v53  ;;  %4025 = vmatpush3.bf16.msra.mxu1 %v4189_v53 }
 0xba8   : > { %v2342_v31 = vpop.permute.xlu0 %2341  ;;  %3979 = vmatprep.mubr.bf16.mxu0 %v2699_v2  ;;  %v2692_v7 = vmul.f32 %v4450_v52, %v6053_v48  ;;  %v4190_v48 = vld [vmem:[#allocation11 + $0x18] sm:$0xff]  }
 0xba9   : > { %2365 = vst.msk [vmem:[#allocation2 + $0x8] sm:$0xff] %vm2363_vm2, %v2342_v31  ;;  %3989 = vmatprep.subr.bf16.mxu0 %v4190_v48  ;;  %4018 = vmatprep.subr.bf16.mxu1 %v4190_v48  ;;  %v4483_v31 = vld [vmem:[%s5038_s9 + $0x10] sm:$0xff] }
 0xbaa   : > { %v2700_v32 = vpack.c.bf16 %v2692_v7, %v2691_v19 }
 0xbab   : > { %3990 = vmatpush3.bf16.msra.mxu0 %v4190_v48  ;;  %4026 = vmatpush3.bf16.msra.mxu1 %v4190_v48  ;;  %v4486_v48 = vld [vmem:[%s5038_s9 + $0x18] sm:$0xff] }
 0xbac   : > { %v1845_v51 = vpop.permute.xlu0 %1844  ;;  %3980 = vmatmul.mubr.bf16.gmra.mrb[92].mxu0 %v2700_v32  ;;  %3991 = vmatprep.subr.bf16.mxu0 %v4191_v27 }
 0xbad   : > { %1867 = vst.msk [vmem:[#allocation2 + $0x10] sm:$0xff] %vm1864_vm1, %v1845_v51  ;;  %4019 = vmatprep.subr.bf16.mxu1 %v4191_v27 }
 0xbaf   : > { %3992 = vmatpush3.bf16.msra.mxu0 %v4191_v27  ;;  %4027 = vmatpush3.bf16.msra.mxu1 %v4191_v27 }
 0xbb0   : > { %v1847_v43 = vpop.permute.xlu0 %1846  ;;  %3993 = vmatprep.subr.bf16.mxu0 %v4192_v24  ;;  %4020 = vmatprep.subr.bf16.mxu1 %v4192_v24 }
 0xbb1   : > { %1868 = vst.msk [vmem:[#allocation2 + $0x18] sm:$0xff] %vm1864_vm1, %v1847_v43  ;;  %v4484_v43 = vld [vmem:[%s5038_s9 + $0x8] sm:$0xff] }
 0xbb3   : > { %3994 = vmatpush3.bf16.msra.mxu0 %v4192_v24  ;;  %4028 = vmatpush3.bf16.msra.mxu1 %v4192_v24 }
 0xbb4   : > { %v2344_v60 = vpop.permute.xlu0 %2343  ;;  %3995 = vmatprep.subr.bf16.mxu0 %v4193_v4  ;;  %4021 = vmatprep.subr.bf16.mxu1 %v4193_v4 }
 0xbb5   : > { %2366 = vst.msk [vmem:[#allocation2 + $0x10] sm:$0xff] %vm2363_vm2, %v2344_v60 }
 0xbb7   : > { %3996 = vmatpush3.bf16.msra.mxu0 %v4193_v4  ;;  %4029 = vmatpush3.bf16.msra.mxu1 %v4193_v4 }
 0xbb8   : > { %3997 = vmatprep.subr.bf16.mxu0 %v4194_v22  ;;  %4022 = vmatprep.subr.bf16.mxu1 %v4194_v22 }
 0xbbb   : > { %3998 = vmatpush3.bf16.msra.mxu0 %v4194_v22  ;;  %4030 = vmatpush3.bf16.msra.mxu1 %v4194_v22 }
 0xc43   : > { %v3969_v30 = vpop.f32.mrb[80].mxu0 }
 0xc44   : > { %v2759_v44 = vpop.f32.mrb[81].mxu0 }
 0xc45   : > { %v3970_v13 = vpop.f32.mrb[82].mxu0 }
 0xc46   : > { %v2823_v29 = vpack.c.bf16 %v3970_v13, %v3969_v30  ;;  %v2762_v33 = vpop.f32.mrb[83].mxu0 }
 0xc47   : > { %v2822_v55 = vpack.c.bf16 %v2762_v33, %v2759_v44  ;;  %v4487_v44 = vld [vmem:[%s5038_s9 + $0x30] sm:$0xff] }
 0xc48   : > { %2840 = vrot.lane.b32.xlu0 %v2823_v29, %s4733_s22 }
 0xc4b   : > { %v3973_v26 = vpop.f32.mrb[84].mxu0 }
 0xc4c   : > { %2838 = vrot.lane.b32.xlu0 %v2822_v55, %s4733_s22  ;;  %v2775_v47 = vpop.f32.mrb[85].mxu0 }
 0xc4d   : > { %v3974_v28 = vpop.f32.mrb[86].mxu0 }
 0xc4e   : > { %v2825_v59 = vpack.c.bf16 %v3974_v28, %v3973_v26  ;;  %v2778_v58 = vpop.f32.mrb[87].mxu0  ;;  %v4488_v26 = vld [vmem:[%s5038_s9 + $0x38] sm:$0xff] }
 0xc4f   : > { %v2824_v37 = vpack.c.bf16 %v2778_v58, %v2775_v47 }
 0xc50   : > { %2345 = vrot.lane.b32.xlu0 %v6511_v63, %s4734_s13  ;;  %v4489_v63 = vld [vmem:[%s5038_s9 + $0x20] sm:$0xff] }
 0xc53   : > { %v3977_v3 = vpop.f32.mrb[88].mxu0 }
 0xc54   : > { %2842 = vrot.lane.b32.xlu0 %v2824_v37, %s4733_s22  ;;  %v2791_v45 = vpop.f32.mrb[89].mxu0 }
 0xc55   : > { %v3978_v41 = vpop.f32.mrb[90].mxu0 }
 0xc56   : > { %v2827_v61 = vpack.c.bf16 %v3978_v41, %v3977_v3  ;;  %v2794_v0 = vpop.f32.mrb[91].mxu0 }
 0xc57   : > { %v2826_v6 = vpack.c.bf16 %v2794_v0, %v2791_v45 }
 0xc58   : > { %2844 = vrot.lane.b32.xlu0 %v2825_v59, %s4733_s22  ;;  %2848 = vrot.lane.b32.xlu1 %v2827_v61, %s4733_s22  ;;  %v4490_v61 = vld [vmem:[%s5038_s9 + $0x28] sm:$0xff] }
 0xc5c   : > { %2846 = vrot.lane.b32.xlu1 %v2826_v6, %s4733_s22 }
 0xc60   : > { %2353 = vrot.lane.b32.xlu1 %v6512_v62, %s4734_s13  ;;  %v4491_v62 = vld [vmem:[%s5038_s9 + $0x50] sm:$0xff]  ;;  %s4649_s13 = scalar_lea.vmem %s4648_s11, 4096 }
 0xc7f   : > { %v3981_v40 = vpop.f32.mrb[92].mxu0 }
 0xc80   : > { %v2807_v1 = vpop.f32.mrb[93].mxu0 }
 0xc81   : > { %v3982_v20 = vpop.f32.mrb[94].mxu0 }
 0xc82   : > { %v2829_v18 = vpack.c.bf16 %v3982_v20, %v3981_v40  ;;  %v2810_v54 = vpop.f32.mrb[95].mxu0  ;;  %v4492_v20 = vld [vmem:[%s5038_s9 + $0x58] sm:$0xff] }
 0xc83   : > { %v2828_v35 = vpack.c.bf16 %v2810_v54, %v2807_v1 }
 0xc85   : > { %2850 = vrot.lane.b32.xlu1 %v2828_v35, %s4733_s22  ;;  %v4493_v35 = vld [vmem:[%s5038_s9 + $0x40] sm:$0xff] }
 0xc89   : > { %2852 = vrot.lane.b32.xlu1 %v2829_v18, %s4733_s22 }
 0xcba   : > { %v2841_v16 = vpop.permute.xlu0 %2840 }
 0xcbb   : > { %2864 = vst.msk [vmem:[#allocation2 + $0x8] sm:$0xff] %vm2862_vm3, %v2841_v16 }
 0xcbe   : > { %v2839_v17 = vpop.permute.xlu0 %2838 }
 0xcbf   : > { %2863 = vst.msk [vmem:[#allocation2] sm:$0xff] %vm2862_vm3, %v2839_v17  ;;  %v4494_v17 = vld [vmem:[%s5038_s9 + $0x48] sm:$0xff] }
 0xcc2   : > { %v2346_v50 = vpop.permute.xlu0 %2345  ;;  %v2872_v56 = vld [vmem:[#allocation2 + $0x8] sm:$0xff] }
 0xcc3   : > { %2367 = vst.msk [vmem:[#allocation2 + $0x18] sm:$0xff] %vm2363_vm2, %v2346_v50 }
 0xcc6   : > { %v2843_v11 = vpop.permute.xlu0 %2842  ;;  %v2871_v14 = vld [vmem:[#allocation2] sm:$0xff] }
 0xcc7   : > { %2865 = vst.msk [vmem:[#allocation2 + $0x10] sm:$0xff] %vm2862_vm3, %v2843_v11  ;;  %3999 = vmatprep.mubr.bf16.mxu0 %v2871_v14 }
 0xcc8   : > { %4000 = vmatmul.mubr.bf16.vlgmr.msra.gmra.mrb[96].mxu0 %v2872_v56 }
 0xcca   : > { %v2845_v38 = vpop.permute.xlu0 %2844  ;;  %v2849_v9 = vpop.permute.xlu1 %2848 }
 0xccb   : > { %2866 = vst.msk [vmem:[#allocation2 + $0x18] sm:$0xff] %vm2862_vm3, %v2845_v38  ;;  %2868 = vst.msk [vmem:[#allocation2 + $0x28] sm:$0xff] %vm2862_vm3, %v2849_v9 }
 0xcce   : > { %v2847_v36 = vpop.permute.xlu1 %2846  ;;  %v2873_v21 = vld [vmem:[#allocation2 + $0x10] sm:$0xff] }
 0xccf   : > { %2867 = vst.msk [vmem:[#allocation2 + $0x20] sm:$0xff] %vm2862_vm3, %v2847_v36  ;;  %4003 = vmatprep.mubr.bf16.mxu0 %v2873_v21 }
 0xcd2   : > { %v2354_v15 = vpop.permute.xlu1 %2353  ;;  %v2874_v23 = vld [vmem:[#allocation2 + $0x18] sm:$0xff]  ;;  %v2876_v39 = vld [vmem:[#allocation2 + $0x28] sm:$0xff] }
 0xcd3   : > { %2371 = vst.msk [vmem:[#allocation2 + $0x38] sm:$0xff] %vm2363_vm2, %v2354_v15  ;;  %4004 = vmatmul.mubr.bf16.gmra.mrb[100].mxu0 %v2874_v23  ;;  %v4495_v15 = vld [vmem:[%s5038_s9 + $0x60] sm:$0xff] }
 0xcd6   : > { %v2875_v42 = vld [vmem:[#allocation2 + $0x20] sm:$0xff] }
 0xcd7   : > { %4007 = vmatprep.mubr.bf16.mxu1 %v2875_v42 }
 0xcd8   : > { %4008 = vmatmul.mubr.bf16.vlgmr.msra.gmra.mrb[80].mxu1 %v2876_v39  ;;  %v4496_v39 = vld [vmem:[%s5038_s9 + $0x68] sm:$0xff] }
 0xcf7   : > { %v2851_v34 = vpop.permute.xlu1 %2850 }
 0xcf8   : > { %2869 = vst.msk [vmem:[#allocation2 + $0x30] sm:$0xff] %vm2862_vm3, %v2851_v34 }
 0xcfb   : > { %v2853_v10 = vpop.permute.xlu1 %2852 }
 0xcfc   : > { %2870 = vst.msk [vmem:[#allocation2 + $0x38] sm:$0xff] %vm2862_vm3, %v2853_v10  ;;  %v4497_v10 = vld [vmem:[%s5038_s9 + $0x70] sm:$0xff] }
 0xcff   : > { %v2877_v25 = vld [vmem:[#allocation2 + $0x30] sm:$0xff] }
 0xd00   : > { %4011 = vmatprep.mubr.bf16.mxu1 %v2877_v25 }
 0xd03   : > { %v2878_v8 = vld [vmem:[#allocation2 + $0x38] sm:$0xff] }
 0xd04   : > { %4012 = vmatmul.mubr.bf16.gmra.mrb[84].mxu1 %v2878_v8  ;;  %v4498_v8 = vld [vmem:[%s5038_s9 + $0x78] sm:$0xff]  ;;  %s6319_s9 = scalar_lea.vmem [#allocation12], %s5034_s2  ;;  %s3534_s2 = sshll.u32 %s4815_s17, 11 }
 0xd05   : > { %s3316_s21 = sshll.u32 %s6319_s9, 4  ;;  %s6383_s27 = scalar_lea.hbm %s6514_s19, %s3534_s2  ;;  %s6385_s21 = int_to_ptr.vmem [resolvable:$true] %s3316_s21 }
 0xd06   : > { %s3303_s17 = scalar_lea.sflag [#allocation5], %s5031_s24  ;;  %s4643_s22 = scalar_lea.vmem %s6385_s21, 2048 }
 0xd07   : > { %p4644_p2 = scmp.ne.s32.totalorder %s6385_s21, %s4643_s22  ;;  %p4650_p8 = scmp.lt.s32.totalorder %s6385_s21, %s4648_s11 }
 0xd08   : > { %p4651_p6 = scmp.lt.s32.totalorder %s4649_s13, %s4643_s22 }
 0xd09   : > { %p4645_p4 = pnand %p4644_p2, %p4939_p5 }
 0xd0a   : > { %p4652_p10 = por %p4651_p6, %p4650_p8 }
 0xd0b   : > { %p4646_p0 = pneg %p4645_p4 }
 0xd0d   : > { %p4653_p3 = pnand %p4652_p10, %p4646_p0 }
 0xd9b   : > { %v4001_v5 = vpop.f32.mrb[96].mxu0 }
 0xd9c   : > { %v2993_v12 = vadd.f32 %v4001_v5, %v6142_v57  ;;  %v2984_v2 = vpop.f32.mrb[97].mxu0 }
 0xd9d   : > { %v4002_v52 = vpop.f32.mrb[98].mxu0  ;;  %v2985_v7 = vadd.f32 %v6142_v57, %v2984_v2 }
 0xd9e   : > { %v6146_v19 = vadd.f32 %v4483_v31, %v2993_v12  ;;  %v2987_v32 = vpop.f32.mrb[99].mxu0  ;;  %v2996_v53 = vadd.f32 %v4002_v52, %v6142_v57 }
 0xd9f   : > { %v2988_v51 = vadd.f32 %v6142_v57, %v2987_v32  ;;  %v6155_v49 = vadd.f32 %v4485_v46, %v2985_v7 }
 0xda0   : > { %3067 = vadd.xlane.f32.xlu0 %v6146_v19  ;;  %v6161_v27 = vadd.f32 %v4486_v48, %v2996_v53 }
 0xda1   : > { %v6152_v60 = vadd.f32 %v4484_v43, %v2988_v51 }
 0xda3   : > { %3065 = vadd.xlane.f32.xlu1 %v6152_v60 }
 0xda4   : > { %3063 = vadd.xlane.f32.xlu0 %v6155_v49 }
 0xda6   : > { %v4005_v24 = vpop.f32.mrb[100].mxu0 }
 0xda7   : > { %v3009_v4 = vadd.f32 %v4005_v24, %v6142_v57  ;;  %v3000_v30 = vpop.f32.mrb[101].mxu0 }
 0xda8   : > { %v4006_v22 = vpop.f32.mrb[102].mxu0  ;;  %3069 = vadd.xlane.f32.xlu0 %v6161_v27  ;;  %v3001_v55 = vadd.f32 %v6142_v57, %v3000_v30 }
 0xda9   : > { %v6166_v13 = vadd.f32 %v4487_v44, %v3009_v4  ;;  %v3012_v29 = vadd.f32 %v4006_v22, %v6142_v57  ;;  %v3003_v33 = vpop.f32.mrb[103].mxu0 }
 0xdaa   : > { %v3004_v28 = vadd.f32 %v6142_v57, %v3003_v33  ;;  %v6177_v3 = vadd.f32 %v4489_v63, %v3001_v55 }
 0xdab   : > { %v6171_v47 = vadd.f32 %v4488_v26, %v3012_v29  ;;  %v4009_v59 = vpop.f32.mrb[80].mxu1 }
 0xdac   : > { %3075 = vadd.xlane.f32.xlu0 %v6166_v13  ;;  %v3016_v58 = vpop.f32.mrb[81].mxu1  ;;  %v3025_v45 = vadd.f32 %v4009_v59, %v6142_v57  ;;  %v6181_v0 = vadd.f32 %v4490_v61, %v3004_v28 }
 0xdad   : > { %3077 = vadd.xlane.f32.xlu1 %v6171_v47  ;;  %v4010_v37 = vpop.f32.mrb[82].mxu1  ;;  %v3017_v1 = vadd.f32 %v6142_v57, %v3016_v58 }
 0xdae   : > { %v3019_v41 = vpop.f32.mrb[83].mxu1  ;;  %v3028_v6 = vadd.f32 %v4010_v37, %v6142_v57  ;;  %v6187_v40 = vadd.f32 %v4491_v62, %v3025_v45 }
 0xdaf   : > { %v3020_v54 = vadd.f32 %v6142_v57, %v3019_v41  ;;  %v6197_v16 = vadd.f32 %v4493_v35, %v3017_v1 }
 0xdb0   : > { %3071 = vadd.xlane.f32.xlu0 %v6177_v3  ;;  %v6191_v18 = vadd.f32 %v4492_v20, %v3028_v6 }
 0xdb1   : > { %3073 = vadd.xlane.f32.xlu1 %v6181_v0  ;;  %v6200_v50 = vadd.f32 %v4494_v17, %v3020_v54 }
 0xdb4   : > { %3083 = vadd.xlane.f32.xlu0 %v6187_v40 }
 0xdb5   : > { %3085 = vadd.xlane.f32.xlu1 %v6191_v18 }
 0xdb8   : > { %3079 = vadd.xlane.f32.xlu0 %v6197_v16 }
 0xdb9   : > { %3081 = vadd.xlane.f32.xlu1 %v6200_v50 }
 0xdd7   : > { %v4013_v11 = vpop.f32.mrb[84].mxu1 }
 0xdd8   : > { %v3041_v14 = vadd.f32 %v4013_v11, %v6142_v57  ;;  %v3032_v56 = vpop.f32.mrb[85].mxu1 }
 0xdd9   : > { %v3033_v38 = vadd.f32 %v6142_v57, %v3032_v56  ;;  %v4014_v9 = vpop.f32.mrb[86].mxu1 }
 0xdda   : > { %v3044_v36 = vadd.f32 %v4014_v9, %v6142_v57  ;;  %v3035_v21 = vpop.f32.mrb[87].mxu1  ;;  %v6216_v25 = vadd.f32 %v4497_v10, %v3041_v14 }
 0xddb   : > { %v6208_v23 = vadd.f32 %v4495_v15, %v3033_v38  ;;  %v3036_v42 = vadd.f32 %v6142_v57, %v3035_v21 }
 0xddc   : > { %v6220_v5 = vadd.f32 %v4498_v8, %v3044_v36 }
 0xddd   : > { %v6212_v34 = vadd.f32 %v4496_v39, %v3036_v42  ;;  %3087 = vadd.xlane.f32.xlu0 %v6208_v23 }
 0xddf   : > { %3089 = vadd.xlane.f32.xlu1 %v6212_v34 }
 0xde1   : > { %3091 = vadd.xlane.f32.xlu0 %v6216_v25 }
 0xde3   : > { %3093 = vadd.xlane.f32.xlu1 %v6220_v5 }
 0xe2d   : > { %v3068_v12 = vpop.xlane.xlu0 %3067 }
 0xe2e   : > { %v3098_v2 = vmul.f32 0.0078125, %v3068_v12 }
 0xe30   : > { %v6225_v57 = vsub.f32 %v6146_v19, %v3098_v2  ;;  %v3066_v32 = vpop.xlane.xlu1 %3065 }
 0xe31   : > { %v3064_v52 = vpop.xlane.xlu0 %3063  ;;  %v3097_v46 = vmul.f32 0.0078125, %v3066_v32 }
 0xe32   : > { %v3096_v31 = vmul.f32 0.0078125, %v3064_v52  ;;  %v3130_v7 = vmul.f32 %v6225_v57, %v6225_v57 }
 0xe33   : > { %v6238_v4 = vsub.f32 %v6152_v60, %v3097_v46 }
 0xe34   : > { %v6230_v51 = vsub.f32 %v6155_v49, %v3096_v31  ;;  %3148 = vadd.xlane.f32.xlu0 %v3130_v7 }
 0xe35   : > { %v3070_v43 = vpop.xlane.xlu0 %3069  ;;  %v3129_v28 = vmul.f32 %v6238_v4, %v6238_v4 }
 0xe36   : > { %v3099_v53 = vmul.f32 0.0078125, %v3070_v43  ;;  %v3128_v48 = vmul.f32 %v6230_v51, %v6230_v51 }
 0xe38   : > { %v6235_v24 = vsub.f32 %v6161_v27, %v3099_v53  ;;  %3144 = vadd.xlane.f32.xlu0 %v3128_v48 }
 0xe39   : > { %v3076_v19 = vpop.xlane.xlu0 %3075 }
 0xe3a   : > { %v3102_v30 = vmul.f32 0.0078125, %v3076_v19  ;;  %v3078_v22 = vpop.xlane.xlu1 %3077  ;;  %v3131_v49 = vmul.f32 %v6235_v24, %v6235_v24 }
 0xe3b   : > { %v3103_v44 = vmul.f32 0.0078125, %v3078_v22 }
 0xe3c   : > { %v6243_v29 = vsub.f32 %v6166_v13, %v3102_v30  ;;  %3150 = vadd.xlane.f32.xlu1 %v3131_v49 }
 0xe3d   : > { %v3072_v33 = vpop.xlane.xlu0 %3071  ;;  %v6246_v55 = vsub.f32 %v6171_v47, %v3103_v44  ;;  %v6307_v44 = vld [vmem:[%s6440_s8] ss:$0 sm:$0xff] }
 0xe3e   : > { %v3100_v27 = vmul.f32 0.0078125, %v3072_v33  ;;  %v3074_v26 = vpop.xlane.xlu1 %3073  ;;  %v3134_v60 = vmul.f32 %v6243_v29, %v6243_v29 }
 0xe3f   : > { %v3101_v59 = vmul.f32 0.0078125, %v3074_v26  ;;  %v3135_v41 = vmul.f32 %v6246_v55, %v6246_v55 }
 0xe40   : > { %v6253_v58 = vsub.f32 %v6177_v3, %v3100_v27  ;;  %3156 = vadd.xlane.f32.xlu0 %v3134_v60  ;;  %3146 = vadd.xlane.f32.xlu1 %v3129_v28 }
 0xe41   : > { %v3084_v13 = vpop.xlane.xlu0 %3083  ;;  %v6256_v37 = vsub.f32 %v6181_v0, %v3101_v59  ;;  %v6313_v59 = vld [vmem:[%s6513_s23] ss:$0 sm:$0xff] }
 0xe42   : > { %v3106_v47 = vmul.f32 0.0078125, %v3084_v13  ;;  %v3086_v63 = vpop.xlane.xlu1 %3085  ;;  %v3132_v45 = vmul.f32 %v6253_v58, %v6253_v58 }
 0xe43   : > { %v3107_v61 = vmul.f32 0.0078125, %v3086_v63  ;;  %v3133_v54 = vmul.f32 %v6256_v37, %v6256_v37 }
 0xe44   : > { %v6263_v6 = vsub.f32 %v6187_v40, %v3106_v47  ;;  %3152 = vadd.xlane.f32.xlu0 %v3132_v45  ;;  %3158 = vadd.xlane.f32.xlu1 %v3135_v41 }
 0xe45   : > { %v3080_v3 = vpop.xlane.xlu0 %3079  ;;  %v6266_v62 = vsub.f32 %v6191_v18, %v3107_v61 }
 0xe46   : > { %v3104_v0 = vmul.f32 0.0078125, %v3080_v3  ;;  %v3082_v1 = vpop.xlane.xlu1 %3081  ;;  %v3138_v20 = vmul.f32 %v6263_v6, %v6263_v6 }
 0xe47   : > { %v3105_v35 = vmul.f32 0.0078125, %v3082_v1  ;;  %v3139_v11 = vmul.f32 %v6266_v62, %v6266_v62 }
 0xe48   : > { %v6273_v17 = vsub.f32 %v6197_v16, %v3104_v0  ;;  %3164 = vadd.xlane.f32.xlu0 %v3138_v20  ;;  %3154 = vadd.xlane.f32.xlu1 %v3133_v54 }
 0xe49   : > { %v6276_v40 = vsub.f32 %v6200_v50, %v3105_v35 }
 0xe4a   : > { %v3136_v18 = vmul.f32 %v6273_v17, %v6273_v17 }
 0xe4b   : > { %v3137_v14 = vmul.f32 %v6276_v40, %v6276_v40 }
 0xe4c   : > { %3160 = vadd.xlane.f32.xlu0 %v3136_v18  ;;  %3166 = vadd.xlane.f32.xlu1 %v3139_v11 }
 0xe50   : > { %3162 = vadd.xlane.f32.xlu1 %v3137_v14 }
 0xe6a   : > { %v3088_v56 = vpop.xlane.xlu0 %3087 }
 0xe6b   : > { %v3108_v16 = vmul.f32 0.0078125, %v3088_v56 }
 0xe6c   : > { %v3090_v38 = vpop.xlane.xlu1 %3089 }
 0xe6d   : > { %v6285_v9 = vsub.f32 %v6208_v23, %v3108_v16  ;;  %v3109_v50 = vmul.f32 0.0078125, %v3090_v38 }
 0xe6e   : > { %v3092_v36 = vpop.xlane.xlu0 %3091 }
 0xe6f   : > { %v6288_v21 = vsub.f32 %v6212_v34, %v3109_v50  ;;  %v3110_v15 = vmul.f32 0.0078125, %v3092_v36  ;;  %v3140_v42 = vmul.f32 %v6285_v9, %v6285_v9 }
 0xe70   : > { %v3094_v39 = vpop.xlane.xlu1 %3093 }
 0xe71   : > { %v6293_v10 = vsub.f32 %v6216_v25, %v3110_v15  ;;  %v3111_v8 = vmul.f32 0.0078125, %v3094_v39  ;;  %3168 = vadd.xlane.f32.xlu0 %v3140_v42  ;;  %v3141_v12 = vmul.f32 %v6288_v21, %v6288_v21 }
 0xe73   : > { %v6298_v23 = vsub.f32 %v6220_v5, %v3111_v8  ;;  %3170 = vadd.xlane.f32.xlu1 %v3141_v12  ;;  %v3142_v34 = vmul.f32 %v6293_v10, %v6293_v10 }
 0xe75   : > { %3172 = vadd.xlane.f32.xlu0 %v3142_v34  ;;  %v3143_v2 = vmul.f32 %v6298_v23, %v6298_v23 }
 0xe77   : > { %3174 = vadd.xlane.f32.xlu1 %v3143_v2 }
 0xec1   : > { %v3149_v52 = vpop.xlane.xlu0 %3148 }
 0xec2   : > { %v3178_v25 = vmul.f32 0.0078125, %v3149_v52 }
 0xec4   : > { %v3194_v31 = vadd.f32 1e-05, %v3178_v25 }
 0xec5   : > { %v3145_v7 = vpop.xlane.xlu0 %3144 }
 0xec6   : > { %4451 = vrsqrt.f32 %v3194_v31  ;;  %v3176_v32 = vmul.f32 0.0078125, %v3145_v7 }
 0xec8   : > { %v3192_v43 = vadd.f32 1e-05, %v3176_v32 }
 0xec9   : > { %v3151_v46 = vpop.xlane.xlu1 %3150 }
 0xeca   : > { %4453 = vrsqrt.f32 %v3192_v43  ;;  %v3179_v5 = vmul.f32 0.0078125, %v3151_v46 }
 0xecc   : > { %v3195_v53 = vadd.f32 1e-05, %v3179_v5 }
 0xecd   : > { %v3157_v48 = vpop.xlane.xlu0 %3156  ;;  %v3147_v19 = vpop.xlane.xlu1 %3146 }
 0xece   : > { %4455 = vrsqrt.f32 %v3195_v53  ;;  %v3182_v30 = vmul.f32 0.0078125, %v3157_v48  ;;  %v3177_v22 = vmul.f32 0.0078125, %v3147_v19 }
 0xed0   : > { %v4452_v49 = vpop.eup %4451  ;;  %v3198_v33 = vadd.f32 1e-05, %v3182_v30  ;;  %v3193_v27 = vadd.f32 1e-05, %v3177_v22 }
 0xed1   : > { %v3226_v26 = vmul.f32 %v4452_v49, %v6225_v57  ;;  %v3153_v60 = vpop.xlane.xlu0 %3152  ;;  %v3159_v28 = vpop.xlane.xlu1 %3158 }
 0xed2   : > { %4457 = vrsqrt.f32 %v3198_v33  ;;  %v3180_v13 = vmul.f32 0.0078125, %v3153_v60  ;;  %v3183_v47 = vmul.f32 0.0078125, %v3159_v28 }
 0xed3   : > { %v3249_v63 = vmul.f32 %v6307_v44, %v3226_v26  ;;  %4459 = vrsqrt.f32 %v3193_v27 }
 0xed4   : > { %v4454_v45 = vpop.eup %4453  ;;  %v3196_v41 = vadd.f32 1e-05, %v3180_v13  ;;  %v3199_v61 = vadd.f32 1e-05, %v3183_v47 }
 0xed5   : > { %v3272_v3 = vadd.f32 %v6313_v59, %v3249_v63  ;;  %v3224_v57 = vmul.f32 %v4454_v45, %v6230_v51  ;;  %v3165_v0 = vpop.xlane.xlu0 %3164  ;;  %v3155_v1 = vpop.xlane.xlu1 %3154 }
 0xed6   : > { %4461 = vrsqrt.f32 %v3196_v41  ;;  %v3186_v20 = vmul.f32 0.0078125, %v3165_v0  ;;  %v3181_v54 = vmul.f32 0.0078125, %v3155_v1 }
 0xed7   : > { %3288 = vst [vmem:[%s6319_s9 + $0x10] sm:$0xff] %v3272_v3  ;;  %v3247_v35 = vmul.f32 %v6307_v44, %v3224_v57  ;;  %4463 = vrsqrt.f32 %v3199_v61 }
 0xed8   : > { %v4456_v18 = vpop.eup %4455  ;;  %v3202_v11 = vadd.f32 1e-05, %v3186_v20  ;;  %v3197_v14 = vadd.f32 1e-05, %v3181_v54 }
 0xed9   : > { %v3270_v56 = vadd.f32 %v6313_v59, %v3247_v35  ;;  %v3227_v51 = vmul.f32 %v4456_v18, %v6235_v24  ;;  %v3161_v16 = vpop.xlane.xlu0 %3160  ;;  %v3167_v38 = vpop.xlane.xlu1 %3166 }
 0xeda   : > { %4465 = vrsqrt.f32 %v3202_v11  ;;  %v3184_v50 = vmul.f32 0.0078125, %v3161_v16  ;;  %v3187_v36 = vmul.f32 0.0078125, %v3167_v38 }
 0xedb   : > { %3286 = vst [vmem:[%s6319_s9] sm:$0xff] %v3270_v56  ;;  %v3250_v15 = vmul.f32 %v6307_v44, %v3227_v51  ;;  %4467 = vrsqrt.f32 %v3197_v14 }
 0xedc   : > { %v4458_v42 = vpop.eup %4457  ;;  %v3200_v39 = vadd.f32 1e-05, %v3184_v50  ;;  %v3203_v8 = vadd.f32 1e-05, %v3187_v36 }
 0xedd   : > { %v4460_v12 = vpop.eup %4459  ;;  %v3273_v34 = vadd.f32 %v6313_v59, %v3250_v15  ;;  %v3230_v2 = vmul.f32 %v4458_v42, %v6243_v29  ;;  %v3163_v52 = vpop.xlane.xlu1 %3162 }
 0xede   : > { %v3225_v24 = vmul.f32 %v4460_v12, %v6238_v4  ;;  %4469 = vrsqrt.f32 %v3200_v39  ;;  %v3185_v25 = vmul.f32 0.0078125, %v3163_v52 }
 0xedf   : > { %3289 = vst [vmem:[%s6319_s9 + $0x18] sm:$0xff] %v3273_v34  ;;  %v3253_v31 = vmul.f32 %v6307_v44, %v3230_v2  ;;  %4471 = vrsqrt.f32 %v3203_v8 }
 0xee0   : > { %v4462_v7 = vpop.eup %4461  ;;  %v3248_v32 = vmul.f32 %v6307_v44, %v3225_v24  ;;  %v3201_v43 = vadd.f32 1e-05, %v3185_v25 }
 0xee1   : > { %v4464_v46 = vpop.eup %4463  ;;  %v3276_v5 = vadd.f32 %v6313_v59, %v3253_v31  ;;  %v3228_v29 = vmul.f32 %v4462_v7, %v6253_v58 }
 0xee2   : > { %v3271_v53 = vadd.f32 %v6313_v59, %v3248_v32  ;;  %v3231_v4 = vmul.f32 %v4464_v46, %v6246_v55  ;;  %4473 = vrsqrt.f32 %v3201_v43 }
 0xee3   : > { %3292 = vst [vmem:[%s6319_s9 + $0x30] sm:$0xff] %v3276_v5  ;;  %v3251_v48 = vmul.f32 %v6307_v44, %v3228_v29 }
 0xee4   : > { %v4466_v19 = vpop.eup %4465  ;;  %3287 = vst [vmem:[%s6319_s9 + $0x8] sm:$0xff] %v3271_v53  ;;  %v3254_v30 = vmul.f32 %v6307_v44, %v3231_v4 }
 0xee5   : > { %v4468_v22 = vpop.eup %4467  ;;  %v3274_v49 = vadd.f32 %v6313_v59, %v3251_v48  ;;  %v3234_v33 = vmul.f32 %v4466_v19, %v6263_v6 }
 0xee6   : > { %v3277_v58 = vadd.f32 %v6313_v59, %v3254_v30  ;;  %v3229_v27 = vmul.f32 %v4468_v22, %v6256_v37 }
 0xee7   : > { %3290 = vst [vmem:[%s6319_s9 + $0x20] sm:$0xff] %v3274_v49  ;;  %v3257_v55 = vmul.f32 %v6307_v44, %v3234_v33 }
 0xee8   : > { %v4470_v26 = vpop.eup %4469  ;;  %3293 = vst [vmem:[%s6319_s9 + $0x38] sm:$0xff] %v3277_v58  ;;  %v3252_v60 = vmul.f32 %v6307_v44, %v3229_v27 }
 0xee9   : > { %v4472_v28 = vpop.eup %4471  ;;  %v3280_v13 = vadd.f32 %v6313_v59, %v3257_v55  ;;  %v3232_v6 = vmul.f32 %v4470_v26, %v6273_v17 }
 0xeea   : > { %v3275_v47 = vadd.f32 %v6313_v59, %v3252_v60  ;;  %v3235_v63 = vmul.f32 %v4472_v28, %v6266_v62 }
 0xeeb   : > { %3296 = vst [vmem:[%s6319_s9 + $0x50] sm:$0xff] %v3280_v13  ;;  %v3255_v37 = vmul.f32 %v6307_v44, %v3232_v6 }
 0xeec   : > { %v4474_v45 = vpop.eup %4473  ;;  %3291 = vst [vmem:[%s6319_s9 + $0x28] sm:$0xff] %v3275_v47  ;;  %v3258_v41 = vmul.f32 %v6307_v44, %v3235_v63 }
 0xeed   : > { %v3278_v61 = vadd.f32 %v6313_v59, %v3255_v37  ;;  %v3233_v3 = vmul.f32 %v4474_v45, %v6276_v40 }
 0xeee   : > { %v3281_v57 = vadd.f32 %v6313_v59, %v3258_v41 }
 0xeef   : > { %3294 = vst [vmem:[%s6319_s9 + $0x40] sm:$0xff] %v3278_v61  ;;  %v3256_v17 = vmul.f32 %v6307_v44, %v3233_v3 }
 0xef0   : > { %3297 = vst [vmem:[%s6319_s9 + $0x58] sm:$0xff] %v3281_v57 }
 0xef1   : > { %v3279_v0 = vadd.f32 %v6313_v59, %v3256_v17 }
 0xef3   : > { %3295 = vst [vmem:[%s6319_s9 + $0x48] sm:$0xff] %v3279_v0 }
 0xefe   : > { %v3169_v62 = vpop.xlane.xlu0 %3168 }
 0xeff   : > { %v3188_v1 = vmul.f32 0.0078125, %v3169_v62 }
 0xf00   : > { %v3171_v20 = vpop.xlane.xlu1 %3170 }
 0xf01   : > { %v3204_v54 = vadd.f32 1e-05, %v3188_v1  ;;  %v3189_v35 = vmul.f32 0.0078125, %v3171_v20 }
 0xf02   : > { %v3173_v18 = vpop.xlane.xlu0 %3172 }
 0xf03   : > { %4475 = vrsqrt.f32 %v3204_v54  ;;  %v3205_v11 = vadd.f32 1e-05, %v3189_v35  ;;  %v3190_v14 = vmul.f32 0.0078125, %v3173_v18 }
 0xf04   : > { %v3175_v56 = vpop.xlane.xlu1 %3174 }
 0xf05   : > { %4477 = vrsqrt.f32 %v3205_v11  ;;  %v3206_v40 = vadd.f32 1e-05, %v3190_v14  ;;  %v3191_v51 = vmul.f32 0.0078125, %v3175_v56 }
 0xf07   : > { %4479 = vrsqrt.f32 %v3206_v40  ;;  %v3207_v16 = vadd.f32 1e-05, %v3191_v51 }
 0xf09   : > { %4481 = vrsqrt.f32 %v3207_v16 }
 0xf0d   : > { %v4476_v38 = vpop.eup %4475 }
 0xf0e   : > { %v3236_v50 = vmul.f32 %v4476_v38, %v6285_v9 }
 0xf0f   : > { %v4478_v36 = vpop.eup %4477 }
 0xf10   : > { %v3259_v15 = vmul.f32 %v6307_v44, %v3236_v50  ;;  %v3237_v42 = vmul.f32 %v4478_v36, %v6288_v21 }
 0xf11   : > { %v4480_v39 = vpop.eup %4479 }
 0xf12   : > { %v3282_v8 = vadd.f32 %v6313_v59, %v3259_v15  ;;  %v3260_v12 = vmul.f32 %v6307_v44, %v3237_v42  ;;  %v3238_v34 = vmul.f32 %v4480_v39, %v6293_v10 }
 0xf13   : > { %v4482_v2 = vpop.eup %4481 }
 0xf14   : > { %3298 = vst [vmem:[%s6319_s9 + $0x60] sm:$0xff] %v3282_v8  ;;  %v3283_v52 = vadd.f32 %v6313_v59, %v3260_v12  ;;  %v3261_v9 = vmul.f32 %v6307_v44, %v3238_v34  ;;  %v3239_v24 = vmul.f32 %v4482_v2, %v6298_v23 }
 0xf16   : > { %3299 = vst [vmem:[%s6319_s9 + $0x68] sm:$0xff] %v3283_v52  ;;  %v3284_v21 = vadd.f32 %v6313_v59, %v3261_v9  ;;  %v3262_v25 = vmul.f32 %v6307_v44, %v3239_v24 }
 0xf18   : > { %3300 = vst [vmem:[%s6319_s9 + $0x70] sm:$0xff] %v3284_v21  ;;  %v3285_v10 = vadd.f32 %v6313_v59, %v3262_v25 }
 0xf1a   : > { %3301 = vst [vmem:[%s6319_s9 + $0x78] sm:$0xff] %v3285_v10 }
 0xf1b   : > { %4656 = shalt.err (!%p4653_p3)
}
 0xf1c   : > { %s4657_s29 = scalar_lea.hbm %s6383_s27, 2048  ;;  %s4661_s30 = scalar_lea.hbm %s6514_s19, 4096 }
 0xf1d   : > { %p4658_p9 = scmp.ne.s32.totalorder %s6383_s27, %s4657_s29  ;;  %p4662_p7 = scmp.lt.u32.totalorder %s6383_s27, %s6514_s19 }
 0xf1e   : > { %p4663_p12 = scmp.lt.u32.totalorder %s4661_s30, %s4657_s29  ;;  %p4665_p2 = scmp.lt.u32.totalorder %s4657_s29, %s6383_s27 }
 0xf1f   : > { %p4659_p13 = pnand %p4658_p9, %p4939_p5 }
 0xf20   : > { %p4664_p1 = por %p4663_p12, %p4662_p7 }
 0xf21   : > { %p4660_p11 = pneg %p4659_p13 }
 0xf22   : > { %p4666_p4 = por %p4665_p2, %p4664_p1 }
 0xf24   : > { %p4667_p0 = pnand %p4666_p4, %p4660_p11 }
 0xf26   : > { %4670 = shalt.err (!%p4667_p0)
}
 0xf27   : > { %s4737_s0 = smov 128   ;;  %s4738_s23 = smov 8  }
 0xf28   : > { %4079 = dma.vmem_to_hbm [thread:$0]  (%p4939_p5), %s6385_s21, 2048, %s6383_s27, %s3303_s17, %s4737_s0, %s4737_s0, %s4738_s23  }
 0xf29 PF: > { %s6515_s9 = sld [smem:[#allocation18_spill]]  ;;  %s6516_s2 = sld [smem:[#allocation19_spill]] }
 0xf2a   : > { %p6518_p6 = scmp.ge.s32.totalorder %s4721_s16, 2 }
 0xf2f   : > { %s3331_s28 = sand.u32 1, %s6515_s9   ;;  %p6517_p8 = scmp.ne.s32.totalorder %s6516_s2, 0 }
 0xf30   : > { %s3332_s4 = scalar_lea.sflag [#allocation5], %s3331_s28 }
 0xf31   : > { %p4099_p10 = pnand %p6518_p6, %p6517_p8 }
 0xf33   : > { %4704 = dma.done.wait (!%p4099_p10), %s3332_s4, 2048  }
 0xf34   : > { %4706 = vsyncadd (!%p4099_p10), %s3332_s4, 4294965248  ;;  %s6519_s22 = sld [smem:[#allocation20_spill]]  ;;  %p27_p3 = scmp.ge.s32.totalorder %s4907_s18, 4  }
 0xf35   : > { %s6520_s13 = smov %s4713_s14  ;;  %s6521_s14 = smov %s4717_s15 }
 0xf36   : > { %s6523_s16 = smov %s4907_s18  ;;  %29 = sbr.rel (!%p27_p3) target bundleno = 15 (0xf), region = 130 }
 0xf3a   : > { %s6522_s15 = smov %s6519_s22 }
 0xf3d   :  { %3337 = vsyncpa [#allocation4], 1 }
 0xf3e   :  { %3339 = vsyncpa [#allocation4 + $0x1], 1 }
 0xf3f   :  { %3340 = vsyncpa [#allocation7], 1 }
 0xf40   :  { %3342 = vsyncpa [#allocation7 + $0x1], 1 }
 0xf41   :  { %3343 = vsyncpa [#allocation10], 1 }
 0xf42   :  { %3344 = vsyncpa [#allocation5], 1 }
 0xf43   :  { %3346 = vsyncpa [#allocation5 + $0x1], 1 }

</bundles_post_ra>
